<compile_context>
chip_gen: v5e
topology: v5e:2x2
jax: 0.10.0
libtpu: 0.0.40
codegen_flags: <defaults>
</compile_context>

<pallas_src>
import jax
import jax.numpy as jnp
from jax import lax
from jax.experimental import pallas as pl
from jax.experimental.pallas import tpu as pltpu


NEG_BIG = -1e30  # fill for padded vocab lanes (never wins max/argmax)


def _round_up(x, m):
    return ((x + m - 1) // m) * m


def make_gru_decoder_kernel(L, T, Bp, Vp, H, unroll):
    """refs: h0, fused_emb, W_i(stacked), W_h(stacked), b_rz, b_in, b_hn, fc_w, fc_b, out."""
    H2, H3 = 2 * H, 3 * H

    def kernel(h0_ref, femb_ref, wi_ref, wh_ref, brz_ref, bin_ref, bhn_ref,
               fcw_ref, fcb_ref, out_ref):
        # ---- hoisted loop-invariant loads (JAX does not CSE broadcasts) ----
        lane_iota = lax.broadcasted_iota(jnp.int32, (Bp, Vp), 1)
        femb = femb_ref[...]                        # (Vp, 3H) bf16 = emb @ W_i[0]^T
        fcw = fcw_ref[...]                          # (H, Vp)  bf16
        fcb = fcb_ref[...]                          # (1, Vp)  f32 (pad lanes -1e30)
        wi = [wi_ref[l] for l in range(1, L)]       # (H, 3H)  bf16, layers 1..L-1
        wh = [wh_ref[l] for l in range(L)]          # (H, 3H)  bf16
        brz = [brz_ref[l] for l in range(L)]        # (1, 2H)  f32  b_ih+b_hh (r|z)
        bin_ = [bin_ref[l] for l in range(L)]       # (1, H)   f32  b_ih (n)
        bhn = [bhn_ref[l] for l in range(L)]        # (1, H)   f32  b_hh (n)

        h_init = tuple(h0_ref[l] for l in range(L))             # L x (Bp, H) f32
        tok_init = (lane_iota == 0).astype(jnp.bfloat16)         # start token 0

        def step(t, carry):
            h, tok = carry
            new_h = []
            x = None
            for l in range(L):
                h_prev = h[l]
                if l == 0:
                    # embedding lookup fused into the layer-0 input projection
                    gi = jnp.dot(tok, femb, preferred_element_type=jnp.float32)
                else:
                    gi = jnp.dot(x.astype(jnp.bfloat16), wi[l - 1],
                                 preferred_element_type=jnp.float32)
                gh = jnp.dot(h_prev.astype(jnp.bfloat16), wh[l],
                             preferred_element_type=jnp.float32)
                # PyTorch GRU gate math, gate order r | z | n
                rz = jax.nn.sigmoid(gi[:, 0:H2] + gh[:, 0:H2] + brz[l])
                r = rz[:, 0:H]
                z = rz[:, H:H2]
                n = jnp.tanh(gi[:, H2:H3] + bin_[l] + r * (gh[:, H2:H3] + bhn[l]))
                h_new = (1.0 - z) * n + z * h_prev
                new_h.append(h_new)
                x = h_new

            logits = jnp.dot(x.astype(jnp.bfloat16), fcw,
                             preferred_element_type=jnp.float32) + fcb
            out_ref[t] = logits                                  # lane-dense store

            # greedy argmax (first-max tie-break) -> next one-hot token
            mx = jnp.max(logits, axis=1, keepdims=True)
            arg = jnp.min(jnp.where(logits == mx, lane_iota, Vp),
                          axis=1, keepdims=True)
            tok_new = (lane_iota == arg).astype(jnp.bfloat16)
            return (tuple(new_h), tok_new)

        lax.fori_loop(0, T, step, (h_init, tok_init), unroll=unroll)

    return kernel


def init_params(key, vocab_size, latent_dim, gru_hidden_dim, num_layers):
    """Deterministic synthetic init matching the nn.Module's parameter shapes."""
    V, E, H, L = vocab_size, latent_dim, gru_hidden_dim, num_layers
    keys = iter(jax.random.split(key, 5 + 4 * L))   # exactly the number consumed

    def unif(k, shape, bound):
        return jax.random.uniform(k, shape, jnp.float32, -bound, bound)

    params = {}
    params["embedding"] = jax.random.normal(next(keys), (V, E), jnp.float32)
    kh = 1.0 / (H ** 0.5)
    gru = []
    for _ in range(L):
        in_l = E if not gru else H
        gru.append(dict(
            w_ih=unif(next(keys), (3 * H, in_l), kh),
            w_hh=unif(next(keys), (3 * H, H), kh),
            b_ih=unif(next(keys), (3 * H,), kh),
            b_hh=unif(next(keys), (3 * H,), kh),
        ))
    params["gru"] = gru
    params["fc_w"] = unif(next(keys), (V, H), kh)
    params["fc_b"] = unif(next(keys), (V,), kh)
    ke = 1.0 / (E ** 0.5)
    params["lth_w"] = unif(next(keys), (H * L, E), ke)
    params["lth_b"] = unif(next(keys), (H * L,), ke)
    return params


def gru_decoder_2_forward(z, max_length, params, vocab_size, latent_dim,
                          gru_hidden_dim, num_layers):
    V, E, H, L, T = vocab_size, latent_dim, gru_hidden_dim, num_layers, max_length
    B = z.shape[0]
    Bp = max(8, _round_up(B, 8))      # sublane-aligned batch
    Vp = max(128, _round_up(V, 128))  # lane-dense vocab

    # latent -> initial hidden (plain-JAX glue); reshape reproduces the torch
    # (B, L*H).view(L, B, H) row-major reinterpretation; pad batch.
    hidden_flat = z.astype(jnp.float32) @ params["lth_w"].T + params["lth_b"]
    h0 = hidden_flat.reshape(L, B, H)
    h0 = jnp.pad(h0, ((0, 0), (0, Bp - B), (0, 0)))

    # fused embedding table: one-hot @ (emb @ W_ih0^T) == emb[tok] @ W_ih0^T
    emb_p = jnp.pad(params["embedding"], ((0, Vp - V), (0, 0)))            # (Vp, E)
    femb = (emb_p @ params["gru"][0]["w_ih"].T).astype(jnp.bfloat16)       # (Vp, 3H)

    # stacked per-layer weights (row 0 of wi_all is unused: fused into femb)
    wi_all = jnp.zeros((L, H, 3 * H), jnp.float32)
    for l in range(1, L):
        wi_all = wi_all.at[l].set(params["gru"][l]["w_ih"].T)
    wi_all = wi_all.astype(jnp.bfloat16)
    wh_all = jnp.stack([params["gru"][l]["w_hh"].T
                        for l in range(L)]).astype(jnp.bfloat16)           # (L, H, 3H)

    # pre-folded biases: (b_ih+b_hh) for r/z; b_ih_n and b_hh_n kept separate
    brz, bin_, bhn = [], [], []
    for l in range(L):
        b_ih = params["gru"][l]["b_ih"]
        b_hh = params["gru"][l]["b_hh"]
        brz.append((b_ih[:2 * H] + b_hh[:2 * H]).reshape(1, 2 * H))
        bin_.append(b_ih[2 * H:].reshape(1, H))
        bhn.append(b_hh[2 * H:].reshape(1, H))
    brz_all = jnp.stack(brz)          # (L, 1, 2H)
    bin_all = jnp.stack(bin_)         # (L, 1, H)
    bhn_all = jnp.stack(bhn)          # (L, 1, H)

    # output projection padded to a full 128-lane slab; pad lanes get -1e30
    fcw_p = jnp.pad(params["fc_w"].T, ((0, 0), (0, Vp - V))).astype(jnp.bfloat16)
    fcb_p = jnp.pad(params["fc_b"], ((0, Vp - V),),
                    constant_values=NEG_BIG).reshape(1, Vp)                # (1, Vp) f32

    kernel = make_gru_decoder_kernel(L, T, Bp, Vp, H, unroll=min(T, 8))

    vmem = pl.BlockSpec(memory_space=pltpu.MemorySpace.VMEM)
    out_tbv = pl.pallas_call(
        kernel,
        out_shape=jax.ShapeDtypeStruct((T, Bp, Vp), jnp.float32),
        in_specs=[vmem] * 9,
        out_specs=vmem,
    )(h0, femb, wi_all, wh_all, brz_all, bin_all, bhn_all, fcw_p, fcb_p)

    # (T, Bp, Vp) time-major -> PyTorch convention (batch, max_length, vocab).
    # TODO(synk): at scale keep time-major (saves a full HBM re-read/write, v5e).
    return jnp.transpose(out_tbv, (1, 0, 2))[:B, :, :V]


if __name__ == "__main__":
    vocab_size = 64
    latent_dim = 32
    gru_hidden_dim = 32
    num_layers = 3
    batch = 2
    max_length = 8

    key = jax.random.PRNGKey(0)
    pkey, zkey = jax.random.split(key)
    params = init_params(pkey, vocab_size, latent_dim, gru_hidden_dim, num_layers)
    z = jax.random.normal(zkey, (batch, latent_dim), jnp.float32)

    out = gru_decoder_2_forward(z, max_length, params, vocab_size, latent_dim,
                                gru_hidden_dim, num_layers)
    out = jax.block_until_ready(out)
    assert out.shape == (batch, max_length, vocab_size), out.shape
    assert bool(jnp.all(jnp.isfinite(out))), "non-finite logits"
    print("KERNEL_OK")
</pallas_src>

<mosaic_0001>
module attributes {stable_mosaic.version = 11 : i64} {
  func.func @kernel(%arg0: memref<3x8x32xf32, #tpu.memory_space<vmem>>, %arg1: memref<128x96xbf16, #tpu.memory_space<vmem>>, %arg2: memref<3x32x96xbf16, #tpu.memory_space<vmem>>, %arg3: memref<3x32x96xbf16, #tpu.memory_space<vmem>>, %arg4: memref<3x1x64xf32, #tpu.memory_space<vmem>>, %arg5: memref<3x1x32xf32, #tpu.memory_space<vmem>>, %arg6: memref<3x1x32xf32, #tpu.memory_space<vmem>>, %arg7: memref<32x128xbf16, #tpu.memory_space<vmem>>, %arg8: memref<1x128xf32, #tpu.memory_space<vmem>>, %arg9: memref<8x8x128xf32, #tpu.memory_space<vmem>>) attributes {dimension_semantics = [], scalar_prefetch = 0 : i64, scratch_operands = 0 : i64, tpu.core_type = #tpu.core_type<tc>} {
    %0 = tpu.iota {dimensions = array<i32: 1>} : vector<8x128xi32>
    %c0 = arith.constant 0 : index
    %c0_0 = arith.constant 0 : index
    %1 = vector.load %arg1[%c0, %c0_0] : memref<128x96xbf16, #tpu.memory_space<vmem>>, vector<128x96xbf16>
    %c0_1 = arith.constant 0 : index
    %c0_2 = arith.constant 0 : index
    %2 = vector.load %arg7[%c0_1, %c0_2] : memref<32x128xbf16, #tpu.memory_space<vmem>>, vector<32x128xbf16>
    %c0_3 = arith.constant 0 : index
    %c0_4 = arith.constant 0 : index
    %3 = vector.load %arg8[%c0_3, %c0_4] : memref<1x128xf32, #tpu.memory_space<vmem>>, vector<1x128xf32>
    %c1 = arith.constant 1 : index
    %c0_5 = arith.constant 0 : index
    %c0_6 = arith.constant 0 : index
    %4 = vector.load %arg2[%c1, %c0_5, %c0_6] : memref<3x32x96xbf16, #tpu.memory_space<vmem>>, vector<1x32x96xbf16>
    %5 = vector.shape_cast %4 : vector<1x32x96xbf16> to vector<32x96xbf16>
    %c2 = arith.constant 2 : index
    %c0_7 = arith.constant 0 : index
    %c0_8 = arith.constant 0 : index
    %6 = vector.load %arg2[%c2, %c0_7, %c0_8] : memref<3x32x96xbf16, #tpu.memory_space<vmem>>, vector<1x32x96xbf16>
    %7 = vector.shape_cast %6 : vector<1x32x96xbf16> to vector<32x96xbf16>
    %c0_9 = arith.constant 0 : index
    %c0_10 = arith.constant 0 : index
    %c0_11 = arith.constant 0 : index
    %8 = vector.load %arg3[%c0_9, %c0_10, %c0_11] : memref<3x32x96xbf16, #tpu.memory_space<vmem>>, vector<1x32x96xbf16>
    %9 = vector.shape_cast %8 : vector<1x32x96xbf16> to vector<32x96xbf16>
    %c1_12 = arith.constant 1 : index
    %c0_13 = arith.constant 0 : index
    %c0_14 = arith.constant 0 : index
    %10 = vector.load %arg3[%c1_12, %c0_13, %c0_14] : memref<3x32x96xbf16, #tpu.memory_space<vmem>>, vector<1x32x96xbf16>
    %11 = vector.shape_cast %10 : vector<1x32x96xbf16> to vector<32x96xbf16>
    %c2_15 = arith.constant 2 : index
    %c0_16 = arith.constant 0 : index
    %c0_17 = arith.constant 0 : index
    %12 = vector.load %arg3[%c2_15, %c0_16, %c0_17] : memref<3x32x96xbf16, #tpu.memory_space<vmem>>, vector<1x32x96xbf16>
    %13 = vector.shape_cast %12 : vector<1x32x96xbf16> to vector<32x96xbf16>
    %c0_18 = arith.constant 0 : index
    %c0_19 = arith.constant 0 : index
    %c0_20 = arith.constant 0 : index
    %14 = vector.load %arg4[%c0_18, %c0_19, %c0_20] : memref<3x1x64xf32, #tpu.memory_space<vmem>>, vector<1x1x64xf32>
    %15 = vector.shape_cast %14 : vector<1x1x64xf32> to vector<1x64xf32>
    %c1_21 = arith.constant 1 : index
    %c0_22 = arith.constant 0 : index
    %c0_23 = arith.constant 0 : index
    %16 = vector.load %arg4[%c1_21, %c0_22, %c0_23] : memref<3x1x64xf32, #tpu.memory_space<vmem>>, vector<1x1x64xf32>
    %17 = vector.shape_cast %16 : vector<1x1x64xf32> to vector<1x64xf32>
    %c2_24 = arith.constant 2 : index
    %c0_25 = arith.constant 0 : index
    %c0_26 = arith.constant 0 : index
    %18 = vector.load %arg4[%c2_24, %c0_25, %c0_26] : memref<3x1x64xf32, #tpu.memory_space<vmem>>, vector<1x1x64xf32>
    %19 = vector.shape_cast %18 : vector<1x1x64xf32> to vector<1x64xf32>
    %c0_27 = arith.constant 0 : index
    %c0_28 = arith.constant 0 : index
    %c0_29 = arith.constant 0 : index
    %20 = vector.load %arg5[%c0_27, %c0_28, %c0_29] : memref<3x1x32xf32, #tpu.memory_space<vmem>>, vector<1x1x32xf32>
    %21 = vector.shape_cast %20 : vector<1x1x32xf32> to vector<1x32xf32>
    %c1_30 = arith.constant 1 : index
    %c0_31 = arith.constant 0 : index
    %c0_32 = arith.constant 0 : index
    %22 = vector.load %arg5[%c1_30, %c0_31, %c0_32] : memref<3x1x32xf32, #tpu.memory_space<vmem>>, vector<1x1x32xf32>
    %23 = vector.shape_cast %22 : vector<1x1x32xf32> to vector<1x32xf32>
    %c2_33 = arith.constant 2 : index
    %c0_34 = arith.constant 0 : index
    %c0_35 = arith.constant 0 : index
    %24 = vector.load %arg5[%c2_33, %c0_34, %c0_35] : memref<3x1x32xf32, #tpu.memory_space<vmem>>, vector<1x1x32xf32>
    %25 = vector.shape_cast %24 : vector<1x1x32xf32> to vector<1x32xf32>
    %c0_36 = arith.constant 0 : index
    %c0_37 = arith.constant 0 : index
    %c0_38 = arith.constant 0 : index
    %26 = vector.load %arg6[%c0_36, %c0_37, %c0_38] : memref<3x1x32xf32, #tpu.memory_space<vmem>>, vector<1x1x32xf32>
    %27 = vector.shape_cast %26 : vector<1x1x32xf32> to vector<1x32xf32>
    %c1_39 = arith.constant 1 : index
    %c0_40 = arith.constant 0 : index
    %c0_41 = arith.constant 0 : index
    %28 = vector.load %arg6[%c1_39, %c0_40, %c0_41] : memref<3x1x32xf32, #tpu.memory_space<vmem>>, vector<1x1x32xf32>
    %29 = vector.shape_cast %28 : vector<1x1x32xf32> to vector<1x32xf32>
    %c2_42 = arith.constant 2 : index
    %c0_43 = arith.constant 0 : index
    %c0_44 = arith.constant 0 : index
    %30 = vector.load %arg6[%c2_42, %c0_43, %c0_44] : memref<3x1x32xf32, #tpu.memory_space<vmem>>, vector<1x1x32xf32>
    %31 = vector.shape_cast %30 : vector<1x1x32xf32> to vector<1x32xf32>
    %c0_45 = arith.constant 0 : index
    %c0_46 = arith.constant 0 : index
    %c0_47 = arith.constant 0 : index
    %32 = vector.load %arg0[%c0_45, %c0_46, %c0_47] : memref<3x8x32xf32, #tpu.memory_space<vmem>>, vector<1x8x32xf32>
    %33 = vector.shape_cast %32 : vector<1x8x32xf32> to vector<8x32xf32>
    %c1_48 = arith.constant 1 : index
    %c0_49 = arith.constant 0 : index
    %c0_50 = arith.constant 0 : index
    %34 = vector.load %arg0[%c1_48, %c0_49, %c0_50] : memref<3x8x32xf32, #tpu.memory_space<vmem>>, vector<1x8x32xf32>
    %35 = vector.shape_cast %34 : vector<1x8x32xf32> to vector<8x32xf32>
    %c2_51 = arith.constant 2 : index
    %c0_52 = arith.constant 0 : index
    %c0_53 = arith.constant 0 : index
    %36 = vector.load %arg0[%c2_51, %c0_52, %c0_53] : memref<3x8x32xf32, #tpu.memory_space<vmem>>, vector<1x8x32xf32>
    %37 = vector.shape_cast %36 : vector<1x8x32xf32> to vector<8x32xf32>
    %c0_i32 = arith.constant 0 : i32
    %38 = vector.broadcast %c0_i32 : i32 to vector<8x128xi32>
    %39 = arith.cmpi eq, %0, %38 : vector<8x128xi32>
    %40 = arith.extui %39 : vector<8x128xi1> to vector<8x128xi32>
    %41 = arith.sitofp %40 : vector<8x128xi32> to vector<8x128xf32>
    %42 = arith.truncf %41 : vector<8x128xf32> to vector<8x128xbf16>
    %c0_i32_54 = arith.constant 0 : i32
    %cst = arith.constant dense<0.000000e+00> : vector<8x96xf32>
    %43 = tpu.matmul %42, %1, %cst {dimension_numbers = #tpu.dot_dimension_numbers<[1], [0], [0], [1], [0, 0, 1, 1], [], []>} : vector<8x128xbf16>, vector<128x96xbf16>, vector<8x96xf32> -> vector<8x96xf32>
    %44 = arith.truncf %33 : vector<8x32xf32> to vector<8x32xbf16>
    %cst_55 = arith.constant dense<0.000000e+00> : vector<8x96xf32>
    %45 = tpu.matmul %44, %9, %cst_55 {dimension_numbers = #tpu.dot_dimension_numbers<[1], [0], [0], [1], [0, 0, 1, 1], [], []>} : vector<8x32xbf16>, vector<32x96xbf16>, vector<8x96xf32> -> vector<8x96xf32>
    %46 = vector.extract_strided_slice %43 {offsets = [0, 0], sizes = [8, 64], strides = [1, 1]} : vector<8x96xf32> to vector<8x64xf32>
    %47 = vector.extract_strided_slice %45 {offsets = [0, 0], sizes = [8, 64], strides = [1, 1]} : vector<8x96xf32> to vector<8x64xf32>
    %48 = arith.addf %46, %47 : vector<8x64xf32>
    %49 = vector.broadcast %15 : vector<1x64xf32> to vector<8x64xf32>
    %50 = arith.addf %48, %49 : vector<8x64xf32>
    %51 = arith.negf %50 : vector<8x64xf32>
    %52 = math.exp %51 : vector<8x64xf32>
    %cst_56 = arith.constant 1.000000e+00 : f32
    %53 = vector.broadcast %cst_56 : f32 to vector<8x64xf32>
    %54 = arith.addf %53, %52 : vector<8x64xf32>
    %55 = arith.divf %53, %54 : vector<8x64xf32>
    %56 = vector.extract_strided_slice %55 {offsets = [0, 0], sizes = [8, 32], strides = [1, 1]} : vector<8x64xf32> to vector<8x32xf32>
    %57 = vector.extract_strided_slice %55 {offsets = [0, 32], sizes = [8, 32], strides = [1, 1]} : vector<8x64xf32> to vector<8x32xf32>
    %58 = vector.extract_strided_slice %43 {offsets = [0, 64], sizes = [8, 32], strides = [1, 1]} : vector<8x96xf32> to vector<8x32xf32>
    %59 = vector.broadcast %21 : vector<1x32xf32> to vector<8x32xf32>
    %60 = arith.addf %58, %59 : vector<8x32xf32>
    %61 = vector.extract_strided_slice %45 {offsets = [0, 64], sizes = [8, 32], strides = [1, 1]} : vector<8x96xf32> to vector<8x32xf32>
    %62 = vector.broadcast %27 : vector<1x32xf32> to vector<8x32xf32>
    %63 = arith.addf %61, %62 : vector<8x32xf32>
    %64 = arith.mulf %56, %63 : vector<8x32xf32>
    %65 = arith.addf %60, %64 : vector<8x32xf32>
    %66 = math.tanh %65 : vector<8x32xf32>
    %cst_57 = arith.constant 1.000000e+00 : f32
    %67 = vector.broadcast %cst_57 : f32 to vector<8x32xf32>
    %68 = arith.subf %67, %57 : vector<8x32xf32>
    %69 = arith.mulf %68, %66 : vector<8x32xf32>
    %70 = arith.mulf %57, %33 : vector<8x32xf32>
    %71 = arith.addf %69, %70 : vector<8x32xf32>
    %72 = arith.truncf %71 : vector<8x32xf32> to vector<8x32xbf16>
    %cst_58 = arith.constant dense<0.000000e+00> : vector<8x96xf32>
    %73 = tpu.matmul %72, %5, %cst_58 {dimension_numbers = #tpu.dot_dimension_numbers<[1], [0], [0], [1], [0, 0, 1, 1], [], []>} : vector<8x32xbf16>, vector<32x96xbf16>, vector<8x96xf32> -> vector<8x96xf32>
    %74 = arith.truncf %35 : vector<8x32xf32> to vector<8x32xbf16>
    %cst_59 = arith.constant dense<0.000000e+00> : vector<8x96xf32>
    %75 = tpu.matmul %74, %11, %cst_59 {dimension_numbers = #tpu.dot_dimension_numbers<[1], [0], [0], [1], [0, 0, 1, 1], [], []>} : vector<8x32xbf16>, vector<32x96xbf16>, vector<8x96xf32> -> vector<8x96xf32>
    %76 = vector.extract_strided_slice %73 {offsets = [0, 0], sizes = [8, 64], strides = [1, 1]} : vector<8x96xf32> to vector<8x64xf32>
    %77 = vector.extract_strided_slice %75 {offsets = [0, 0], sizes = [8, 64], strides = [1, 1]} : vector<8x96xf32> to vector<8x64xf32>
    %78 = arith.addf %76, %77 : vector<8x64xf32>
    %79 = vector.broadcast %17 : vector<1x64xf32> to vector<8x64xf32>
    %80 = arith.addf %78, %79 : vector<8x64xf32>
    %81 = arith.negf %80 : vector<8x64xf32>
    %82 = math.exp %81 : vector<8x64xf32>
    %cst_60 = arith.constant 1.000000e+00 : f32
    %83 = vector.broadcast %cst_60 : f32 to vector<8x64xf32>
    %84 = arith.addf %83, %82 : vector<8x64xf32>
    %85 = arith.divf %83, %84 : vector<8x64xf32>
    %86 = vector.extract_strided_slice %85 {offsets = [0, 0], sizes = [8, 32], strides = [1, 1]} : vector<8x64xf32> to vector<8x32xf32>
    %87 = vector.extract_strided_slice %85 {offsets = [0, 32], sizes = [8, 32], strides = [1, 1]} : vector<8x64xf32> to vector<8x32xf32>
    %88 = vector.extract_strided_slice %73 {offsets = [0, 64], sizes = [8, 32], strides = [1, 1]} : vector<8x96xf32> to vector<8x32xf32>
    %89 = vector.broadcast %23 : vector<1x32xf32> to vector<8x32xf32>
    %90 = arith.addf %88, %89 : vector<8x32xf32>
    %91 = vector.extract_strided_slice %75 {offsets = [0, 64], sizes = [8, 32], strides = [1, 1]} : vector<8x96xf32> to vector<8x32xf32>
    %92 = vector.broadcast %29 : vector<1x32xf32> to vector<8x32xf32>
    %93 = arith.addf %91, %92 : vector<8x32xf32>
    %94 = arith.mulf %86, %93 : vector<8x32xf32>
    %95 = arith.addf %90, %94 : vector<8x32xf32>
    %96 = math.tanh %95 : vector<8x32xf32>
    %cst_61 = arith.constant 1.000000e+00 : f32
    %97 = vector.broadcast %cst_61 : f32 to vector<8x32xf32>
    %98 = arith.subf %97, %87 : vector<8x32xf32>
    %99 = arith.mulf %98, %96 : vector<8x32xf32>
    %100 = arith.mulf %87, %35 : vector<8x32xf32>
    %101 = arith.addf %99, %100 : vector<8x32xf32>
    %102 = arith.truncf %101 : vector<8x32xf32> to vector<8x32xbf16>
    %cst_62 = arith.constant dense<0.000000e+00> : vector<8x96xf32>
    %103 = tpu.matmul %102, %7, %cst_62 {dimension_numbers = #tpu.dot_dimension_numbers<[1], [0], [0], [1], [0, 0, 1, 1], [], []>} : vector<8x32xbf16>, vector<32x96xbf16>, vector<8x96xf32> -> vector<8x96xf32>
    %104 = arith.truncf %37 : vector<8x32xf32> to vector<8x32xbf16>
    %cst_63 = arith.constant dense<0.000000e+00> : vector<8x96xf32>
    %105 = tpu.matmul %104, %13, %cst_63 {dimension_numbers = #tpu.dot_dimension_numbers<[1], [0], [0], [1], [0, 0, 1, 1], [], []>} : vector<8x32xbf16>, vector<32x96xbf16>, vector<8x96xf32> -> vector<8x96xf32>
    %106 = vector.extract_strided_slice %103 {offsets = [0, 0], sizes = [8, 64], strides = [1, 1]} : vector<8x96xf32> to vector<8x64xf32>
    %107 = vector.extract_strided_slice %105 {offsets = [0, 0], sizes = [8, 64], strides = [1, 1]} : vector<8x96xf32> to vector<8x64xf32>
    %108 = arith.addf %106, %107 : vector<8x64xf32>
    %109 = vector.broadcast %19 : vector<1x64xf32> to vector<8x64xf32>
    %110 = arith.addf %108, %109 : vector<8x64xf32>
    %111 = arith.negf %110 : vector<8x64xf32>
    %112 = math.exp %111 : vector<8x64xf32>
    %cst_64 = arith.constant 1.000000e+00 : f32
    %113 = vector.broadcast %cst_64 : f32 to vector<8x64xf32>
    %114 = arith.addf %113, %112 : vector<8x64xf32>
    %115 = arith.divf %113, %114 : vector<8x64xf32>
    %116 = vector.extract_strided_slice %115 {offsets = [0, 0], sizes = [8, 32], strides = [1, 1]} : vector<8x64xf32> to vector<8x32xf32>
    %117 = vector.extract_strided_slice %115 {offsets = [0, 32], sizes = [8, 32], strides = [1, 1]} : vector<8x64xf32> to vector<8x32xf32>
    %118 = vector.extract_strided_slice %103 {offsets = [0, 64], sizes = [8, 32], strides = [1, 1]} : vector<8x96xf32> to vector<8x32xf32>
    %119 = vector.broadcast %25 : vector<1x32xf32> to vector<8x32xf32>
    %120 = arith.addf %118, %119 : vector<8x32xf32>
    %121 = vector.extract_strided_slice %105 {offsets = [0, 64], sizes = [8, 32], strides = [1, 1]} : vector<8x96xf32> to vector<8x32xf32>
    %122 = vector.broadcast %31 : vector<1x32xf32> to vector<8x32xf32>
    %123 = arith.addf %121, %122 : vector<8x32xf32>
    %124 = arith.mulf %116, %123 : vector<8x32xf32>
    %125 = arith.addf %120, %124 : vector<8x32xf32>
    %126 = math.tanh %125 : vector<8x32xf32>
    %cst_65 = arith.constant 1.000000e+00 : f32
    %127 = vector.broadcast %cst_65 : f32 to vector<8x32xf32>
    %128 = arith.subf %127, %117 : vector<8x32xf32>
    %129 = arith.mulf %128, %126 : vector<8x32xf32>
    %130 = arith.mulf %117, %37 : vector<8x32xf32>
    %131 = arith.addf %129, %130 : vector<8x32xf32>
    %132 = arith.truncf %131 : vector<8x32xf32> to vector<8x32xbf16>
    %cst_66 = arith.constant dense<0.000000e+00> : vector<8x128xf32>
    %133 = tpu.matmul %132, %2, %cst_66 {dimension_numbers = #tpu.dot_dimension_numbers<[1], [0], [0], [1], [0, 0, 1, 1], [], []>} : vector<8x32xbf16>, vector<32x128xbf16>, vector<8x128xf32> -> vector<8x128xf32>
    %134 = vector.broadcast %3 : vector<1x128xf32> to vector<8x128xf32>
    %135 = arith.addf %133, %134 : vector<8x128xf32>
    %136 = arith.index_cast %c0_i32_54 : i32 to index
    %c0_67 = arith.constant 0 : index
    %c0_68 = arith.constant 0 : index
    %137 = vector.load %arg9[%136, %c0_67, %c0_68] : memref<8x8x128xf32, #tpu.memory_space<vmem>>, vector<1x8x128xf32>
    %138 = vector.shape_cast %137 : vector<1x8x128xf32> to vector<8x128xf32>
    %139 = vector.shape_cast %135 : vector<8x128xf32> to vector<1x8x128xf32>
    tpu.vector_store %arg9[%136, %c0_67, %c0_68], %139 {strides = array<i32>} : memref<8x8x128xf32, #tpu.memory_space<vmem>>, vector<1x8x128xf32>,
    %cst_69 = arith.constant dense<0xFF800000> : vector<8xf32>
    %140 = vector.multi_reduction <maximumf>, %135, %cst_69 [1] : vector<8x128xf32> to vector<8xf32>
    %141 = vector.shape_cast %140 : vector<8xf32> to vector<8x1xf32>
    %142 = vector.broadcast %141 : vector<8x1xf32> to vector<8x128xf32>
    %143 = arith.cmpf oeq, %135, %142 : vector<8x128xf32>
    %c128_i32 = arith.constant 128 : i32
    %144 = vector.broadcast %c128_i32 : i32 to vector<8x128xi32>
    %145 = arith.select %143, %0, %144 : vector<8x128xi1>, vector<8x128xi32>
    %cst_70 = arith.constant dense<2147483647> : vector<8xi32>
    %146 = vector.multi_reduction <minsi>, %145, %cst_70 [1] : vector<8x128xi32> to vector<8xi32>
    %147 = vector.shape_cast %146 : vector<8xi32> to vector<8x1xi32>
    %148 = vector.broadcast %147 : vector<8x1xi32> to vector<8x128xi32>
    %149 = arith.cmpi eq, %0, %148 : vector<8x128xi32>
    %150 = arith.extui %149 : vector<8x128xi1> to vector<8x128xi32>
    %151 = arith.sitofp %150 : vector<8x128xi32> to vector<8x128xf32>
    %152 = arith.truncf %151 : vector<8x128xf32> to vector<8x128xbf16>
    %c1_i32 = arith.constant 1 : i32
    %cst_71 = arith.constant dense<0.000000e+00> : vector<8x96xf32>
    %153 = tpu.matmul %152, %1, %cst_71 {dimension_numbers = #tpu.dot_dimension_numbers<[1], [0], [0], [1], [0, 0, 1, 1], [], []>} : vector<8x128xbf16>, vector<128x96xbf16>, vector<8x96xf32> -> vector<8x96xf32>
    %154 = arith.truncf %71 : vector<8x32xf32> to vector<8x32xbf16>
    %cst_72 = arith.constant dense<0.000000e+00> : vector<8x96xf32>
    %155 = tpu.matmul %154, %9, %cst_72 {dimension_numbers = #tpu.dot_dimension_numbers<[1], [0], [0], [1], [0, 0, 1, 1], [], []>} : vector<8x32xbf16>, vector<32x96xbf16>, vector<8x96xf32> -> vector<8x96xf32>
    %156 = vector.extract_strided_slice %153 {offsets = [0, 0], sizes = [8, 64], strides = [1, 1]} : vector<8x96xf32> to vector<8x64xf32>
    %157 = vector.extract_strided_slice %155 {offsets = [0, 0], sizes = [8, 64], strides = [1, 1]} : vector<8x96xf32> to vector<8x64xf32>
    %158 = arith.addf %156, %157 : vector<8x64xf32>
    %159 = vector.broadcast %15 : vector<1x64xf32> to vector<8x64xf32>
    %160 = arith.addf %158, %159 : vector<8x64xf32>
    %161 = arith.negf %160 : vector<8x64xf32>
    %162 = math.exp %161 : vector<8x64xf32>
    %cst_73 = arith.constant 1.000000e+00 : f32
    %163 = vector.broadcast %cst_73 : f32 to vector<8x64xf32>
    %164 = arith.addf %163, %162 : vector<8x64xf32>
    %165 = arith.divf %163, %164 : vector<8x64xf32>
    %166 = vector.extract_strided_slice %165 {offsets = [0, 0], sizes = [8, 32], strides = [1, 1]} : vector<8x64xf32> to vector<8x32xf32>
    %167 = vector.extract_strided_slice %165 {offsets = [0, 32], sizes = [8, 32], strides = [1, 1]} : vector<8x64xf32> to vector<8x32xf32>
    %168 = vector.extract_strided_slice %153 {offsets = [0, 64], sizes = [8, 32], strides = [1, 1]} : vector<8x96xf32> to vector<8x32xf32>
    %169 = vector.broadcast %21 : vector<1x32xf32> to vector<8x32xf32>
    %170 = arith.addf %168, %169 : vector<8x32xf32>
    %171 = vector.extract_strided_slice %155 {offsets = [0, 64], sizes = [8, 32], strides = [1, 1]} : vector<8x96xf32> to vector<8x32xf32>
    %172 = vector.broadcast %27 : vector<1x32xf32> to vector<8x32xf32>
    %173 = arith.addf %171, %172 : vector<8x32xf32>
    %174 = arith.mulf %166, %173 : vector<8x32xf32>
    %175 = arith.addf %170, %174 : vector<8x32xf32>
    %176 = math.tanh %175 : vector<8x32xf32>
    %cst_74 = arith.constant 1.000000e+00 : f32
    %177 = vector.broadcast %cst_74 : f32 to vector<8x32xf32>
    %178 = arith.subf %177, %167 : vector<8x32xf32>
    %179 = arith.mulf %178, %176 : vector<8x32xf32>
    %180 = arith.mulf %167, %71 : vector<8x32xf32>
    %181 = arith.addf %179, %180 : vector<8x32xf32>
    %182 = arith.truncf %181 : vector<8x32xf32> to vector<8x32xbf16>
    %cst_75 = arith.constant dense<0.000000e+00> : vector<8x96xf32>
    %183 = tpu.matmul %182, %5, %cst_75 {dimension_numbers = #tpu.dot_dimension_numbers<[1], [0], [0], [1], [0, 0, 1, 1], [], []>} : vector<8x32xbf16>, vector<32x96xbf16>, vector<8x96xf32> -> vector<8x96xf32>
    %184 = arith.truncf %101 : vector<8x32xf32> to vector<8x32xbf16>
    %cst_76 = arith.constant dense<0.000000e+00> : vector<8x96xf32>
    %185 = tpu.matmul %184, %11, %cst_76 {dimension_numbers = #tpu.dot_dimension_numbers<[1], [0], [0], [1], [0, 0, 1, 1], [], []>} : vector<8x32xbf16>, vector<32x96xbf16>, vector<8x96xf32> -> vector<8x96xf32>
    %186 = vector.extract_strided_slice %183 {offsets = [0, 0], sizes = [8, 64], strides = [1, 1]} : vector<8x96xf32> to vector<8x64xf32>
    %187 = vector.extract_strided_slice %185 {offsets = [0, 0], sizes = [8, 64], strides = [1, 1]} : vector<8x96xf32> to vector<8x64xf32>
    %188 = arith.addf %186, %187 : vector<8x64xf32>
    %189 = vector.broadcast %17 : vector<1x64xf32> to vector<8x64xf32>
    %190 = arith.addf %188, %189 : vector<8x64xf32>
    %191 = arith.negf %190 : vector<8x64xf32>
    %192 = math.exp %191 : vector<8x64xf32>
    %cst_77 = arith.constant 1.000000e+00 : f32
    %193 = vector.broadcast %cst_77 : f32 to vector<8x64xf32>
    %194 = arith.addf %193, %192 : vector<8x64xf32>
    %195 = arith.divf %193, %194 : vector<8x64xf32>
    %196 = vector.extract_strided_slice %195 {offsets = [0, 0], sizes = [8, 32], strides = [1, 1]} : vector<8x64xf32> to vector<8x32xf32>
    %197 = vector.extract_strided_slice %195 {offsets = [0, 32], sizes = [8, 32], strides = [1, 1]} : vector<8x64xf32> to vector<8x32xf32>
    %198 = vector.extract_strided_slice %183 {offsets = [0, 64], sizes = [8, 32], strides = [1, 1]} : vector<8x96xf32> to vector<8x32xf32>
    %199 = vector.broadcast %23 : vector<1x32xf32> to vector<8x32xf32>
    %200 = arith.addf %198, %199 : vector<8x32xf32>
    %201 = vector.extract_strided_slice %185 {offsets = [0, 64], sizes = [8, 32], strides = [1, 1]} : vector<8x96xf32> to vector<8x32xf32>
    %202 = vector.broadcast %29 : vector<1x32xf32> to vector<8x32xf32>
    %203 = arith.addf %201, %202 : vector<8x32xf32>
    %204 = arith.mulf %196, %203 : vector<8x32xf32>
    %205 = arith.addf %200, %204 : vector<8x32xf32>
    %206 = math.tanh %205 : vector<8x32xf32>
    %cst_78 = arith.constant 1.000000e+00 : f32
    %207 = vector.broadcast %cst_78 : f32 to vector<8x32xf32>
    %208 = arith.subf %207, %197 : vector<8x32xf32>
    %209 = arith.mulf %208, %206 : vector<8x32xf32>
    %210 = arith.mulf %197, %101 : vector<8x32xf32>
    %211 = arith.addf %209, %210 : vector<8x32xf32>
    %212 = arith.truncf %211 : vector<8x32xf32> to vector<8x32xbf16>
    %cst_79 = arith.constant dense<0.000000e+00> : vector<8x96xf32>
    %213 = tpu.matmul %212, %7, %cst_79 {dimension_numbers = #tpu.dot_dimension_numbers<[1], [0], [0], [1], [0, 0, 1, 1], [], []>} : vector<8x32xbf16>, vector<32x96xbf16>, vector<8x96xf32> -> vector<8x96xf32>
    %214 = arith.truncf %131 : vector<8x32xf32> to vector<8x32xbf16>
    %cst_80 = arith.constant dense<0.000000e+00> : vector<8x96xf32>
    %215 = tpu.matmul %214, %13, %cst_80 {dimension_numbers = #tpu.dot_dimension_numbers<[1], [0], [0], [1], [0, 0, 1, 1], [], []>} : vector<8x32xbf16>, vector<32x96xbf16>, vector<8x96xf32> -> vector<8x96xf32>
    %216 = vector.extract_strided_slice %213 {offsets = [0, 0], sizes = [8, 64], strides = [1, 1]} : vector<8x96xf32> to vector<8x64xf32>
    %217 = vector.extract_strided_slice %215 {offsets = [0, 0], sizes = [8, 64], strides = [1, 1]} : vector<8x96xf32> to vector<8x64xf32>
    %218 = arith.addf %216, %217 : vector<8x64xf32>
    %219 = vector.broadcast %19 : vector<1x64xf32> to vector<8x64xf32>
    %220 = arith.addf %218, %219 : vector<8x64xf32>
    %221 = arith.negf %220 : vector<8x64xf32>
    %222 = math.exp %221 : vector<8x64xf32>
    %cst_81 = arith.constant 1.000000e+00 : f32
    %223 = vector.broadcast %cst_81 : f32 to vector<8x64xf32>
    %224 = arith.addf %223, %222 : vector<8x64xf32>
    %225 = arith.divf %223, %224 : vector<8x64xf32>
    %226 = vector.extract_strided_slice %225 {offsets = [0, 0], sizes = [8, 32], strides = [1, 1]} : vector<8x64xf32> to vector<8x32xf32>
    %227 = vector.extract_strided_slice %225 {offsets = [0, 32], sizes = [8, 32], strides = [1, 1]} : vector<8x64xf32> to vector<8x32xf32>
    %228 = vector.extract_strided_slice %213 {offsets = [0, 64], sizes = [8, 32], strides = [1, 1]} : vector<8x96xf32> to vector<8x32xf32>
    %229 = vector.broadcast %25 : vector<1x32xf32> to vector<8x32xf32>
    %230 = arith.addf %228, %229 : vector<8x32xf32>
    %231 = vector.extract_strided_slice %215 {offsets = [0, 64], sizes = [8, 32], strides = [1, 1]} : vector<8x96xf32> to vector<8x32xf32>
    %232 = vector.broadcast %31 : vector<1x32xf32> to vector<8x32xf32>
    %233 = arith.addf %231, %232 : vector<8x32xf32>
    %234 = arith.mulf %226, %233 : vector<8x32xf32>
    %235 = arith.addf %230, %234 : vector<8x32xf32>
    %236 = math.tanh %235 : vector<8x32xf32>
    %cst_82 = arith.constant 1.000000e+00 : f32
    %237 = vector.broadcast %cst_82 : f32 to vector<8x32xf32>
    %238 = arith.subf %237, %227 : vector<8x32xf32>
    %239 = arith.mulf %238, %236 : vector<8x32xf32>
    %240 = arith.mulf %227, %131 : vector<8x32xf32>
    %241 = arith.addf %239, %240 : vector<8x32xf32>
    %242 = arith.truncf %241 : vector<8x32xf32> to vector<8x32xbf16>
    %cst_83 = arith.constant dense<0.000000e+00> : vector<8x128xf32>
    %243 = tpu.matmul %242, %2, %cst_83 {dimension_numbers = #tpu.dot_dimension_numbers<[1], [0], [0], [1], [0, 0, 1, 1], [], []>} : vector<8x32xbf16>, vector<32x128xbf16>, vector<8x128xf32> -> vector<8x128xf32>
    %244 = vector.broadcast %3 : vector<1x128xf32> to vector<8x128xf32>
    %245 = arith.addf %243, %244 : vector<8x128xf32>
    %246 = arith.index_cast %c1_i32 : i32 to index
    %c0_84 = arith.constant 0 : index
    %c0_85 = arith.constant 0 : index
    %247 = vector.load %arg9[%246, %c0_84, %c0_85] : memref<8x8x128xf32, #tpu.memory_space<vmem>>, vector<1x8x128xf32>
    %248 = vector.shape_cast %247 : vector<1x8x128xf32> to vector<8x128xf32>
    %249 = vector.shape_cast %245 : vector<8x128xf32> to vector<1x8x128xf32>
    tpu.vector_store %arg9[%246, %c0_84, %c0_85], %249 {strides = array<i32>} : memref<8x8x128xf32, #tpu.memory_space<vmem>>, vector<1x8x128xf32>,
    %cst_86 = arith.constant dense<0xFF800000> : vector<8xf32>
    %250 = vector.multi_reduction <maximumf>, %245, %cst_86 [1] : vector<8x128xf32> to vector<8xf32>
    %251 = vector.shape_cast %250 : vector<8xf32> to vector<8x1xf32>
    %252 = vector.broadcast %251 : vector<8x1xf32> to vector<8x128xf32>
    %253 = arith.cmpf oeq, %245, %252 : vector<8x128xf32>
    %c128_i32_87 = arith.constant 128 : i32
    %254 = vector.broadcast %c128_i32_87 : i32 to vector<8x128xi32>
    %255 = arith.select %253, %0, %254 : vector<8x128xi1>, vector<8x128xi32>
    %cst_88 = arith.constant dense<2147483647> : vector<8xi32>
    %256 = vector.multi_reduction <minsi>, %255, %cst_88 [1] : vector<8x128xi32> to vector<8xi32>
    %257 = vector.shape_cast %256 : vector<8xi32> to vector<8x1xi32>
    %258 = vector.broadcast %257 : vector<8x1xi32> to vector<8x128xi32>
    %259 = arith.cmpi eq, %0, %258 : vector<8x128xi32>
    %260 = arith.extui %259 : vector<8x128xi1> to vector<8x128xi32>
    %261 = arith.sitofp %260 : vector<8x128xi32> to vector<8x128xf32>
    %262 = arith.truncf %261 : vector<8x128xf32> to vector<8x128xbf16>
    %c2_i32 = arith.constant 2 : i32
    %cst_89 = arith.constant dense<0.000000e+00> : vector<8x96xf32>
    %263 = tpu.matmul %262, %1, %cst_89 {dimension_numbers = #tpu.dot_dimension_numbers<[1], [0], [0], [1], [0, 0, 1, 1], [], []>} : vector<8x128xbf16>, vector<128x96xbf16>, vector<8x96xf32> -> vector<8x96xf32>
    %264 = arith.truncf %181 : vector<8x32xf32> to vector<8x32xbf16>
    %cst_90 = arith.constant dense<0.000000e+00> : vector<8x96xf32>
    %265 = tpu.matmul %264, %9, %cst_90 {dimension_numbers = #tpu.dot_dimension_numbers<[1], [0], [0], [1], [0, 0, 1, 1], [], []>} : vector<8x32xbf16>, vector<32x96xbf16>, vector<8x96xf32> -> vector<8x96xf32>
    %266 = vector.extract_strided_slice %263 {offsets = [0, 0], sizes = [8, 64], strides = [1, 1]} : vector<8x96xf32> to vector<8x64xf32>
    %267 = vector.extract_strided_slice %265 {offsets = [0, 0], sizes = [8, 64], strides = [1, 1]} : vector<8x96xf32> to vector<8x64xf32>
    %268 = arith.addf %266, %267 : vector<8x64xf32>
    %269 = vector.broadcast %15 : vector<1x64xf32> to vector<8x64xf32>
    %270 = arith.addf %268, %269 : vector<8x64xf32>
    %271 = arith.negf %270 : vector<8x64xf32>
    %272 = math.exp %271 : vector<8x64xf32>
    %cst_91 = arith.constant 1.000000e+00 : f32
    %273 = vector.broadcast %cst_91 : f32 to vector<8x64xf32>
    %274 = arith.addf %273, %272 : vector<8x64xf32>
    %275 = arith.divf %273, %274 : vector<8x64xf32>
    %276 = vector.extract_strided_slice %275 {offsets = [0, 0], sizes = [8, 32], strides = [1, 1]} : vector<8x64xf32> to vector<8x32xf32>
    %277 = vector.extract_strided_slice %275 {offsets = [0, 32], sizes = [8, 32], strides = [1, 1]} : vector<8x64xf32> to vector<8x32xf32>
    %278 = vector.extract_strided_slice %263 {offsets = [0, 64], sizes = [8, 32], strides = [1, 1]} : vector<8x96xf32> to vector<8x32xf32>
    %279 = vector.broadcast %21 : vector<1x32xf32> to vector<8x32xf32>
    %280 = arith.addf %278, %279 : vector<8x32xf32>
    %281 = vector.extract_strided_slice %265 {offsets = [0, 64], sizes = [8, 32], strides = [1, 1]} : vector<8x96xf32> to vector<8x32xf32>
    %282 = vector.broadcast %27 : vector<1x32xf32> to vector<8x32xf32>
    %283 = arith.addf %281, %282 : vector<8x32xf32>
    %284 = arith.mulf %276, %283 : vector<8x32xf32>
    %285 = arith.addf %280, %284 : vector<8x32xf32>
    %286 = math.tanh %285 : vector<8x32xf32>
    %cst_92 = arith.constant 1.000000e+00 : f32
    %287 = vector.broadcast %cst_92 : f32 to vector<8x32xf32>
    %288 = arith.subf %287, %277 : vector<8x32xf32>
    %289 = arith.mulf %288, %286 : vector<8x32xf32>
    %290 = arith.mulf %277, %181 : vector<8x32xf32>
    %291 = arith.addf %289, %290 : vector<8x32xf32>
    %292 = arith.truncf %291 : vector<8x32xf32> to vector<8x32xbf16>
    %cst_93 = arith.constant dense<0.000000e+00> : vector<8x96xf32>
    %293 = tpu.matmul %292, %5, %cst_93 {dimension_numbers = #tpu.dot_dimension_numbers<[1], [0], [0], [1], [0, 0, 1, 1], [], []>} : vector<8x32xbf16>, vector<32x96xbf16>, vector<8x96xf32> -> vector<8x96xf32>
    %294 = arith.truncf %211 : vector<8x32xf32> to vector<8x32xbf16>
    %cst_94 = arith.constant dense<0.000000e+00> : vector<8x96xf32>
    %295 = tpu.matmul %294, %11, %cst_94 {dimension_numbers = #tpu.dot_dimension_numbers<[1], [0], [0], [1], [0, 0, 1, 1], [], []>} : vector<8x32xbf16>, vector<32x96xbf16>, vector<8x96xf32> -> vector<8x96xf32>
    %296 = vector.extract_strided_slice %293 {offsets = [0, 0], sizes = [8, 64], strides = [1, 1]} : vector<8x96xf32> to vector<8x64xf32>
    %297 = vector.extract_strided_slice %295 {offsets = [0, 0], sizes = [8, 64], strides = [1, 1]} : vector<8x96xf32> to vector<8x64xf32>
    %298 = arith.addf %296, %297 : vector<8x64xf32>
    %299 = vector.broadcast %17 : vector<1x64xf32> to vector<8x64xf32>
    %300 = arith.addf %298, %299 : vector<8x64xf32>
    %301 = arith.negf %300 : vector<8x64xf32>
    %302 = math.exp %301 : vector<8x64xf32>
    %cst_95 = arith.constant 1.000000e+00 : f32
    %303 = vector.broadcast %cst_95 : f32 to vector<8x64xf32>
    %304 = arith.addf %303, %302 : vector<8x64xf32>
    %305 = arith.divf %303, %304 : vector<8x64xf32>
    %306 = vector.extract_strided_slice %305 {offsets = [0, 0], sizes = [8, 32], strides = [1, 1]} : vector<8x64xf32> to vector<8x32xf32>
    %307 = vector.extract_strided_slice %305 {offsets = [0, 32], sizes = [8, 32], strides = [1, 1]} : vector<8x64xf32> to vector<8x32xf32>
    %308 = vector.extract_strided_slice %293 {offsets = [0, 64], sizes = [8, 32], strides = [1, 1]} : vector<8x96xf32> to vector<8x32xf32>
    %309 = vector.broadcast %23 : vector<1x32xf32> to vector<8x32xf32>
    %310 = arith.addf %308, %309 : vector<8x32xf32>
    %311 = vector.extract_strided_slice %295 {offsets = [0, 64], sizes = [8, 32], strides = [1, 1]} : vector<8x96xf32> to vector<8x32xf32>
    %312 = vector.broadcast %29 : vector<1x32xf32> to vector<8x32xf32>
    %313 = arith.addf %311, %312 : vector<8x32xf32>
    %314 = arith.mulf %306, %313 : vector<8x32xf32>
    %315 = arith.addf %310, %314 : vector<8x32xf32>
    %316 = math.tanh %315 : vector<8x32xf32>
    %cst_96 = arith.constant 1.000000e+00 : f32
    %317 = vector.broadcast %cst_96 : f32 to vector<8x32xf32>
    %318 = arith.subf %317, %307 : vector<8x32xf32>
    %319 = arith.mulf %318, %316 : vector<8x32xf32>
    %320 = arith.mulf %307, %211 : vector<8x32xf32>
    %321 = arith.addf %319, %320 : vector<8x32xf32>
    %322 = arith.truncf %321 : vector<8x32xf32> to vector<8x32xbf16>
    %cst_97 = arith.constant dense<0.000000e+00> : vector<8x96xf32>
    %323 = tpu.matmul %322, %7, %cst_97 {dimension_numbers = #tpu.dot_dimension_numbers<[1], [0], [0], [1], [0, 0, 1, 1], [], []>} : vector<8x32xbf16>, vector<32x96xbf16>, vector<8x96xf32> -> vector<8x96xf32>
    %324 = arith.truncf %241 : vector<8x32xf32> to vector<8x32xbf16>
    %cst_98 = arith.constant dense<0.000000e+00> : vector<8x96xf32>
    %325 = tpu.matmul %324, %13, %cst_98 {dimension_numbers = #tpu.dot_dimension_numbers<[1], [0], [0], [1], [0, 0, 1, 1], [], []>} : vector<8x32xbf16>, vector<32x96xbf16>, vector<8x96xf32> -> vector<8x96xf32>
    %326 = vector.extract_strided_slice %323 {offsets = [0, 0], sizes = [8, 64], strides = [1, 1]} : vector<8x96xf32> to vector<8x64xf32>
    %327 = vector.extract_strided_slice %325 {offsets = [0, 0], sizes = [8, 64], strides = [1, 1]} : vector<8x96xf32> to vector<8x64xf32>
    %328 = arith.addf %326, %327 : vector<8x64xf32>
    %329 = vector.broadcast %19 : vector<1x64xf32> to vector<8x64xf32>
    %330 = arith.addf %328, %329 : vector<8x64xf32>
    %331 = arith.negf %330 : vector<8x64xf32>
    %332 = math.exp %331 : vector<8x64xf32>
    %cst_99 = arith.constant 1.000000e+00 : f32
    %333 = vector.broadcast %cst_99 : f32 to vector<8x64xf32>
    %334 = arith.addf %333, %332 : vector<8x64xf32>
    %335 = arith.divf %333, %334 : vector<8x64xf32>
    %336 = vector.extract_strided_slice %335 {offsets = [0, 0], sizes = [8, 32], strides = [1, 1]} : vector<8x64xf32> to vector<8x32xf32>
    %337 = vector.extract_strided_slice %335 {offsets = [0, 32], sizes = [8, 32], strides = [1, 1]} : vector<8x64xf32> to vector<8x32xf32>
    %338 = vector.extract_strided_slice %323 {offsets = [0, 64], sizes = [8, 32], strides = [1, 1]} : vector<8x96xf32> to vector<8x32xf32>
    %339 = vector.broadcast %25 : vector<1x32xf32> to vector<8x32xf32>
    %340 = arith.addf %338, %339 : vector<8x32xf32>
    %341 = vector.extract_strided_slice %325 {offsets = [0, 64], sizes = [8, 32], strides = [1, 1]} : vector<8x96xf32> to vector<8x32xf32>
    %342 = vector.broadcast %31 : vector<1x32xf32> to vector<8x32xf32>
    %343 = arith.addf %341, %342 : vector<8x32xf32>
    %344 = arith.mulf %336, %343 : vector<8x32xf32>
    %345 = arith.addf %340, %344 : vector<8x32xf32>
    %346 = math.tanh %345 : vector<8x32xf32>
    %cst_100 = arith.constant 1.000000e+00 : f32
    %347 = vector.broadcast %cst_100 : f32 to vector<8x32xf32>
    %348 = arith.subf %347, %337 : vector<8x32xf32>
    %349 = arith.mulf %348, %346 : vector<8x32xf32>
    %350 = arith.mulf %337, %241 : vector<8x32xf32>
    %351 = arith.addf %349, %350 : vector<8x32xf32>
    %352 = arith.truncf %351 : vector<8x32xf32> to vector<8x32xbf16>
    %cst_101 = arith.constant dense<0.000000e+00> : vector<8x128xf32>
    %353 = tpu.matmul %352, %2, %cst_101 {dimension_numbers = #tpu.dot_dimension_numbers<[1], [0], [0], [1], [0, 0, 1, 1], [], []>} : vector<8x32xbf16>, vector<32x128xbf16>, vector<8x128xf32> -> vector<8x128xf32>
    %354 = vector.broadcast %3 : vector<1x128xf32> to vector<8x128xf32>
    %355 = arith.addf %353, %354 : vector<8x128xf32>
    %356 = arith.index_cast %c2_i32 : i32 to index
    %c0_102 = arith.constant 0 : index
    %c0_103 = arith.constant 0 : index
    %357 = vector.load %arg9[%356, %c0_102, %c0_103] : memref<8x8x128xf32, #tpu.memory_space<vmem>>, vector<1x8x128xf32>
    %358 = vector.shape_cast %357 : vector<1x8x128xf32> to vector<8x128xf32>
    %359 = vector.shape_cast %355 : vector<8x128xf32> to vector<1x8x128xf32>
    tpu.vector_store %arg9[%356, %c0_102, %c0_103], %359 {strides = array<i32>} : memref<8x8x128xf32, #tpu.memory_space<vmem>>, vector<1x8x128xf32>,
    %cst_104 = arith.constant dense<0xFF800000> : vector<8xf32>
    %360 = vector.multi_reduction <maximumf>, %355, %cst_104 [1] : vector<8x128xf32> to vector<8xf32>
    %361 = vector.shape_cast %360 : vector<8xf32> to vector<8x1xf32>
    %362 = vector.broadcast %361 : vector<8x1xf32> to vector<8x128xf32>
    %363 = arith.cmpf oeq, %355, %362 : vector<8x128xf32>
    %c128_i32_105 = arith.constant 128 : i32
    %364 = vector.broadcast %c128_i32_105 : i32 to vector<8x128xi32>
    %365 = arith.select %363, %0, %364 : vector<8x128xi1>, vector<8x128xi32>
    %cst_106 = arith.constant dense<2147483647> : vector<8xi32>
    %366 = vector.multi_reduction <minsi>, %365, %cst_106 [1] : vector<8x128xi32> to vector<8xi32>
    %367 = vector.shape_cast %366 : vector<8xi32> to vector<8x1xi32>
    %368 = vector.broadcast %367 : vector<8x1xi32> to vector<8x128xi32>
    %369 = arith.cmpi eq, %0, %368 : vector<8x128xi32>
    %370 = arith.extui %369 : vector<8x128xi1> to vector<8x128xi32>
    %371 = arith.sitofp %370 : vector<8x128xi32> to vector<8x128xf32>
    %372 = arith.truncf %371 : vector<8x128xf32> to vector<8x128xbf16>
    %c3_i32 = arith.constant 3 : i32
    %cst_107 = arith.constant dense<0.000000e+00> : vector<8x96xf32>
    %373 = tpu.matmul %372, %1, %cst_107 {dimension_numbers = #tpu.dot_dimension_numbers<[1], [0], [0], [1], [0, 0, 1, 1], [], []>} : vector<8x128xbf16>, vector<128x96xbf16>, vector<8x96xf32> -> vector<8x96xf32>
    %374 = arith.truncf %291 : vector<8x32xf32> to vector<8x32xbf16>
    %cst_108 = arith.constant dense<0.000000e+00> : vector<8x96xf32>
    %375 = tpu.matmul %374, %9, %cst_108 {dimension_numbers = #tpu.dot_dimension_numbers<[1], [0], [0], [1], [0, 0, 1, 1], [], []>} : vector<8x32xbf16>, vector<32x96xbf16>, vector<8x96xf32> -> vector<8x96xf32>
    %376 = vector.extract_strided_slice %373 {offsets = [0, 0], sizes = [8, 64], strides = [1, 1]} : vector<8x96xf32> to vector<8x64xf32>
    %377 = vector.extract_strided_slice %375 {offsets = [0, 0], sizes = [8, 64], strides = [1, 1]} : vector<8x96xf32> to vector<8x64xf32>
    %378 = arith.addf %376, %377 : vector<8x64xf32>
    %379 = vector.broadcast %15 : vector<1x64xf32> to vector<8x64xf32>
    %380 = arith.addf %378, %379 : vector<8x64xf32>
    %381 = arith.negf %380 : vector<8x64xf32>
    %382 = math.exp %381 : vector<8x64xf32>
    %cst_109 = arith.constant 1.000000e+00 : f32
    %383 = vector.broadcast %cst_109 : f32 to vector<8x64xf32>
    %384 = arith.addf %383, %382 : vector<8x64xf32>
    %385 = arith.divf %383, %384 : vector<8x64xf32>
    %386 = vector.extract_strided_slice %385 {offsets = [0, 0], sizes = [8, 32], strides = [1, 1]} : vector<8x64xf32> to vector<8x32xf32>
    %387 = vector.extract_strided_slice %385 {offsets = [0, 32], sizes = [8, 32], strides = [1, 1]} : vector<8x64xf32> to vector<8x32xf32>
    %388 = vector.extract_strided_slice %373 {offsets = [0, 64], sizes = [8, 32], strides = [1, 1]} : vector<8x96xf32> to vector<8x32xf32>
    %389 = vector.broadcast %21 : vector<1x32xf32> to vector<8x32xf32>
    %390 = arith.addf %388, %389 : vector<8x32xf32>
    %391 = vector.extract_strided_slice %375 {offsets = [0, 64], sizes = [8, 32], strides = [1, 1]} : vector<8x96xf32> to vector<8x32xf32>
    %392 = vector.broadcast %27 : vector<1x32xf32> to vector<8x32xf32>
    %393 = arith.addf %391, %392 : vector<8x32xf32>
    %394 = arith.mulf %386, %393 : vector<8x32xf32>
    %395 = arith.addf %390, %394 : vector<8x32xf32>
    %396 = math.tanh %395 : vector<8x32xf32>
    %cst_110 = arith.constant 1.000000e+00 : f32
    %397 = vector.broadcast %cst_110 : f32 to vector<8x32xf32>
    %398 = arith.subf %397, %387 : vector<8x32xf32>
    %399 = arith.mulf %398, %396 : vector<8x32xf32>
    %400 = arith.mulf %387, %291 : vector<8x32xf32>
    %401 = arith.addf %399, %400 : vector<8x32xf32>
    %402 = arith.truncf %401 : vector<8x32xf32> to vector<8x32xbf16>
    %cst_111 = arith.constant dense<0.000000e+00> : vector<8x96xf32>
    %403 = tpu.matmul %402, %5, %cst_111 {dimension_numbers = #tpu.dot_dimension_numbers<[1], [0], [0], [1], [0, 0, 1, 1], [], []>} : vector<8x32xbf16>, vector<32x96xbf16>, vector<8x96xf32> -> vector<8x96xf32>
    %404 = arith.truncf %321 : vector<8x32xf32> to vector<8x32xbf16>
    %cst_112 = arith.constant dense<0.000000e+00> : vector<8x96xf32>
    %405 = tpu.matmul %404, %11, %cst_112 {dimension_numbers = #tpu.dot_dimension_numbers<[1], [0], [0], [1], [0, 0, 1, 1], [], []>} : vector<8x32xbf16>, vector<32x96xbf16>, vector<8x96xf32> -> vector<8x96xf32>
    %406 = vector.extract_strided_slice %403 {offsets = [0, 0], sizes = [8, 64], strides = [1, 1]} : vector<8x96xf32> to vector<8x64xf32>
    %407 = vector.extract_strided_slice %405 {offsets = [0, 0], sizes = [8, 64], strides = [1, 1]} : vector<8x96xf32> to vector<8x64xf32>
    %408 = arith.addf %406, %407 : vector<8x64xf32>
    %409 = vector.broadcast %17 : vector<1x64xf32> to vector<8x64xf32>
    %410 = arith.addf %408, %409 : vector<8x64xf32>
    %411 = arith.negf %410 : vector<8x64xf32>
    %412 = math.exp %411 : vector<8x64xf32>
    %cst_113 = arith.constant 1.000000e+00 : f32
    %413 = vector.broadcast %cst_113 : f32 to vector<8x64xf32>
    %414 = arith.addf %413, %412 : vector<8x64xf32>
    %415 = arith.divf %413, %414 : vector<8x64xf32>
    %416 = vector.extract_strided_slice %415 {offsets = [0, 0], sizes = [8, 32], strides = [1, 1]} : vector<8x64xf32> to vector<8x32xf32>
    %417 = vector.extract_strided_slice %415 {offsets = [0, 32], sizes = [8, 32], strides = [1, 1]} : vector<8x64xf32> to vector<8x32xf32>
    %418 = vector.extract_strided_slice %403 {offsets = [0, 64], sizes = [8, 32], strides = [1, 1]} : vector<8x96xf32> to vector<8x32xf32>
    %419 = vector.broadcast %23 : vector<1x32xf32> to vector<8x32xf32>
    %420 = arith.addf %418, %419 : vector<8x32xf32>
    %421 = vector.extract_strided_slice %405 {offsets = [0, 64], sizes = [8, 32], strides = [1, 1]} : vector<8x96xf32> to vector<8x32xf32>
    %422 = vector.broadcast %29 : vector<1x32xf32> to vector<8x32xf32>
    %423 = arith.addf %421, %422 : vector<8x32xf32>
    %424 = arith.mulf %416, %423 : vector<8x32xf32>
    %425 = arith.addf %420, %424 : vector<8x32xf32>
    %426 = math.tanh %425 : vector<8x32xf32>
    %cst_114 = arith.constant 1.000000e+00 : f32
    %427 = vector.broadcast %cst_114 : f32 to vector<8x32xf32>
    %428 = arith.subf %427, %417 : vector<8x32xf32>
    %429 = arith.mulf %428, %426 : vector<8x32xf32>
    %430 = arith.mulf %417, %321 : vector<8x32xf32>
    %431 = arith.addf %429, %430 : vector<8x32xf32>
    %432 = arith.truncf %431 : vector<8x32xf32> to vector<8x32xbf16>
    %cst_115 = arith.constant dense<0.000000e+00> : vector<8x96xf32>
    %433 = tpu.matmul %432, %7, %cst_115 {dimension_numbers = #tpu.dot_dimension_numbers<[1], [0], [0], [1], [0, 0, 1, 1], [], []>} : vector<8x32xbf16>, vector<32x96xbf16>, vector<8x96xf32> -> vector<8x96xf32>
    %434 = arith.truncf %351 : vector<8x32xf32> to vector<8x32xbf16>
    %cst_116 = arith.constant dense<0.000000e+00> : vector<8x96xf32>
    %435 = tpu.matmul %434, %13, %cst_116 {dimension_numbers = #tpu.dot_dimension_numbers<[1], [0], [0], [1], [0, 0, 1, 1], [], []>} : vector<8x32xbf16>, vector<32x96xbf16>, vector<8x96xf32> -> vector<8x96xf32>
    %436 = vector.extract_strided_slice %433 {offsets = [0, 0], sizes = [8, 64], strides = [1, 1]} : vector<8x96xf32> to vector<8x64xf32>
    %437 = vector.extract_strided_slice %435 {offsets = [0, 0], sizes = [8, 64], strides = [1, 1]} : vector<8x96xf32> to vector<8x64xf32>
    %438 = arith.addf %436, %437 : vector<8x64xf32>
    %439 = vector.broadcast %19 : vector<1x64xf32> to vector<8x64xf32>
    %440 = arith.addf %438, %439 : vector<8x64xf32>
    %441 = arith.negf %440 : vector<8x64xf32>
    %442 = math.exp %441 : vector<8x64xf32>
    %cst_117 = arith.constant 1.000000e+00 : f32
    %443 = vector.broadcast %cst_117 : f32 to vector<8x64xf32>
    %444 = arith.addf %443, %442 : vector<8x64xf32>
    %445 = arith.divf %443, %444 : vector<8x64xf32>
    %446 = vector.extract_strided_slice %445 {offsets = [0, 0], sizes = [8, 32], strides = [1, 1]} : vector<8x64xf32> to vector<8x32xf32>
    %447 = vector.extract_strided_slice %445 {offsets = [0, 32], sizes = [8, 32], strides = [1, 1]} : vector<8x64xf32> to vector<8x32xf32>
    %448 = vector.extract_strided_slice %433 {offsets = [0, 64], sizes = [8, 32], strides = [1, 1]} : vector<8x96xf32> to vector<8x32xf32>
    %449 = vector.broadcast %25 : vector<1x32xf32> to vector<8x32xf32>
    %450 = arith.addf %448, %449 : vector<8x32xf32>
    %451 = vector.extract_strided_slice %435 {offsets = [0, 64], sizes = [8, 32], strides = [1, 1]} : vector<8x96xf32> to vector<8x32xf32>
    %452 = vector.broadcast %31 : vector<1x32xf32> to vector<8x32xf32>
    %453 = arith.addf %451, %452 : vector<8x32xf32>
    %454 = arith.mulf %446, %453 : vector<8x32xf32>
    %455 = arith.addf %450, %454 : vector<8x32xf32>
    %456 = math.tanh %455 : vector<8x32xf32>
    %cst_118 = arith.constant 1.000000e+00 : f32
    %457 = vector.broadcast %cst_118 : f32 to vector<8x32xf32>
    %458 = arith.subf %457, %447 : vector<8x32xf32>
    %459 = arith.mulf %458, %456 : vector<8x32xf32>
    %460 = arith.mulf %447, %351 : vector<8x32xf32>
    %461 = arith.addf %459, %460 : vector<8x32xf32>
    %462 = arith.truncf %461 : vector<8x32xf32> to vector<8x32xbf16>
    %cst_119 = arith.constant dense<0.000000e+00> : vector<8x128xf32>
    %463 = tpu.matmul %462, %2, %cst_119 {dimension_numbers = #tpu.dot_dimension_numbers<[1], [0], [0], [1], [0, 0, 1, 1], [], []>} : vector<8x32xbf16>, vector<32x128xbf16>, vector<8x128xf32> -> vector<8x128xf32>
    %464 = vector.broadcast %3 : vector<1x128xf32> to vector<8x128xf32>
    %465 = arith.addf %463, %464 : vector<8x128xf32>
    %466 = arith.index_cast %c3_i32 : i32 to index
    %c0_120 = arith.constant 0 : index
    %c0_121 = arith.constant 0 : index
    %467 = vector.load %arg9[%466, %c0_120, %c0_121] : memref<8x8x128xf32, #tpu.memory_space<vmem>>, vector<1x8x128xf32>
    %468 = vector.shape_cast %467 : vector<1x8x128xf32> to vector<8x128xf32>
    %469 = vector.shape_cast %465 : vector<8x128xf32> to vector<1x8x128xf32>
    tpu.vector_store %arg9[%466, %c0_120, %c0_121], %469 {strides = array<i32>} : memref<8x8x128xf32, #tpu.memory_space<vmem>>, vector<1x8x128xf32>,
    %cst_122 = arith.constant dense<0xFF800000> : vector<8xf32>
    %470 = vector.multi_reduction <maximumf>, %465, %cst_122 [1] : vector<8x128xf32> to vector<8xf32>
    %471 = vector.shape_cast %470 : vector<8xf32> to vector<8x1xf32>
    %472 = vector.broadcast %471 : vector<8x1xf32> to vector<8x128xf32>
    %473 = arith.cmpf oeq, %465, %472 : vector<8x128xf32>
    %c128_i32_123 = arith.constant 128 : i32
    %474 = vector.broadcast %c128_i32_123 : i32 to vector<8x128xi32>
    %475 = arith.select %473, %0, %474 : vector<8x128xi1>, vector<8x128xi32>
    %cst_124 = arith.constant dense<2147483647> : vector<8xi32>
    %476 = vector.multi_reduction <minsi>, %475, %cst_124 [1] : vector<8x128xi32> to vector<8xi32>
    %477 = vector.shape_cast %476 : vector<8xi32> to vector<8x1xi32>
    %478 = vector.broadcast %477 : vector<8x1xi32> to vector<8x128xi32>
    %479 = arith.cmpi eq, %0, %478 : vector<8x128xi32>
    %480 = arith.extui %479 : vector<8x128xi1> to vector<8x128xi32>
    %481 = arith.sitofp %480 : vector<8x128xi32> to vector<8x128xf32>
    %482 = arith.truncf %481 : vector<8x128xf32> to vector<8x128xbf16>
    %c4_i32 = arith.constant 4 : i32
    %cst_125 = arith.constant dense<0.000000e+00> : vector<8x96xf32>
    %483 = tpu.matmul %482, %1, %cst_125 {dimension_numbers = #tpu.dot_dimension_numbers<[1], [0], [0], [1], [0, 0, 1, 1], [], []>} : vector<8x128xbf16>, vector<128x96xbf16>, vector<8x96xf32> -> vector<8x96xf32>
    %484 = arith.truncf %401 : vector<8x32xf32> to vector<8x32xbf16>
    %cst_126 = arith.constant dense<0.000000e+00> : vector<8x96xf32>
    %485 = tpu.matmul %484, %9, %cst_126 {dimension_numbers = #tpu.dot_dimension_numbers<[1], [0], [0], [1], [0, 0, 1, 1], [], []>} : vector<8x32xbf16>, vector<32x96xbf16>, vector<8x96xf32> -> vector<8x96xf32>
    %486 = vector.extract_strided_slice %483 {offsets = [0, 0], sizes = [8, 64], strides = [1, 1]} : vector<8x96xf32> to vector<8x64xf32>
    %487 = vector.extract_strided_slice %485 {offsets = [0, 0], sizes = [8, 64], strides = [1, 1]} : vector<8x96xf32> to vector<8x64xf32>
    %488 = arith.addf %486, %487 : vector<8x64xf32>
    %489 = vector.broadcast %15 : vector<1x64xf32> to vector<8x64xf32>
    %490 = arith.addf %488, %489 : vector<8x64xf32>
    %491 = arith.negf %490 : vector<8x64xf32>
    %492 = math.exp %491 : vector<8x64xf32>
    %cst_127 = arith.constant 1.000000e+00 : f32
    %493 = vector.broadcast %cst_127 : f32 to vector<8x64xf32>
    %494 = arith.addf %493, %492 : vector<8x64xf32>
    %495 = arith.divf %493, %494 : vector<8x64xf32>
    %496 = vector.extract_strided_slice %495 {offsets = [0, 0], sizes = [8, 32], strides = [1, 1]} : vector<8x64xf32> to vector<8x32xf32>
    %497 = vector.extract_strided_slice %495 {offsets = [0, 32], sizes = [8, 32], strides = [1, 1]} : vector<8x64xf32> to vector<8x32xf32>
    %498 = vector.extract_strided_slice %483 {offsets = [0, 64], sizes = [8, 32], strides = [1, 1]} : vector<8x96xf32> to vector<8x32xf32>
    %499 = vector.broadcast %21 : vector<1x32xf32> to vector<8x32xf32>
    %500 = arith.addf %498, %499 : vector<8x32xf32>
    %501 = vector.extract_strided_slice %485 {offsets = [0, 64], sizes = [8, 32], strides = [1, 1]} : vector<8x96xf32> to vector<8x32xf32>
    %502 = vector.broadcast %27 : vector<1x32xf32> to vector<8x32xf32>
    %503 = arith.addf %501, %502 : vector<8x32xf32>
    %504 = arith.mulf %496, %503 : vector<8x32xf32>
    %505 = arith.addf %500, %504 : vector<8x32xf32>
    %506 = math.tanh %505 : vector<8x32xf32>
    %cst_128 = arith.constant 1.000000e+00 : f32
    %507 = vector.broadcast %cst_128 : f32 to vector<8x32xf32>
    %508 = arith.subf %507, %497 : vector<8x32xf32>
    %509 = arith.mulf %508, %506 : vector<8x32xf32>
    %510 = arith.mulf %497, %401 : vector<8x32xf32>
    %511 = arith.addf %509, %510 : vector<8x32xf32>
    %512 = arith.truncf %511 : vector<8x32xf32> to vector<8x32xbf16>
    %cst_129 = arith.constant dense<0.000000e+00> : vector<8x96xf32>
    %513 = tpu.matmul %512, %5, %cst_129 {dimension_numbers = #tpu.dot_dimension_numbers<[1], [0], [0], [1], [0, 0, 1, 1], [], []>} : vector<8x32xbf16>, vector<32x96xbf16>, vector<8x96xf32> -> vector<8x96xf32>
    %514 = arith.truncf %431 : vector<8x32xf32> to vector<8x32xbf16>
    %cst_130 = arith.constant dense<0.000000e+00> : vector<8x96xf32>
    %515 = tpu.matmul %514, %11, %cst_130 {dimension_numbers = #tpu.dot_dimension_numbers<[1], [0], [0], [1], [0, 0, 1, 1], [], []>} : vector<8x32xbf16>, vector<32x96xbf16>, vector<8x96xf32> -> vector<8x96xf32>
    %516 = vector.extract_strided_slice %513 {offsets = [0, 0], sizes = [8, 64], strides = [1, 1]} : vector<8x96xf32> to vector<8x64xf32>
    %517 = vector.extract_strided_slice %515 {offsets = [0, 0], sizes = [8, 64], strides = [1, 1]} : vector<8x96xf32> to vector<8x64xf32>
    %518 = arith.addf %516, %517 : vector<8x64xf32>
    %519 = vector.broadcast %17 : vector<1x64xf32> to vector<8x64xf32>
    %520 = arith.addf %518, %519 : vector<8x64xf32>
    %521 = arith.negf %520 : vector<8x64xf32>
    %522 = math.exp %521 : vector<8x64xf32>
    %cst_131 = arith.constant 1.000000e+00 : f32
    %523 = vector.broadcast %cst_131 : f32 to vector<8x64xf32>
    %524 = arith.addf %523, %522 : vector<8x64xf32>
    %525 = arith.divf %523, %524 : vector<8x64xf32>
    %526 = vector.extract_strided_slice %525 {offsets = [0, 0], sizes = [8, 32], strides = [1, 1]} : vector<8x64xf32> to vector<8x32xf32>
    %527 = vector.extract_strided_slice %525 {offsets = [0, 32], sizes = [8, 32], strides = [1, 1]} : vector<8x64xf32> to vector<8x32xf32>
    %528 = vector.extract_strided_slice %513 {offsets = [0, 64], sizes = [8, 32], strides = [1, 1]} : vector<8x96xf32> to vector<8x32xf32>
    %529 = vector.broadcast %23 : vector<1x32xf32> to vector<8x32xf32>
    %530 = arith.addf %528, %529 : vector<8x32xf32>
    %531 = vector.extract_strided_slice %515 {offsets = [0, 64], sizes = [8, 32], strides = [1, 1]} : vector<8x96xf32> to vector<8x32xf32>
    %532 = vector.broadcast %29 : vector<1x32xf32> to vector<8x32xf32>
    %533 = arith.addf %531, %532 : vector<8x32xf32>
    %534 = arith.mulf %526, %533 : vector<8x32xf32>
    %535 = arith.addf %530, %534 : vector<8x32xf32>
    %536 = math.tanh %535 : vector<8x32xf32>
    %cst_132 = arith.constant 1.000000e+00 : f32
    %537 = vector.broadcast %cst_132 : f32 to vector<8x32xf32>
    %538 = arith.subf %537, %527 : vector<8x32xf32>
    %539 = arith.mulf %538, %536 : vector<8x32xf32>
    %540 = arith.mulf %527, %431 : vector<8x32xf32>
    %541 = arith.addf %539, %540 : vector<8x32xf32>
    %542 = arith.truncf %541 : vector<8x32xf32> to vector<8x32xbf16>
    %cst_133 = arith.constant dense<0.000000e+00> : vector<8x96xf32>
    %543 = tpu.matmul %542, %7, %cst_133 {dimension_numbers = #tpu.dot_dimension_numbers<[1], [0], [0], [1], [0, 0, 1, 1], [], []>} : vector<8x32xbf16>, vector<32x96xbf16>, vector<8x96xf32> -> vector<8x96xf32>
    %544 = arith.truncf %461 : vector<8x32xf32> to vector<8x32xbf16>
    %cst_134 = arith.constant dense<0.000000e+00> : vector<8x96xf32>
    %545 = tpu.matmul %544, %13, %cst_134 {dimension_numbers = #tpu.dot_dimension_numbers<[1], [0], [0], [1], [0, 0, 1, 1], [], []>} : vector<8x32xbf16>, vector<32x96xbf16>, vector<8x96xf32> -> vector<8x96xf32>
    %546 = vector.extract_strided_slice %543 {offsets = [0, 0], sizes = [8, 64], strides = [1, 1]} : vector<8x96xf32> to vector<8x64xf32>
    %547 = vector.extract_strided_slice %545 {offsets = [0, 0], sizes = [8, 64], strides = [1, 1]} : vector<8x96xf32> to vector<8x64xf32>
    %548 = arith.addf %546, %547 : vector<8x64xf32>
    %549 = vector.broadcast %19 : vector<1x64xf32> to vector<8x64xf32>
    %550 = arith.addf %548, %549 : vector<8x64xf32>
    %551 = arith.negf %550 : vector<8x64xf32>
    %552 = math.exp %551 : vector<8x64xf32>
    %cst_135 = arith.constant 1.000000e+00 : f32
    %553 = vector.broadcast %cst_135 : f32 to vector<8x64xf32>
    %554 = arith.addf %553, %552 : vector<8x64xf32>
    %555 = arith.divf %553, %554 : vector<8x64xf32>
    %556 = vector.extract_strided_slice %555 {offsets = [0, 0], sizes = [8, 32], strides = [1, 1]} : vector<8x64xf32> to vector<8x32xf32>
    %557 = vector.extract_strided_slice %555 {offsets = [0, 32], sizes = [8, 32], strides = [1, 1]} : vector<8x64xf32> to vector<8x32xf32>
    %558 = vector.extract_strided_slice %543 {offsets = [0, 64], sizes = [8, 32], strides = [1, 1]} : vector<8x96xf32> to vector<8x32xf32>
    %559 = vector.broadcast %25 : vector<1x32xf32> to vector<8x32xf32>
    %560 = arith.addf %558, %559 : vector<8x32xf32>
    %561 = vector.extract_strided_slice %545 {offsets = [0, 64], sizes = [8, 32], strides = [1, 1]} : vector<8x96xf32> to vector<8x32xf32>
    %562 = vector.broadcast %31 : vector<1x32xf32> to vector<8x32xf32>
    %563 = arith.addf %561, %562 : vector<8x32xf32>
    %564 = arith.mulf %556, %563 : vector<8x32xf32>
    %565 = arith.addf %560, %564 : vector<8x32xf32>
    %566 = math.tanh %565 : vector<8x32xf32>
    %cst_136 = arith.constant 1.000000e+00 : f32
    %567 = vector.broadcast %cst_136 : f32 to vector<8x32xf32>
    %568 = arith.subf %567, %557 : vector<8x32xf32>
    %569 = arith.mulf %568, %566 : vector<8x32xf32>
    %570 = arith.mulf %557, %461 : vector<8x32xf32>
    %571 = arith.addf %569, %570 : vector<8x32xf32>
    %572 = arith.truncf %571 : vector<8x32xf32> to vector<8x32xbf16>
    %cst_137 = arith.constant dense<0.000000e+00> : vector<8x128xf32>
    %573 = tpu.matmul %572, %2, %cst_137 {dimension_numbers = #tpu.dot_dimension_numbers<[1], [0], [0], [1], [0, 0, 1, 1], [], []>} : vector<8x32xbf16>, vector<32x128xbf16>, vector<8x128xf32> -> vector<8x128xf32>
    %574 = vector.broadcast %3 : vector<1x128xf32> to vector<8x128xf32>
    %575 = arith.addf %573, %574 : vector<8x128xf32>
    %576 = arith.index_cast %c4_i32 : i32 to index
    %c0_138 = arith.constant 0 : index
    %c0_139 = arith.constant 0 : index
    %577 = vector.load %arg9[%576, %c0_138, %c0_139] : memref<8x8x128xf32, #tpu.memory_space<vmem>>, vector<1x8x128xf32>
    %578 = vector.shape_cast %577 : vector<1x8x128xf32> to vector<8x128xf32>
    %579 = vector.shape_cast %575 : vector<8x128xf32> to vector<1x8x128xf32>
    tpu.vector_store %arg9[%576, %c0_138, %c0_139], %579 {strides = array<i32>} : memref<8x8x128xf32, #tpu.memory_space<vmem>>, vector<1x8x128xf32>,
    %cst_140 = arith.constant dense<0xFF800000> : vector<8xf32>
    %580 = vector.multi_reduction <maximumf>, %575, %cst_140 [1] : vector<8x128xf32> to vector<8xf32>
    %581 = vector.shape_cast %580 : vector<8xf32> to vector<8x1xf32>
    %582 = vector.broadcast %581 : vector<8x1xf32> to vector<8x128xf32>
    %583 = arith.cmpf oeq, %575, %582 : vector<8x128xf32>
    %c128_i32_141 = arith.constant 128 : i32
    %584 = vector.broadcast %c128_i32_141 : i32 to vector<8x128xi32>
    %585 = arith.select %583, %0, %584 : vector<8x128xi1>, vector<8x128xi32>
    %cst_142 = arith.constant dense<2147483647> : vector<8xi32>
    %586 = vector.multi_reduction <minsi>, %585, %cst_142 [1] : vector<8x128xi32> to vector<8xi32>
    %587 = vector.shape_cast %586 : vector<8xi32> to vector<8x1xi32>
    %588 = vector.broadcast %587 : vector<8x1xi32> to vector<8x128xi32>
    %589 = arith.cmpi eq, %0, %588 : vector<8x128xi32>
    %590 = arith.extui %589 : vector<8x128xi1> to vector<8x128xi32>
    %591 = arith.sitofp %590 : vector<8x128xi32> to vector<8x128xf32>
    %592 = arith.truncf %591 : vector<8x128xf32> to vector<8x128xbf16>
    %c5_i32 = arith.constant 5 : i32
    %cst_143 = arith.constant dense<0.000000e+00> : vector<8x96xf32>
    %593 = tpu.matmul %592, %1, %cst_143 {dimension_numbers = #tpu.dot_dimension_numbers<[1], [0], [0], [1], [0, 0, 1, 1], [], []>} : vector<8x128xbf16>, vector<128x96xbf16>, vector<8x96xf32> -> vector<8x96xf32>
    %594 = arith.truncf %511 : vector<8x32xf32> to vector<8x32xbf16>
    %cst_144 = arith.constant dense<0.000000e+00> : vector<8x96xf32>
    %595 = tpu.matmul %594, %9, %cst_144 {dimension_numbers = #tpu.dot_dimension_numbers<[1], [0], [0], [1], [0, 0, 1, 1], [], []>} : vector<8x32xbf16>, vector<32x96xbf16>, vector<8x96xf32> -> vector<8x96xf32>
    %596 = vector.extract_strided_slice %593 {offsets = [0, 0], sizes = [8, 64], strides = [1, 1]} : vector<8x96xf32> to vector<8x64xf32>
    %597 = vector.extract_strided_slice %595 {offsets = [0, 0], sizes = [8, 64], strides = [1, 1]} : vector<8x96xf32> to vector<8x64xf32>
    %598 = arith.addf %596, %597 : vector<8x64xf32>
    %599 = vector.broadcast %15 : vector<1x64xf32> to vector<8x64xf32>
    %600 = arith.addf %598, %599 : vector<8x64xf32>
    %601 = arith.negf %600 : vector<8x64xf32>
    %602 = math.exp %601 : vector<8x64xf32>
    %cst_145 = arith.constant 1.000000e+00 : f32
    %603 = vector.broadcast %cst_145 : f32 to vector<8x64xf32>
    %604 = arith.addf %603, %602 : vector<8x64xf32>
    %605 = arith.divf %603, %604 : vector<8x64xf32>
    %606 = vector.extract_strided_slice %605 {offsets = [0, 0], sizes = [8, 32], strides = [1, 1]} : vector<8x64xf32> to vector<8x32xf32>
    %607 = vector.extract_strided_slice %605 {offsets = [0, 32], sizes = [8, 32], strides = [1, 1]} : vector<8x64xf32> to vector<8x32xf32>
    %608 = vector.extract_strided_slice %593 {offsets = [0, 64], sizes = [8, 32], strides = [1, 1]} : vector<8x96xf32> to vector<8x32xf32>
    %609 = vector.broadcast %21 : vector<1x32xf32> to vector<8x32xf32>
    %610 = arith.addf %608, %609 : vector<8x32xf32>
    %611 = vector.extract_strided_slice %595 {offsets = [0, 64], sizes = [8, 32], strides = [1, 1]} : vector<8x96xf32> to vector<8x32xf32>
    %612 = vector.broadcast %27 : vector<1x32xf32> to vector<8x32xf32>
    %613 = arith.addf %611, %612 : vector<8x32xf32>
    %614 = arith.mulf %606, %613 : vector<8x32xf32>
    %615 = arith.addf %610, %614 : vector<8x32xf32>
    %616 = math.tanh %615 : vector<8x32xf32>
    %cst_146 = arith.constant 1.000000e+00 : f32
    %617 = vector.broadcast %cst_146 : f32 to vector<8x32xf32>
    %618 = arith.subf %617, %607 : vector<8x32xf32>
    %619 = arith.mulf %618, %616 : vector<8x32xf32>
    %620 = arith.mulf %607, %511 : vector<8x32xf32>
    %621 = arith.addf %619, %620 : vector<8x32xf32>
    %622 = arith.truncf %621 : vector<8x32xf32> to vector<8x32xbf16>
    %cst_147 = arith.constant dense<0.000000e+00> : vector<8x96xf32>
    %623 = tpu.matmul %622, %5, %cst_147 {dimension_numbers = #tpu.dot_dimension_numbers<[1], [0], [0], [1], [0, 0, 1, 1], [], []>} : vector<8x32xbf16>, vector<32x96xbf16>, vector<8x96xf32> -> vector<8x96xf32>
    %624 = arith.truncf %541 : vector<8x32xf32> to vector<8x32xbf16>
    %cst_148 = arith.constant dense<0.000000e+00> : vector<8x96xf32>
    %625 = tpu.matmul %624, %11, %cst_148 {dimension_numbers = #tpu.dot_dimension_numbers<[1], [0], [0], [1], [0, 0, 1, 1], [], []>} : vector<8x32xbf16>, vector<32x96xbf16>, vector<8x96xf32> -> vector<8x96xf32>
    %626 = vector.extract_strided_slice %623 {offsets = [0, 0], sizes = [8, 64], strides = [1, 1]} : vector<8x96xf32> to vector<8x64xf32>
    %627 = vector.extract_strided_slice %625 {offsets = [0, 0], sizes = [8, 64], strides = [1, 1]} : vector<8x96xf32> to vector<8x64xf32>
    %628 = arith.addf %626, %627 : vector<8x64xf32>
    %629 = vector.broadcast %17 : vector<1x64xf32> to vector<8x64xf32>
    %630 = arith.addf %628, %629 : vector<8x64xf32>
    %631 = arith.negf %630 : vector<8x64xf32>
    %632 = math.exp %631 : vector<8x64xf32>
    %cst_149 = arith.constant 1.000000e+00 : f32
    %633 = vector.broadcast %cst_149 : f32 to vector<8x64xf32>
    %634 = arith.addf %633, %632 : vector<8x64xf32>
    %635 = arith.divf %633, %634 : vector<8x64xf32>
    %636 = vector.extract_strided_slice %635 {offsets = [0, 0], sizes = [8, 32], strides = [1, 1]} : vector<8x64xf32> to vector<8x32xf32>
    %637 = vector.extract_strided_slice %635 {offsets = [0, 32], sizes = [8, 32], strides = [1, 1]} : vector<8x64xf32> to vector<8x32xf32>
    %638 = vector.extract_strided_slice %623 {offsets = [0, 64], sizes = [8, 32], strides = [1, 1]} : vector<8x96xf32> to vector<8x32xf32>
    %639 = vector.broadcast %23 : vector<1x32xf32> to vector<8x32xf32>
    %640 = arith.addf %638, %639 : vector<8x32xf32>
    %641 = vector.extract_strided_slice %625 {offsets = [0, 64], sizes = [8, 32], strides = [1, 1]} : vector<8x96xf32> to vector<8x32xf32>
    %642 = vector.broadcast %29 : vector<1x32xf32> to vector<8x32xf32>
    %643 = arith.addf %641, %642 : vector<8x32xf32>
    %644 = arith.mulf %636, %643 : vector<8x32xf32>
    %645 = arith.addf %640, %644 : vector<8x32xf32>
    %646 = math.tanh %645 : vector<8x32xf32>
    %cst_150 = arith.constant 1.000000e+00 : f32
    %647 = vector.broadcast %cst_150 : f32 to vector<8x32xf32>
    %648 = arith.subf %647, %637 : vector<8x32xf32>
    %649 = arith.mulf %648, %646 : vector<8x32xf32>
    %650 = arith.mulf %637, %541 : vector<8x32xf32>
    %651 = arith.addf %649, %650 : vector<8x32xf32>
    %652 = arith.truncf %651 : vector<8x32xf32> to vector<8x32xbf16>
    %cst_151 = arith.constant dense<0.000000e+00> : vector<8x96xf32>
    %653 = tpu.matmul %652, %7, %cst_151 {dimension_numbers = #tpu.dot_dimension_numbers<[1], [0], [0], [1], [0, 0, 1, 1], [], []>} : vector<8x32xbf16>, vector<32x96xbf16>, vector<8x96xf32> -> vector<8x96xf32>
    %654 = arith.truncf %571 : vector<8x32xf32> to vector<8x32xbf16>
    %cst_152 = arith.constant dense<0.000000e+00> : vector<8x96xf32>
    %655 = tpu.matmul %654, %13, %cst_152 {dimension_numbers = #tpu.dot_dimension_numbers<[1], [0], [0], [1], [0, 0, 1, 1], [], []>} : vector<8x32xbf16>, vector<32x96xbf16>, vector<8x96xf32> -> vector<8x96xf32>
    %656 = vector.extract_strided_slice %653 {offsets = [0, 0], sizes = [8, 64], strides = [1, 1]} : vector<8x96xf32> to vector<8x64xf32>
    %657 = vector.extract_strided_slice %655 {offsets = [0, 0], sizes = [8, 64], strides = [1, 1]} : vector<8x96xf32> to vector<8x64xf32>
    %658 = arith.addf %656, %657 : vector<8x64xf32>
    %659 = vector.broadcast %19 : vector<1x64xf32> to vector<8x64xf32>
    %660 = arith.addf %658, %659 : vector<8x64xf32>
    %661 = arith.negf %660 : vector<8x64xf32>
    %662 = math.exp %661 : vector<8x64xf32>
    %cst_153 = arith.constant 1.000000e+00 : f32
    %663 = vector.broadcast %cst_153 : f32 to vector<8x64xf32>
    %664 = arith.addf %663, %662 : vector<8x64xf32>
    %665 = arith.divf %663, %664 : vector<8x64xf32>
    %666 = vector.extract_strided_slice %665 {offsets = [0, 0], sizes = [8, 32], strides = [1, 1]} : vector<8x64xf32> to vector<8x32xf32>
    %667 = vector.extract_strided_slice %665 {offsets = [0, 32], sizes = [8, 32], strides = [1, 1]} : vector<8x64xf32> to vector<8x32xf32>
    %668 = vector.extract_strided_slice %653 {offsets = [0, 64], sizes = [8, 32], strides = [1, 1]} : vector<8x96xf32> to vector<8x32xf32>
    %669 = vector.broadcast %25 : vector<1x32xf32> to vector<8x32xf32>
    %670 = arith.addf %668, %669 : vector<8x32xf32>
    %671 = vector.extract_strided_slice %655 {offsets = [0, 64], sizes = [8, 32], strides = [1, 1]} : vector<8x96xf32> to vector<8x32xf32>
    %672 = vector.broadcast %31 : vector<1x32xf32> to vector<8x32xf32>
    %673 = arith.addf %671, %672 : vector<8x32xf32>
    %674 = arith.mulf %666, %673 : vector<8x32xf32>
    %675 = arith.addf %670, %674 : vector<8x32xf32>
    %676 = math.tanh %675 : vector<8x32xf32>
    %cst_154 = arith.constant 1.000000e+00 : f32
    %677 = vector.broadcast %cst_154 : f32 to vector<8x32xf32>
    %678 = arith.subf %677, %667 : vector<8x32xf32>
    %679 = arith.mulf %678, %676 : vector<8x32xf32>
    %680 = arith.mulf %667, %571 : vector<8x32xf32>
    %681 = arith.addf %679, %680 : vector<8x32xf32>
    %682 = arith.truncf %681 : vector<8x32xf32> to vector<8x32xbf16>
    %cst_155 = arith.constant dense<0.000000e+00> : vector<8x128xf32>
    %683 = tpu.matmul %682, %2, %cst_155 {dimension_numbers = #tpu.dot_dimension_numbers<[1], [0], [0], [1], [0, 0, 1, 1], [], []>} : vector<8x32xbf16>, vector<32x128xbf16>, vector<8x128xf32> -> vector<8x128xf32>
    %684 = vector.broadcast %3 : vector<1x128xf32> to vector<8x128xf32>
    %685 = arith.addf %683, %684 : vector<8x128xf32>
    %686 = arith.index_cast %c5_i32 : i32 to index
    %c0_156 = arith.constant 0 : index
    %c0_157 = arith.constant 0 : index
    %687 = vector.load %arg9[%686, %c0_156, %c0_157] : memref<8x8x128xf32, #tpu.memory_space<vmem>>, vector<1x8x128xf32>
    %688 = vector.shape_cast %687 : vector<1x8x128xf32> to vector<8x128xf32>
    %689 = vector.shape_cast %685 : vector<8x128xf32> to vector<1x8x128xf32>
    tpu.vector_store %arg9[%686, %c0_156, %c0_157], %689 {strides = array<i32>} : memref<8x8x128xf32, #tpu.memory_space<vmem>>, vector<1x8x128xf32>,
    %cst_158 = arith.constant dense<0xFF800000> : vector<8xf32>
    %690 = vector.multi_reduction <maximumf>, %685, %cst_158 [1] : vector<8x128xf32> to vector<8xf32>
    %691 = vector.shape_cast %690 : vector<8xf32> to vector<8x1xf32>
    %692 = vector.broadcast %691 : vector<8x1xf32> to vector<8x128xf32>
    %693 = arith.cmpf oeq, %685, %692 : vector<8x128xf32>
    %c128_i32_159 = arith.constant 128 : i32
    %694 = vector.broadcast %c128_i32_159 : i32 to vector<8x128xi32>
    %695 = arith.select %693, %0, %694 : vector<8x128xi1>, vector<8x128xi32>
    %cst_160 = arith.constant dense<2147483647> : vector<8xi32>
    %696 = vector.multi_reduction <minsi>, %695, %cst_160 [1] : vector<8x128xi32> to vector<8xi32>
    %697 = vector.shape_cast %696 : vector<8xi32> to vector<8x1xi32>
    %698 = vector.broadcast %697 : vector<8x1xi32> to vector<8x128xi32>
    %699 = arith.cmpi eq, %0, %698 : vector<8x128xi32>
    %700 = arith.extui %699 : vector<8x128xi1> to vector<8x128xi32>
    %701 = arith.sitofp %700 : vector<8x128xi32> to vector<8x128xf32>
    %702 = arith.truncf %701 : vector<8x128xf32> to vector<8x128xbf16>
    %c6_i32 = arith.constant 6 : i32
    %cst_161 = arith.constant dense<0.000000e+00> : vector<8x96xf32>
    %703 = tpu.matmul %702, %1, %cst_161 {dimension_numbers = #tpu.dot_dimension_numbers<[1], [0], [0], [1], [0, 0, 1, 1], [], []>} : vector<8x128xbf16>, vector<128x96xbf16>, vector<8x96xf32> -> vector<8x96xf32>
    %704 = arith.truncf %621 : vector<8x32xf32> to vector<8x32xbf16>
    %cst_162 = arith.constant dense<0.000000e+00> : vector<8x96xf32>
    %705 = tpu.matmul %704, %9, %cst_162 {dimension_numbers = #tpu.dot_dimension_numbers<[1], [0], [0], [1], [0, 0, 1, 1], [], []>} : vector<8x32xbf16>, vector<32x96xbf16>, vector<8x96xf32> -> vector<8x96xf32>
    %706 = vector.extract_strided_slice %703 {offsets = [0, 0], sizes = [8, 64], strides = [1, 1]} : vector<8x96xf32> to vector<8x64xf32>
    %707 = vector.extract_strided_slice %705 {offsets = [0, 0], sizes = [8, 64], strides = [1, 1]} : vector<8x96xf32> to vector<8x64xf32>
    %708 = arith.addf %706, %707 : vector<8x64xf32>
    %709 = vector.broadcast %15 : vector<1x64xf32> to vector<8x64xf32>
    %710 = arith.addf %708, %709 : vector<8x64xf32>
    %711 = arith.negf %710 : vector<8x64xf32>
    %712 = math.exp %711 : vector<8x64xf32>
    %cst_163 = arith.constant 1.000000e+00 : f32
    %713 = vector.broadcast %cst_163 : f32 to vector<8x64xf32>
    %714 = arith.addf %713, %712 : vector<8x64xf32>
    %715 = arith.divf %713, %714 : vector<8x64xf32>
    %716 = vector.extract_strided_slice %715 {offsets = [0, 0], sizes = [8, 32], strides = [1, 1]} : vector<8x64xf32> to vector<8x32xf32>
    %717 = vector.extract_strided_slice %715 {offsets = [0, 32], sizes = [8, 32], strides = [1, 1]} : vector<8x64xf32> to vector<8x32xf32>
    %718 = vector.extract_strided_slice %703 {offsets = [0, 64], sizes = [8, 32], strides = [1, 1]} : vector<8x96xf32> to vector<8x32xf32>
    %719 = vector.broadcast %21 : vector<1x32xf32> to vector<8x32xf32>
    %720 = arith.addf %718, %719 : vector<8x32xf32>
    %721 = vector.extract_strided_slice %705 {offsets = [0, 64], sizes = [8, 32], strides = [1, 1]} : vector<8x96xf32> to vector<8x32xf32>
    %722 = vector.broadcast %27 : vector<1x32xf32> to vector<8x32xf32>
    %723 = arith.addf %721, %722 : vector<8x32xf32>
    %724 = arith.mulf %716, %723 : vector<8x32xf32>
    %725 = arith.addf %720, %724 : vector<8x32xf32>
    %726 = math.tanh %725 : vector<8x32xf32>
    %cst_164 = arith.constant 1.000000e+00 : f32
    %727 = vector.broadcast %cst_164 : f32 to vector<8x32xf32>
    %728 = arith.subf %727, %717 : vector<8x32xf32>
    %729 = arith.mulf %728, %726 : vector<8x32xf32>
    %730 = arith.mulf %717, %621 : vector<8x32xf32>
    %731 = arith.addf %729, %730 : vector<8x32xf32>
    %732 = arith.truncf %731 : vector<8x32xf32> to vector<8x32xbf16>
    %cst_165 = arith.constant dense<0.000000e+00> : vector<8x96xf32>
    %733 = tpu.matmul %732, %5, %cst_165 {dimension_numbers = #tpu.dot_dimension_numbers<[1], [0], [0], [1], [0, 0, 1, 1], [], []>} : vector<8x32xbf16>, vector<32x96xbf16>, vector<8x96xf32> -> vector<8x96xf32>
    %734 = arith.truncf %651 : vector<8x32xf32> to vector<8x32xbf16>
    %cst_166 = arith.constant dense<0.000000e+00> : vector<8x96xf32>
    %735 = tpu.matmul %734, %11, %cst_166 {dimension_numbers = #tpu.dot_dimension_numbers<[1], [0], [0], [1], [0, 0, 1, 1], [], []>} : vector<8x32xbf16>, vector<32x96xbf16>, vector<8x96xf32> -> vector<8x96xf32>
    %736 = vector.extract_strided_slice %733 {offsets = [0, 0], sizes = [8, 64], strides = [1, 1]} : vector<8x96xf32> to vector<8x64xf32>
    %737 = vector.extract_strided_slice %735 {offsets = [0, 0], sizes = [8, 64], strides = [1, 1]} : vector<8x96xf32> to vector<8x64xf32>
    %738 = arith.addf %736, %737 : vector<8x64xf32>
    %739 = vector.broadcast %17 : vector<1x64xf32> to vector<8x64xf32>
    %740 = arith.addf %738, %739 : vector<8x64xf32>
    %741 = arith.negf %740 : vector<8x64xf32>
    %742 = math.exp %741 : vector<8x64xf32>
    %cst_167 = arith.constant 1.000000e+00 : f32
    %743 = vector.broadcast %cst_167 : f32 to vector<8x64xf32>
    %744 = arith.addf %743, %742 : vector<8x64xf32>
    %745 = arith.divf %743, %744 : vector<8x64xf32>
    %746 = vector.extract_strided_slice %745 {offsets = [0, 0], sizes = [8, 32], strides = [1, 1]} : vector<8x64xf32> to vector<8x32xf32>
    %747 = vector.extract_strided_slice %745 {offsets = [0, 32], sizes = [8, 32], strides = [1, 1]} : vector<8x64xf32> to vector<8x32xf32>
    %748 = vector.extract_strided_slice %733 {offsets = [0, 64], sizes = [8, 32], strides = [1, 1]} : vector<8x96xf32> to vector<8x32xf32>
    %749 = vector.broadcast %23 : vector<1x32xf32> to vector<8x32xf32>
    %750 = arith.addf %748, %749 : vector<8x32xf32>
    %751 = vector.extract_strided_slice %735 {offsets = [0, 64], sizes = [8, 32], strides = [1, 1]} : vector<8x96xf32> to vector<8x32xf32>
    %752 = vector.broadcast %29 : vector<1x32xf32> to vector<8x32xf32>
    %753 = arith.addf %751, %752 : vector<8x32xf32>
    %754 = arith.mulf %746, %753 : vector<8x32xf32>
    %755 = arith.addf %750, %754 : vector<8x32xf32>
    %756 = math.tanh %755 : vector<8x32xf32>
    %cst_168 = arith.constant 1.000000e+00 : f32
    %757 = vector.broadcast %cst_168 : f32 to vector<8x32xf32>
    %758 = arith.subf %757, %747 : vector<8x32xf32>
    %759 = arith.mulf %758, %756 : vector<8x32xf32>
    %760 = arith.mulf %747, %651 : vector<8x32xf32>
    %761 = arith.addf %759, %760 : vector<8x32xf32>
    %762 = arith.truncf %761 : vector<8x32xf32> to vector<8x32xbf16>
    %cst_169 = arith.constant dense<0.000000e+00> : vector<8x96xf32>
    %763 = tpu.matmul %762, %7, %cst_169 {dimension_numbers = #tpu.dot_dimension_numbers<[1], [0], [0], [1], [0, 0, 1, 1], [], []>} : vector<8x32xbf16>, vector<32x96xbf16>, vector<8x96xf32> -> vector<8x96xf32>
    %764 = arith.truncf %681 : vector<8x32xf32> to vector<8x32xbf16>
    %cst_170 = arith.constant dense<0.000000e+00> : vector<8x96xf32>
    %765 = tpu.matmul %764, %13, %cst_170 {dimension_numbers = #tpu.dot_dimension_numbers<[1], [0], [0], [1], [0, 0, 1, 1], [], []>} : vector<8x32xbf16>, vector<32x96xbf16>, vector<8x96xf32> -> vector<8x96xf32>
    %766 = vector.extract_strided_slice %763 {offsets = [0, 0], sizes = [8, 64], strides = [1, 1]} : vector<8x96xf32> to vector<8x64xf32>
    %767 = vector.extract_strided_slice %765 {offsets = [0, 0], sizes = [8, 64], strides = [1, 1]} : vector<8x96xf32> to vector<8x64xf32>
    %768 = arith.addf %766, %767 : vector<8x64xf32>
    %769 = vector.broadcast %19 : vector<1x64xf32> to vector<8x64xf32>
    %770 = arith.addf %768, %769 : vector<8x64xf32>
    %771 = arith.negf %770 : vector<8x64xf32>
    %772 = math.exp %771 : vector<8x64xf32>
    %cst_171 = arith.constant 1.000000e+00 : f32
    %773 = vector.broadcast %cst_171 : f32 to vector<8x64xf32>
    %774 = arith.addf %773, %772 : vector<8x64xf32>
    %775 = arith.divf %773, %774 : vector<8x64xf32>
    %776 = vector.extract_strided_slice %775 {offsets = [0, 0], sizes = [8, 32], strides = [1, 1]} : vector<8x64xf32> to vector<8x32xf32>
    %777 = vector.extract_strided_slice %775 {offsets = [0, 32], sizes = [8, 32], strides = [1, 1]} : vector<8x64xf32> to vector<8x32xf32>
    %778 = vector.extract_strided_slice %763 {offsets = [0, 64], sizes = [8, 32], strides = [1, 1]} : vector<8x96xf32> to vector<8x32xf32>
    %779 = vector.broadcast %25 : vector<1x32xf32> to vector<8x32xf32>
    %780 = arith.addf %778, %779 : vector<8x32xf32>
    %781 = vector.extract_strided_slice %765 {offsets = [0, 64], sizes = [8, 32], strides = [1, 1]} : vector<8x96xf32> to vector<8x32xf32>
    %782 = vector.broadcast %31 : vector<1x32xf32> to vector<8x32xf32>
    %783 = arith.addf %781, %782 : vector<8x32xf32>
    %784 = arith.mulf %776, %783 : vector<8x32xf32>
    %785 = arith.addf %780, %784 : vector<8x32xf32>
    %786 = math.tanh %785 : vector<8x32xf32>
    %cst_172 = arith.constant 1.000000e+00 : f32
    %787 = vector.broadcast %cst_172 : f32 to vector<8x32xf32>
    %788 = arith.subf %787, %777 : vector<8x32xf32>
    %789 = arith.mulf %788, %786 : vector<8x32xf32>
    %790 = arith.mulf %777, %681 : vector<8x32xf32>
    %791 = arith.addf %789, %790 : vector<8x32xf32>
    %792 = arith.truncf %791 : vector<8x32xf32> to vector<8x32xbf16>
    %cst_173 = arith.constant dense<0.000000e+00> : vector<8x128xf32>
    %793 = tpu.matmul %792, %2, %cst_173 {dimension_numbers = #tpu.dot_dimension_numbers<[1], [0], [0], [1], [0, 0, 1, 1], [], []>} : vector<8x32xbf16>, vector<32x128xbf16>, vector<8x128xf32> -> vector<8x128xf32>
    %794 = vector.broadcast %3 : vector<1x128xf32> to vector<8x128xf32>
    %795 = arith.addf %793, %794 : vector<8x128xf32>
    %796 = arith.index_cast %c6_i32 : i32 to index
    %c0_174 = arith.constant 0 : index
    %c0_175 = arith.constant 0 : index
    %797 = vector.load %arg9[%796, %c0_174, %c0_175] : memref<8x8x128xf32, #tpu.memory_space<vmem>>, vector<1x8x128xf32>
    %798 = vector.shape_cast %797 : vector<1x8x128xf32> to vector<8x128xf32>
    %799 = vector.shape_cast %795 : vector<8x128xf32> to vector<1x8x128xf32>
    tpu.vector_store %arg9[%796, %c0_174, %c0_175], %799 {strides = array<i32>} : memref<8x8x128xf32, #tpu.memory_space<vmem>>, vector<1x8x128xf32>,
    %cst_176 = arith.constant dense<0xFF800000> : vector<8xf32>
    %800 = vector.multi_reduction <maximumf>, %795, %cst_176 [1] : vector<8x128xf32> to vector<8xf32>
    %801 = vector.shape_cast %800 : vector<8xf32> to vector<8x1xf32>
    %802 = vector.broadcast %801 : vector<8x1xf32> to vector<8x128xf32>
    %803 = arith.cmpf oeq, %795, %802 : vector<8x128xf32>
    %c128_i32_177 = arith.constant 128 : i32
    %804 = vector.broadcast %c128_i32_177 : i32 to vector<8x128xi32>
    %805 = arith.select %803, %0, %804 : vector<8x128xi1>, vector<8x128xi32>
    %cst_178 = arith.constant dense<2147483647> : vector<8xi32>
    %806 = vector.multi_reduction <minsi>, %805, %cst_178 [1] : vector<8x128xi32> to vector<8xi32>
    %807 = vector.shape_cast %806 : vector<8xi32> to vector<8x1xi32>
    %808 = vector.broadcast %807 : vector<8x1xi32> to vector<8x128xi32>
    %809 = arith.cmpi eq, %0, %808 : vector<8x128xi32>
    %810 = arith.extui %809 : vector<8x128xi1> to vector<8x128xi32>
    %811 = arith.sitofp %810 : vector<8x128xi32> to vector<8x128xf32>
    %812 = arith.truncf %811 : vector<8x128xf32> to vector<8x128xbf16>
    %c7_i32 = arith.constant 7 : i32
    %cst_179 = arith.constant dense<0.000000e+00> : vector<8x96xf32>
    %813 = tpu.matmul %812, %1, %cst_179 {dimension_numbers = #tpu.dot_dimension_numbers<[1], [0], [0], [1], [0, 0, 1, 1], [], []>} : vector<8x128xbf16>, vector<128x96xbf16>, vector<8x96xf32> -> vector<8x96xf32>
    %814 = arith.truncf %731 : vector<8x32xf32> to vector<8x32xbf16>
    %cst_180 = arith.constant dense<0.000000e+00> : vector<8x96xf32>
    %815 = tpu.matmul %814, %9, %cst_180 {dimension_numbers = #tpu.dot_dimension_numbers<[1], [0], [0], [1], [0, 0, 1, 1], [], []>} : vector<8x32xbf16>, vector<32x96xbf16>, vector<8x96xf32> -> vector<8x96xf32>
    %816 = vector.extract_strided_slice %813 {offsets = [0, 0], sizes = [8, 64], strides = [1, 1]} : vector<8x96xf32> to vector<8x64xf32>
    %817 = vector.extract_strided_slice %815 {offsets = [0, 0], sizes = [8, 64], strides = [1, 1]} : vector<8x96xf32> to vector<8x64xf32>
    %818 = arith.addf %816, %817 : vector<8x64xf32>
    %819 = vector.broadcast %15 : vector<1x64xf32> to vector<8x64xf32>
    %820 = arith.addf %818, %819 : vector<8x64xf32>
    %821 = arith.negf %820 : vector<8x64xf32>
    %822 = math.exp %821 : vector<8x64xf32>
    %cst_181 = arith.constant 1.000000e+00 : f32
    %823 = vector.broadcast %cst_181 : f32 to vector<8x64xf32>
    %824 = arith.addf %823, %822 : vector<8x64xf32>
    %825 = arith.divf %823, %824 : vector<8x64xf32>
    %826 = vector.extract_strided_slice %825 {offsets = [0, 0], sizes = [8, 32], strides = [1, 1]} : vector<8x64xf32> to vector<8x32xf32>
    %827 = vector.extract_strided_slice %825 {offsets = [0, 32], sizes = [8, 32], strides = [1, 1]} : vector<8x64xf32> to vector<8x32xf32>
    %828 = vector.extract_strided_slice %813 {offsets = [0, 64], sizes = [8, 32], strides = [1, 1]} : vector<8x96xf32> to vector<8x32xf32>
    %829 = vector.broadcast %21 : vector<1x32xf32> to vector<8x32xf32>
    %830 = arith.addf %828, %829 : vector<8x32xf32>
    %831 = vector.extract_strided_slice %815 {offsets = [0, 64], sizes = [8, 32], strides = [1, 1]} : vector<8x96xf32> to vector<8x32xf32>
    %832 = vector.broadcast %27 : vector<1x32xf32> to vector<8x32xf32>
    %833 = arith.addf %831, %832 : vector<8x32xf32>
    %834 = arith.mulf %826, %833 : vector<8x32xf32>
    %835 = arith.addf %830, %834 : vector<8x32xf32>
    %836 = math.tanh %835 : vector<8x32xf32>
    %cst_182 = arith.constant 1.000000e+00 : f32
    %837 = vector.broadcast %cst_182 : f32 to vector<8x32xf32>
    %838 = arith.subf %837, %827 : vector<8x32xf32>
    %839 = arith.mulf %838, %836 : vector<8x32xf32>
    %840 = arith.mulf %827, %731 : vector<8x32xf32>
    %841 = arith.addf %839, %840 : vector<8x32xf32>
    %842 = arith.truncf %841 : vector<8x32xf32> to vector<8x32xbf16>
    %cst_183 = arith.constant dense<0.000000e+00> : vector<8x96xf32>
    %843 = tpu.matmul %842, %5, %cst_183 {dimension_numbers = #tpu.dot_dimension_numbers<[1], [0], [0], [1], [0, 0, 1, 1], [], []>} : vector<8x32xbf16>, vector<32x96xbf16>, vector<8x96xf32> -> vector<8x96xf32>
    %844 = arith.truncf %761 : vector<8x32xf32> to vector<8x32xbf16>
    %cst_184 = arith.constant dense<0.000000e+00> : vector<8x96xf32>
    %845 = tpu.matmul %844, %11, %cst_184 {dimension_numbers = #tpu.dot_dimension_numbers<[1], [0], [0], [1], [0, 0, 1, 1], [], []>} : vector<8x32xbf16>, vector<32x96xbf16>, vector<8x96xf32> -> vector<8x96xf32>
    %846 = vector.extract_strided_slice %843 {offsets = [0, 0], sizes = [8, 64], strides = [1, 1]} : vector<8x96xf32> to vector<8x64xf32>
    %847 = vector.extract_strided_slice %845 {offsets = [0, 0], sizes = [8, 64], strides = [1, 1]} : vector<8x96xf32> to vector<8x64xf32>
    %848 = arith.addf %846, %847 : vector<8x64xf32>
    %849 = vector.broadcast %17 : vector<1x64xf32> to vector<8x64xf32>
    %850 = arith.addf %848, %849 : vector<8x64xf32>
    %851 = arith.negf %850 : vector<8x64xf32>
    %852 = math.exp %851 : vector<8x64xf32>
    %cst_185 = arith.constant 1.000000e+00 : f32
    %853 = vector.broadcast %cst_185 : f32 to vector<8x64xf32>
    %854 = arith.addf %853, %852 : vector<8x64xf32>
    %855 = arith.divf %853, %854 : vector<8x64xf32>
    %856 = vector.extract_strided_slice %855 {offsets = [0, 0], sizes = [8, 32], strides = [1, 1]} : vector<8x64xf32> to vector<8x32xf32>
    %857 = vector.extract_strided_slice %855 {offsets = [0, 32], sizes = [8, 32], strides = [1, 1]} : vector<8x64xf32> to vector<8x32xf32>
    %858 = vector.extract_strided_slice %843 {offsets = [0, 64], sizes = [8, 32], strides = [1, 1]} : vector<8x96xf32> to vector<8x32xf32>
    %859 = vector.broadcast %23 : vector<1x32xf32> to vector<8x32xf32>
    %860 = arith.addf %858, %859 : vector<8x32xf32>
    %861 = vector.extract_strided_slice %845 {offsets = [0, 64], sizes = [8, 32], strides = [1, 1]} : vector<8x96xf32> to vector<8x32xf32>
    %862 = vector.broadcast %29 : vector<1x32xf32> to vector<8x32xf32>
    %863 = arith.addf %861, %862 : vector<8x32xf32>
    %864 = arith.mulf %856, %863 : vector<8x32xf32>
    %865 = arith.addf %860, %864 : vector<8x32xf32>
    %866 = math.tanh %865 : vector<8x32xf32>
    %cst_186 = arith.constant 1.000000e+00 : f32
    %867 = vector.broadcast %cst_186 : f32 to vector<8x32xf32>
    %868 = arith.subf %867, %857 : vector<8x32xf32>
    %869 = arith.mulf %868, %866 : vector<8x32xf32>
    %870 = arith.mulf %857, %761 : vector<8x32xf32>
    %871 = arith.addf %869, %870 : vector<8x32xf32>
    %872 = arith.truncf %871 : vector<8x32xf32> to vector<8x32xbf16>
    %cst_187 = arith.constant dense<0.000000e+00> : vector<8x96xf32>
    %873 = tpu.matmul %872, %7, %cst_187 {dimension_numbers = #tpu.dot_dimension_numbers<[1], [0], [0], [1], [0, 0, 1, 1], [], []>} : vector<8x32xbf16>, vector<32x96xbf16>, vector<8x96xf32> -> vector<8x96xf32>
    %874 = arith.truncf %791 : vector<8x32xf32> to vector<8x32xbf16>
    %cst_188 = arith.constant dense<0.000000e+00> : vector<8x96xf32>
    %875 = tpu.matmul %874, %13, %cst_188 {dimension_numbers = #tpu.dot_dimension_numbers<[1], [0], [0], [1], [0, 0, 1, 1], [], []>} : vector<8x32xbf16>, vector<32x96xbf16>, vector<8x96xf32> -> vector<8x96xf32>
    %876 = vector.extract_strided_slice %873 {offsets = [0, 0], sizes = [8, 64], strides = [1, 1]} : vector<8x96xf32> to vector<8x64xf32>
    %877 = vector.extract_strided_slice %875 {offsets = [0, 0], sizes = [8, 64], strides = [1, 1]} : vector<8x96xf32> to vector<8x64xf32>
    %878 = arith.addf %876, %877 : vector<8x64xf32>
    %879 = vector.broadcast %19 : vector<1x64xf32> to vector<8x64xf32>
    %880 = arith.addf %878, %879 : vector<8x64xf32>
    %881 = arith.negf %880 : vector<8x64xf32>
    %882 = math.exp %881 : vector<8x64xf32>
    %cst_189 = arith.constant 1.000000e+00 : f32
    %883 = vector.broadcast %cst_189 : f32 to vector<8x64xf32>
    %884 = arith.addf %883, %882 : vector<8x64xf32>
    %885 = arith.divf %883, %884 : vector<8x64xf32>
    %886 = vector.extract_strided_slice %885 {offsets = [0, 0], sizes = [8, 32], strides = [1, 1]} : vector<8x64xf32> to vector<8x32xf32>
    %887 = vector.extract_strided_slice %885 {offsets = [0, 32], sizes = [8, 32], strides = [1, 1]} : vector<8x64xf32> to vector<8x32xf32>
    %888 = vector.extract_strided_slice %873 {offsets = [0, 64], sizes = [8, 32], strides = [1, 1]} : vector<8x96xf32> to vector<8x32xf32>
    %889 = vector.broadcast %25 : vector<1x32xf32> to vector<8x32xf32>
    %890 = arith.addf %888, %889 : vector<8x32xf32>
    %891 = vector.extract_strided_slice %875 {offsets = [0, 64], sizes = [8, 32], strides = [1, 1]} : vector<8x96xf32> to vector<8x32xf32>
    %892 = vector.broadcast %31 : vector<1x32xf32> to vector<8x32xf32>
    %893 = arith.addf %891, %892 : vector<8x32xf32>
    %894 = arith.mulf %886, %893 : vector<8x32xf32>
    %895 = arith.addf %890, %894 : vector<8x32xf32>
    %896 = math.tanh %895 : vector<8x32xf32>
    %cst_190 = arith.constant 1.000000e+00 : f32
    %897 = vector.broadcast %cst_190 : f32 to vector<8x32xf32>
    %898 = arith.subf %897, %887 : vector<8x32xf32>
    %899 = arith.mulf %898, %896 : vector<8x32xf32>
    %900 = arith.mulf %887, %791 : vector<8x32xf32>
    %901 = arith.addf %899, %900 : vector<8x32xf32>
    %902 = arith.truncf %901 : vector<8x32xf32> to vector<8x32xbf16>
    %cst_191 = arith.constant dense<0.000000e+00> : vector<8x128xf32>
    %903 = tpu.matmul %902, %2, %cst_191 {dimension_numbers = #tpu.dot_dimension_numbers<[1], [0], [0], [1], [0, 0, 1, 1], [], []>} : vector<8x32xbf16>, vector<32x128xbf16>, vector<8x128xf32> -> vector<8x128xf32>
    %904 = vector.broadcast %3 : vector<1x128xf32> to vector<8x128xf32>
    %905 = arith.addf %903, %904 : vector<8x128xf32>
    %906 = arith.index_cast %c7_i32 : i32 to index
    %c0_192 = arith.constant 0 : index
    %c0_193 = arith.constant 0 : index
    %907 = vector.load %arg9[%906, %c0_192, %c0_193] : memref<8x8x128xf32, #tpu.memory_space<vmem>>, vector<1x8x128xf32>
    %908 = vector.shape_cast %907 : vector<1x8x128xf32> to vector<8x128xf32>
    %909 = vector.shape_cast %905 : vector<8x128xf32> to vector<1x8x128xf32>
    tpu.vector_store %arg9[%906, %c0_192, %c0_193], %909 {strides = array<i32>} : memref<8x8x128xf32, #tpu.memory_space<vmem>>, vector<1x8x128xf32>,
    %cst_194 = arith.constant dense<0xFF800000> : vector<8xf32>
    %910 = vector.multi_reduction <maximumf>, %905, %cst_194 [1] : vector<8x128xf32> to vector<8xf32>
    %911 = vector.shape_cast %910 : vector<8xf32> to vector<8x1xf32>
    %912 = vector.broadcast %911 : vector<8x1xf32> to vector<8x128xf32>
    %913 = arith.cmpf oeq, %905, %912 : vector<8x128xf32>
    %c128_i32_195 = arith.constant 128 : i32
    %914 = vector.broadcast %c128_i32_195 : i32 to vector<8x128xi32>
    %915 = arith.select %913, %0, %914 : vector<8x128xi1>, vector<8x128xi32>
    %cst_196 = arith.constant dense<2147483647> : vector<8xi32>
    %916 = vector.multi_reduction <minsi>, %915, %cst_196 [1] : vector<8x128xi32> to vector<8xi32>
    %917 = vector.shape_cast %916 : vector<8xi32> to vector<8x1xi32>
    %918 = vector.broadcast %917 : vector<8x1xi32> to vector<8x128xi32>
    %919 = arith.cmpi eq, %0, %918 : vector<8x128xi32>
    %920 = arith.extui %919 : vector<8x128xi1> to vector<8x128xi32>
    %921 = arith.sitofp %920 : vector<8x128xi32> to vector<8x128xf32>
    %922 = arith.truncf %921 : vector<8x128xf32> to vector<8x128xbf16>
    %c8_i32 = arith.constant 8 : i32
    return
  }
}

</mosaic_0001>

<bundles_post_ra>
// kernel: tpu_custom_call.1
= control target key start
LH: loop header
LB: loop body
LE: loop exit
PB: predicated region body
PF: predicated region fallthrough
CT: control target
= control target key end

     0   :  { %14 = vsyncpa [#allocation3], 0  ;;  %s3951_s0 = inlined_call_operand.hbm [shape: f32[3,8,32], index: 0, kind: input, shape index: {}]   ;;  %s3952_s1 = inlined_call_operand.vmem [shape: bf16[128,96], index: 1, kind: input, shape index: {}]   ;;  %s3953_s2 = inlined_call_operand.vmem [shape: bf16[3,32,96], index: 2, kind: input, shape index: {}]   ;;  %s3954_s3 = inlined_call_operand.vmem [shape: bf16[3,32,96], index: 3, kind: input, shape index: {}]   ;;  %s3955_s4 = inlined_call_operand.vmem [shape: f32[3,1,64], index: 4, kind: input, shape index: {}]   ;;  %s3956_s5 = inlined_call_operand.hbm [shape: f32[3,1,32], index: 5, kind: input, shape index: {}]   ;;  %s3957_s6 = inlined_call_operand.hbm [shape: f32[3,1,32], index: 6, kind: input, shape index: {}]   ;;  %s3958_s7 = inlined_call_operand.vmem [shape: bf16[32,128], index: 7, kind: input, shape index: {}]   ;;  %s3959_s8 = inlined_call_operand.vmem [shape: f32[1,128], index: 8, kind: input, shape index: {}]   ;;  %s3960_s9 = inlined_call_operand.hbm [shape: f32[8,8,128], index: 9, kind: output, shape index: {}]  }
   0x1   :  { %15 = vsyncpa [#allocation6], 0  ;;  %s42_s11 = sshll.u32 %s3956_s5, 4  ;;  %s43_s11 = int_to_ptr.hbm [resolvable:$true] %s42_s11 }
   0x2   :  { %16 = vsyncpa [#allocation4], 0  ;;  %s2954_s12 = smov [#allocation5]   ;;  %s21_s16 = sshll.u32 %s3951_s0, 4  ;;  %s22_s16 = int_to_ptr.hbm [resolvable:$true] %s21_s16 }
   0x3   :  { %s44_s13 = sshll.u32 %s2954_s12, 4  ;;  %s2955_s17 = smov 16   ;;  %s45_s13 = int_to_ptr.vmem [resolvable:$true] %s44_s13 }
   0x4   :  { %s2956_s18 = smov 1   ;;  %s2957_s19 = smov [#allocation2]  }
   0x5   :  { %50 = dma.hbm_to_vmem [thread:$0]  %s43_s11, 48, %s45_s13, [#allocation6], %s2955_s17, %s2955_s17, %s2956_s18  }
   0x6   :  { %s23_s20 = sshll.u32 %s2957_s19, 4  ;;  %s2958_s21 = smov 128   ;;  %s24_s20 = int_to_ptr.vmem [resolvable:$true] %s23_s20 }
   0x7   :  { %s2959_s22 = smov 8   ;;  %s55_s24 = sshll.u32 %s3957_s6, 4  ;;  %s56_s24 = int_to_ptr.hbm [resolvable:$true] %s55_s24 }
   0x8   :  { %29 = dma.hbm_to_vmem [thread:$0]  %s22_s16, 384, %s24_s20, [#allocation3], %s2958_s21, %s2958_s21, %s2959_s22  }
   0x9   :  { %s2960_s25 = smov [#allocation7]  }
   0xa   :  { %s57_s0 = sshll.u32 %s2960_s25, 4  ;;  %s58_s0 = int_to_ptr.vmem [resolvable:$true] %s57_s0 }
   0xb   :  { %63 = dma.hbm_to_vmem [thread:$0]  %s56_s24, 48, %s58_s0, [#allocation6], %s2955_s17, %s2955_s17, %s2956_s18  }
   0xc   :  { %2948 = dma.done.wait [#allocation3], 384  }
   0xd   :  { %2949 = vsyncadd [#allocation3], 4294966912 }
   0xe   :  { %2950 = dma.done.wait [#allocation6], 96  }
   0xf   :  { %2951 = vsyncadd [#allocation6], 4294967200  ;;  %v3031_v0 = vld [vmem:[%s3952_s1 + $0x38] sm:$0xff]  ;;  %v3036_v1 = vld [vmem:[%s3954_s3 + $0x8] sm:$0xff]  ;;  %vm226_vm0 = vcmask 261120   ;;  %s2961_s14 = smov 64   ;;  %v81_v12 = vlaneseq }
  0x10   :  { %v3041_v2 = vld [vmem:[%s3952_s1 + $0x30] sm:$0xff]  ;;  %200 = vmatpush.bf16.msra.mxu0 %v3031_v0  ;;  %236 = vmatpush.bf16.msra.mxu1 %v3036_v1  ;;  %v3048_v3 = vld [vmem:[%s3954_s3] sm:$0xff]  ;;  %v2658_v5 = vld [vmem:[#allocation7] ss:$0 sm:$0xff]  ;;  %v2962_v16 = vmov 1.0|1.0  }
  0x11   :  { %v3050_v4 = vld [vmem:[#allocation2] sm:$0xff]  ;;  %v3055_v6 = vld [vmem:[%s3952_s1 + $0x28] sm:$0xff]  ;;  %275 = vrot.lane.b32.xlu0 %v2658_v5, %s2961_s14  ;;  %v2659_v8 = vld [vmem:[#allocation5] ss:$0 sm:$0xff]  ;;  %v3088_v14 = vand.u32 127, %v81_v12  ;;  %s2963_s27 = smov 96  }
  0x12   :  { %v213_v7 = vpack.c.bf16 %v3050_v4, %v3050_v4  ;;  %269 = vrot.lane.b32.xlu1 %v2659_v8, %s2961_s14  ;;  %v3068_v9 = vld [vmem:[%s3952_s1 + $0x20] sm:$0xff]  ;;  %v3074_v10 = vld [vmem:[%s3952_s1 + $0x18] sm:$0xff]  ;;  %v3080_v11 = vld [vmem:[%s3952_s1 + $0x10] sm:$0xff]  ;;  %s2964_s28 = smov 32   ;;  %s2418_s6 = sshll.u32 %s3960_s9, 4  ;;  %s2419_s6 = int_to_ptr.hbm [resolvable:$true] %s2418_s6 }
  0x13   :  { %v3086_v13 = vld [vmem:[%s3952_s1 + $0x8] sm:$0xff]  ;;  %v3094_v15 = vld [vmem:[%s3952_s1] sm:$0xff]  ;;  %vm148_vm1 = vcmp.eq.s32.totalorder %v3088_v14, 0  ;;  %v3119_v46 = vld [vmem:[%s3954_s3 + $0x18] sm:$0xff] }
  0x14   :  { %201 = vmatpush.bf16.msra.mxu0 %v3041_v2  ;;  %237 = vmatpush.bf16.msra.mxu1 %v3048_v3  ;;  %vm2483_vm2 = vmpackc.low %vm148_vm1, %vm148_vm1  ;;  %v3106_v24 = vld [vmem:[%s3955_s4] ss:$0 sm:$0xff]  ;;  %v2661_v47 = vld [vmem:[#allocation7 + $0x1] ss:$0 sm:$0xff] }
  0x15   :  { %v3124_v48 = vld [vmem:[%s3953_s2 + $0x18] sm:$0xff]  ;;  %356 = vmatpush.bf16.msra.mxu3 %v3119_v46  ;;  %v3130_v49 = vld [vmem:[%s3954_s3 + $0x10] sm:$0xff]  ;;  %v145_v50 = vld [vmem:[#allocation2 + $0x8] sm:$0xff] }
  0x16   :  { %327 = vmatpush.bf16.msra.mxu2 %v3124_v48  ;;  %v3138_v51 = vld [vmem:[%s3953_s2 + $0x10] sm:$0xff]  ;;  %v334_v52 = vpack.c.bf16 %v145_v50, %v145_v50  ;;  %v3152_v60 = vld [vmem:[%s3954_s3 + $0x28] sm:$0xff]  ;;  %v3158_v61 = vld [vmem:[%s3954_s3 + $0x20] sm:$0xff] }
  0x17   :  { %2493 = vmatmul.msk.bf16.vlgmr.msra.gmra.mxu1 %vm226_vm0, %v213_v7  ;;  %v2662_v62 = vld [vmem:[#allocation5 + $0x1] ss:$0 sm:$0xff]  ;;  %v3170_v12 = vld [vmem:[#allocation2 + $0x10] sm:$0xff] }
  0x18   :  { %202 = vmatpush.bf16.msra.mxu0 %v3055_v6 }
  0x19   :  { %357 = vmatpush.bf16.msra.mxu3 %v3130_v49 }
  0x1a   :  { %328 = vmatpush.bf16.msra.mxu2 %v3138_v51 }
  0x1c   :  { %203 = vmatpush.bf16.msra.mxu0 %v3068_v9  ;;  %2512 = vmatmul.msk.bf16.vlgmr.msra.gmra.mxu3 %vm226_vm0, %v334_v52 }
  0x1e   :  { %476 = vmatpush.bf16.msrb.mxu2 %v3152_v60 }
  0x20   :  { %204 = vmatpush.bf16.msra.mxu0 %v3074_v10 }
  0x22   :  { %477 = vmatpush.bf16.msrb.mxu2 %v3158_v61 }
  0x24   :  { %205 = vmatpush.bf16.msra.mxu0 %v3080_v11 }
  0x28   :  { %206 = vmatpush.bf16.msra.mxu0 %v3086_v13 }
  0x2c   :  { %207 = vmatpush.bf16.msra.mxu0 %v3094_v15 }
  0x2f   :  { %2484 = vmatmul.msk.bf16.vlgmr.msra.gmra.mxu0 %vm2483_vm2, %v2962_v16 }
  0x30   :  { %694 = vmatpush.bf16.msrb.mxu0 %v3119_v46 }
  0x34   :  { %695 = vmatpush.bf16.msrb.mxu0 %v3130_v49 }
  0x83   :  { %v3099_v17 = vpop.permute.xlu0 %275 }
  0x84   :  { %v3110_v41 = vpop.permute.xlu1 %269 }
  0x94   :  { %v239_v18 = vpop.f32.mrf.mxu1 }
  0x95   :  { %v278_v19 = vadd.f32 %v3099_v17, %v239_v18 }
  0x97   :  { %280 = vrot.lane.b32.xlu0 %v278_v19, %s2961_s14  ;;  %v3179_v19 = vld [vmem:[%s3955_s4 + $0x1] ss:$0 sm:$0xff] }
  0x9c   :  { %v241_v20 = vpop.f32.mrf.mxu1 }
  0xac   :  { %v209_v21 = vpop.f32.mrf.mxu0 }
  0xad   :  { %v243_v23 = vadd.f32 %v239_v18, %v209_v21  ;;  %v272_v42 = vadd.f32 %v3110_v41, %v209_v21  ;;  %v454_v18 = vpack.c.bf16 %v3170_v12, %v3170_v12 }
  0xaf   :  { %v247_v25 = vadd.f32 %v3106_v24, %v243_v23 }
  0xb1   :  { %v2494_v26 = vmul.f32 -1.442695, %v247_v25 }
  0xb3   :  { %2668 = vpow2.f32 %v2494_v26 }
  0xb4   :  { %v211_v22 = vpop.f32.mrf.mxu0 }
  0xb9   :  { %v2669_v27 = vpop.eup %2668 }
  0xba   :  { %v251_v28 = vadd.f32 1.0, %v2669_v27 }
  0xbc   :  { %2670 = vrcp.f32 %v251_v28  ;;  %v263_v34 = vand.u32 2147483648, %v251_v28  ;;  %vm257_vm4 = vweird.f32 %v251_v28  ;;  %v261_v35 = vand.u32 2147483647, %v251_v28 }
  0xbe   :  { %v264_v37 = vor.u32 1.1754944e-38, %v263_v34  ;;  %vm262_vm6 = vcmp.eq.f32.partialorder %v261_v35, 8.507059e+37 }
  0xc2   :  { %v2671_v29 = vpop.eup %2670 }
  0xc3   :  { %v253_v30 = vmul.f32 %v2671_v29, %v251_v28  ;;  %vm258_vm3 = vweird.f32 %v2671_v29 }
  0xc4   :  { %vm259_vm5 = vmor %vm257_vm4, %vm258_vm3 }
  0xc5   :  { %v254_v31 = vsub.f32 1.0, %v253_v30 }
  0xc7   :  { %v255_v32 = vmul.f32 %v2671_v29, %v254_v31 }
  0xc9   :  { %v256_v33 = vadd.f32 %v2671_v29, %v255_v32 }
  0xcb   :  { %v260_v36 = vsel %vm259_vm5, %v2671_v29, %v256_v33 }
  0xcc   :  { %v265_v39 = vsel %vm262_vm6, %v264_v37, %v260_v36 }
  0xcd   :  { %v290_v54 = vsub.f32 1.0, %v265_v39 }
 0x109   :  { %v281_v38 = vpop.permute.xlu0 %280 }
 0x10a   :  { %v283_v40 = vmul.f32 %v281_v38, %v265_v39 }
 0x10c   :  { %285 = vrot.lane.b32.xlu1 %v283_v40, %s2961_s14 }
 0x114   :  { %395 = vrot.lane.b32.xlu1 %v2661_v47, %s2961_s14 }
 0x17e   :  { %v286_v43 = vpop.permute.xlu1 %285 }
 0x17f   :  { %v288_v44 = vadd.f32 %v286_v43, %v272_v42 }
 0x181   :  { %2672 = vtanh.f32 %v288_v44 }
 0x186   :  { %v3164_v5 = vpop.permute.xlu1 %395 }
 0x187   :  { %v2673_v45 = vpop.eup %2672 }
 0x188   :  { %292 = vrot.lane.b32.xlu2 %v2673_v45, %s2963_s27 }
 0x190   :  { %297 = vrot.lane.b32.xlu2 %v3050_v4, %s2964_s28  ;;  %v359_v4 = vpop.f32.mrf.mxu3 }
 0x191   :  { %v398_v7 = vadd.f32 %v3164_v5, %v359_v4 }
 0x198   :  { %400 = vrot.lane.b32.xlu2 %v398_v7, %s2961_s14  ;;  %v361_v8 = vpop.f32.mrf.mxu3 }
 0x1e2   :  { %v293_v53 = vpop.permute.xlu2 %292 }
 0x1e3   :  { %v295_v56 = vmul.f32 %v293_v53, %v290_v54  ;;  %v2664_v54 = vld [vmem:[#allocation7 + $0x2] ss:$0 sm:$0xff] }
 0x1ea   :  { %v298_v55 = vpop.permute.xlu2 %297 }
 0x1eb   :  { %v300_v57 = vmul.f32 %v298_v55, %v265_v39  ;;  %v3194_v55 = vld [vmem:[%s3953_s2 + $0x28] sm:$0xff] }
 0x1ec   :  { %447 = vmatpush.bf16.msrb.mxu1 %v3194_v55 }
 0x1ed   :  { %v3144_v58 = vadd.f32 %v300_v57, %v295_v56  ;;  %v3201_v56 = vld [vmem:[%s3953_s2 + $0x20] sm:$0xff] }
 0x1ef   :  { %v302_v59 = vpack.c.bf16 %v3144_v58, %v3144_v58 }
 0x1f0   :  { %448 = vmatpush.bf16.msrb.mxu1 %v3201_v56 }
 0x1f1   :  { %304 = vrot.lane.b32.xlu0 %v302_v59, %s2963_s27 }
 0x1f2   :  { %v401_v38 = vpop.permute.xlu2 %400 }
 0x1f4   :  { %600 = vmatpush.bf16.msra.mxu1 %v3031_v0 }
 0x1f8   :  { %601 = vmatpush.bf16.msra.mxu1 %v3041_v2 }
 0x1f9   :  { %389 = vrot.lane.b32.xlu0 %v2662_v62, %s2961_s14 }
 0x1fc   :  { %602 = vmatpush.bf16.msra.mxu1 %v3055_v6 }
 0x200   :  { %603 = vmatpush.bf16.msra.mxu1 %v3068_v9 }
 0x201   :  { %417 = vrot.lane.b32.xlu0 %v145_v50, %s2964_s28 }
 0x204   :  { %604 = vmatpush.bf16.msra.mxu1 %v3074_v10 }
 0x208   :  { %605 = vmatpush.bf16.msra.mxu1 %v3080_v11 }
 0x20c   :  { %606 = vmatpush.bf16.msra.mxu1 %v3086_v13 }
 0x210   :  { %607 = vmatpush.bf16.msra.mxu1 %v3094_v15 }
 0x263   :  { %v305_v63 = vpop.permute.xlu0 %304 }
 0x264   :  { %2503 = vmatmul.msk.bf16.vlgmr.msra.gmra.mxu2 %vm226_vm0, %v305_v63 }
 0x265   :  { %619 = vmatpush.bf16.msra.mxu2 %v3036_v1 }
 0x269   :  { %620 = vmatpush.bf16.msra.mxu2 %v3048_v3 }
 0x26b   :  { %v3187_v45 = vpop.permute.xlu0 %389 }
 0x273   :  { %v418_v57 = vpop.permute.xlu0 %417 }
 0x274   :  { %2531 = vmatmul.msk.bf16.vlgmr.msrb.gmra.mxu2 %vm226_vm0, %v454_v18  ;;  %v2665_v18 = vld [vmem:[#allocation5 + $0x2] ss:$0 sm:$0xff] }
 0x275   :  { %756 = vmatpush.bf16.msrb.mxu2 %v3194_v55 }
 0x279   :  { %757 = vmatpush.bf16.msrb.mxu2 %v3201_v56 }
 0x284   :  { %2545 = vmatmul.msk.bf16.vlgmr.msra.gmra.mxu2 %vm226_vm0, %v305_v63 }
 0x285   :  { %881 = vmatpush.bf16.msra.mxu2 %v3036_v1 }
 0x289   :  { %882 = vmatpush.bf16.msra.mxu2 %v3048_v3 }
 0x2e7   :  { %v330_v20 = vpop.f32.mrf.mxu2 }
 0x2e8   :  { %v363_v21 = vadd.f32 %v359_v4, %v330_v20  ;;  %v392_v47 = vadd.f32 %v3187_v45, %v330_v20 }
 0x2ea   :  { %v367_v22 = vadd.f32 %v3179_v19, %v363_v21 }
 0x2ec   :  { %v2513_v23 = vmul.f32 -1.442695, %v367_v22 }
 0x2ee   :  { %2674 = vpow2.f32 %v2513_v23 }
 0x2ef   :  { %v332_v25 = vpop.f32.mrf.mxu2 }
 0x2f4   :  { %v2675_v26 = vpop.eup %2674 }
 0x2f5   :  { %v371_v27 = vadd.f32 1.0, %v2675_v26 }
 0x2f7   :  { %2676 = vrcp.f32 %v371_v27  ;;  %v3182_v28 = vpop.f32.mrf.mxu2  ;;  %v383_v33 = vand.u32 2147483648, %v371_v27  ;;  %v381_v35 = vand.u32 2147483647, %v371_v27  ;;  %vm377_vm8 = vweird.f32 %v371_v27 }
 0x2f9   :  { %v384_v37 = vor.u32 1.1754944e-38, %v383_v33  ;;  %vm382_vm10 = vcmp.eq.f32.partialorder %v381_v35, 8.507059e+37 }
 0x2fd   :  { %v2677_v29 = vpop.eup %2676 }
 0x2fe   :  { %v373_v30 = vmul.f32 %v2677_v29, %v371_v27  ;;  %vm378_vm7 = vweird.f32 %v2677_v29 }
 0x2ff   :  { %v481_v31 = vpop.f32.mrf.mxu2  ;;  %vm379_vm9 = vmor %vm377_vm8, %vm378_vm7 }
 0x300   :  { %v374_v32 = vsub.f32 1.0, %v373_v30 }
 0x302   :  { %v375_v34 = vmul.f32 %v2677_v29, %v374_v32 }
 0x304   :  { %v376_v36 = vadd.f32 %v2677_v29, %v375_v34 }
 0x306   :  { %v380_v39 = vsel %vm379_vm9, %v2677_v29, %v376_v36 }
 0x307   :  { %v3184_v40 = vpop.f32.mrf.mxu2  ;;  %v385_v42 = vsel %vm382_vm10, %v384_v37, %v380_v39 }
 0x308   :  { %v403_v43 = vmul.f32 %v401_v38, %v385_v42  ;;  %v410_v59 = vsub.f32 1.0, %v385_v42  ;;  %v420_v63 = vmul.f32 %v418_v57, %v385_v42 }
 0x30a   :  { %405 = vrot.lane.b32.xlu1 %v403_v43, %s2961_s14 }
 0x30f   :  { %v624_v44 = vpop.f32.mrf.mxu2 }
 0x37c   :  { %v406_v50 = vpop.permute.xlu1 %405 }
 0x37d   :  { %v408_v52 = vadd.f32 %v406_v50, %v392_v47 }
 0x37f   :  { %2678 = vtanh.f32 %v408_v52 }
 0x385   :  { %v2679_v53 = vpop.eup %2678 }
 0x386   :  { %412 = vrot.lane.b32.xlu2 %v2679_v53, %s2963_s27 }
 0x38e   :  { %515 = vrot.lane.b32.xlu2 %v2664_v54, %s2961_s14 }
 0x3e0   :  { %v413_v62 = vpop.permute.xlu2 %412 }
 0x3e1   :  { %v415_v4 = vmul.f32 %v413_v62, %v410_v59  ;;  %v3256_v62 = vld [vmem:[%s3958_s7 + $0x8] sm:$0xff] }
 0x3e2   :  { %570 = vmatpush.bf16.msrb.mxu3 %v3256_v62  ;;  %831 = vmatpush.bf16.msra.mxu0 %v3256_v62 }
 0x3e3   :  { %v3214_v7 = vadd.f32 %v420_v63, %v415_v4  ;;  %v3262_v63 = vld [vmem:[%s3958_s7] sm:$0xff] }
 0x3e5   :  { %v422_v8 = vpack.c.bf16 %v3214_v7, %v3214_v7 }
 0x3e6   :  { %571 = vmatpush.bf16.msrb.mxu3 %v3262_v63  ;;  %832 = vmatpush.bf16.msra.mxu0 %v3262_v63 }
 0x3e7   :  { %424 = vrot.lane.b32.xlu1 %v422_v8, %s2963_s27 }
 0x3e8   :  { %v3221_v20 = vpop.permute.xlu2 %515 }
 0x3e9   :  { %v518_v21 = vadd.f32 %v3221_v20, %v3182_v28 }
 0x3ea   :  { %681 = vmatpush.bf16.msra.mxu3 %v3124_v48 }
 0x3eb   :  { %520 = vrot.lane.b32.xlu0 %v518_v21, %s2961_s14 }
 0x3ee   :  { %682 = vmatpush.bf16.msra.mxu3 %v3138_v51 }
 0x3ef   :  { %509 = vrot.lane.b32.xlu1 %v2665_v18, %s2961_s14 }
 0x3f7   :  { %537 = vrot.lane.b32.xlu1 %v3170_v12, %s2964_s28  ;;  %v3242_v12 = vld [vmem:[%s3955_s4 + $0x2] ss:$0 sm:$0xff] }
 0x459   :  { %v425_v22 = vpop.permute.xlu1 %424 }
 0x45a   :  { %2522 = vmatmul.msk.bf16.vlgmr.msrb.gmra.mxu1 %vm226_vm0, %v425_v22  ;;  %2548 = vmatmul.msk.bf16.vlgmr.msrb.gmra.mxu0 %vm226_vm0, %v425_v22 }
 0x45b   :  { %862 = vmatpush.bf16.msrb.mxu1 %v3031_v0  ;;  %956 = vmatpush.bf16.msrb.mxu0 %v3119_v46 }
 0x45d   :  { %v521_v43 = vpop.permute.xlu0 %520 }
 0x45f   :  { %863 = vmatpush.bf16.msrb.mxu1 %v3041_v2  ;;  %957 = vmatpush.bf16.msrb.mxu0 %v3130_v49 }
 0x461   :  { %v3249_v52 = vpop.permute.xlu1 %509 }
 0x463   :  { %864 = vmatpush.bf16.msrb.mxu1 %v3055_v6 }
 0x467   :  { %865 = vmatpush.bf16.msrb.mxu1 %v3068_v9 }
 0x469   :  { %v538_v4 = vpop.permute.xlu1 %537 }
 0x46b   :  { %866 = vmatpush.bf16.msrb.mxu1 %v3074_v10 }
 0x46f   :  { %867 = vmatpush.bf16.msrb.mxu1 %v3080_v11 }
 0x473   :  { %868 = vmatpush.bf16.msrb.mxu1 %v3086_v13 }
 0x477   :  { %869 = vmatpush.bf16.msrb.mxu1 %v3094_v15 }
 0x4d7   :  { %v450_v23 = vpop.f32.mrf.mxu1  ;;  %v3244_v25 = vpop.f32.mrf.mxu0 }
 0x4d8   :  { %v483_v26 = vadd.f32 %v3182_v28, %v450_v23  ;;  %v512_v53 = vadd.f32 %v3249_v52, %v450_v23 }
 0x4da   :  { %v487_v27 = vadd.f32 %v3242_v12, %v483_v26 }
 0x4dc   :  { %v2532_v29 = vmul.f32 -1.442695, %v487_v27 }
 0x4de   :  { %2680 = vpow2.f32 %v2532_v29  ;;  %v3285_v29 = vld [vmem:[%s3959_s8] ss:$0 sm:$0xff] }
 0x4df   :  { %v452_v30 = vpop.f32.mrf.mxu1  ;;  %v699_v31 = vpop.f32.mrf.mxu0 }
 0x4e4   :  { %v2681_v32 = vpop.eup %2680 }
 0x4e5   :  { %v491_v33 = vadd.f32 1.0, %v2681_v32 }
 0x4e7   :  { %2682 = vrcp.f32 %v491_v33  ;;  %v503_v37 = vand.u32 2147483648, %v491_v33  ;;  %v501_v39 = vand.u32 2147483647, %v491_v33  ;;  %vm497_vm12 = vweird.f32 %v491_v33 }
 0x4e9   :  { %v504_v28 = vor.u32 1.1754944e-38, %v503_v37  ;;  %vm502_vm14 = vcmp.eq.f32.partialorder %v501_v39, 8.507059e+37 }
 0x4ed   :  { %v2683_v34 = vpop.eup %2682 }
 0x4ee   :  { %v493_v35 = vmul.f32 %v2683_v34, %v491_v33  ;;  %vm498_vm11 = vweird.f32 %v2683_v34 }
 0x4ef   :  { %vm499_vm13 = vmor %vm497_vm12, %vm498_vm11 }
 0x4f0   :  { %v494_v36 = vsub.f32 1.0, %v493_v35 }
 0x4f2   :  { %v495_v38 = vmul.f32 %v2683_v34, %v494_v36 }
 0x4f4   :  { %v496_v42 = vadd.f32 %v2683_v34, %v495_v38 }
 0x4f6   :  { %v500_v44 = vsel %vm499_vm13, %v2683_v34, %v496_v42 }
 0x4f7   :  { %v505_v47 = vsel %vm502_vm14, %v504_v28, %v500_v44  ;;  %v648_v28 = vadd.f32 %v3184_v40, %v3099_v17 }
 0x4f8   :  { %v523_v50 = vmul.f32 %v521_v43, %v505_v47  ;;  %v530_v8 = vsub.f32 1.0, %v505_v47  ;;  %v540_v21 = vmul.f32 %v538_v4, %v505_v47  ;;  %v723_v43 = vadd.f32 %v3244_v25, %v3164_v5 }
 0x4fa   :  { %525 = vrot.lane.b32.xlu2 %v523_v50, %s2961_s14 }
 0x554   :  { %v526_v54 = vpop.permute.xlu2 %525 }
 0x555   :  { %v528_v57 = vadd.f32 %v526_v54, %v512_v53 }
 0x557   :  { %2684 = vtanh.f32 %v528_v57 }
 0x55d   :  { %v2685_v59 = vpop.eup %2684 }
 0x55e   :  { %532 = vrot.lane.b32.xlu0 %v2685_v59, %s2963_s27 }
 0x5d0   :  { %v533_v18 = vpop.permute.xlu0 %532 }
 0x5d1   :  { %v535_v22 = vmul.f32 %v533_v18, %v530_v8 }
 0x5d3   :  { %v3271_v23 = vadd.f32 %v540_v21, %v535_v22 }
 0x5d5   :  { %v542_v26 = vpack.c.bf16 %v3271_v23, %v3271_v23 }
 0x5d7   :  { %547 = vrot.lane.b32.xlu2 %v542_v26, %s2963_s27 }
 0x631   :  { %v3276_v27 = vpop.permute.xlu2 %547 }
 0x632   :  { %2541 = vmatmul.msk.bf16.vlgmr.msrb.gmra.mxu3 %vm226_vm0, %v3276_v27 }
 0x633   :  { %769 = vmatpush.bf16.msrb.mxu3 %v3152_v60 }
 0x637   :  { %770 = vmatpush.bf16.msrb.mxu3 %v3158_v61 }
 0x6b5   :  { %v573_v30 = vpop.f32.mrf.mxu3 }
 0x6b6   :  { %v574_v31 = vadd.f32 %v3285_v29, %v573_v30 }
 0x6b8   :  { %577 = vst [vmem:[#allocation8] sm:$0xff] %v574_v31  ;;  %578 = vmax.xlane.f32.xlu0 %v574_v31 }
 0x6bd   :  { %v575_v32 = vpop.f32.mrf.mxu3 }
 0x72b   :  { %v579_v33 = vpop.xlane.xlu0 %578 }
 0x72c   :  { %vm580_vm15 = vcmp.eq.f32.partialorder %v574_v31, %v579_v33 }
 0x72d   :  { %v581_v34 = vsel %vm580_vm15, %v3088_v14, 128 }
 0x72e   :  { %v583_v35 = vshra.s32 %v581_v34, 16  ;;  %v582_v37 = vand.u32 65535, %v581_v34 }
 0x730   :  { %v585_v36 = vcvt.s32.f32 %v583_v35  ;;  %v584_v39 = vcvt.s32.f32 %v582_v37 }
 0x732   :  { %586 = vmin.xlane.f32.xlu1 %v585_v36 }
 0x7a5   :  { %v587_v38 = vpop.xlane.xlu1 %586 }
 0x7a6   :  { %vm588_vm1 = vcmp.eq.f32.partialorder %v585_v36, %v587_v38  ;;  %v593_v44 = vcvt.f32.s32 %v587_v38 }
 0x7a7   :  { %v589_v42 = vsel %vm588_vm1, %v584_v39, inf }
 0x7a8   :  { %590 = vmin.xlane.f32.xlu2 %v589_v42  ;;  %v594_v50 = vshll.u32 %v593_v44, 16 }
 0x7c0   :  { %650 = vrot.lane.b32.xlu2 %v648_v28, %s2961_s14 }
 0x7c8   :  { %725 = vrot.lane.b32.xlu2 %v723_v43, %s2961_s14 }
 0x81b   :  { %v591_v47 = vpop.xlane.xlu2 %590 }
 0x81c   :  { %v592_v53 = vcvt.f32.s32 %v591_v47 }
 0x81e   :  { %v595_v54 = vadd.s32 %v594_v50, %v592_v53 }
 0x820   :  { %vm596_vm2 = vcmp.eq.s32.totalorder %v3088_v14, %v595_v54 }
 0x821   :  { %vm2543_vm3 = vmpackc.low %vm596_vm2, %vm596_vm2 }
 0x822   :  { %2544 = vmatmul.msk.bf16.vlgmr.msra.gmra.mxu1 %vm2543_vm3, %v2962_v16 }
 0x823   :  { %1124 = vmatpush.bf16.msra.mxu1 %v3031_v0  ;;  %v651_v37 = vpop.permute.xlu2 %650 }
 0x827   :  { %1125 = vmatpush.bf16.msra.mxu1 %v3041_v2 }
 0x82b   :  { %1126 = vmatpush.bf16.msra.mxu1 %v3055_v6 }
 0x82f   :  { %1127 = vmatpush.bf16.msra.mxu1 %v3068_v9 }
 0x833   :  { %1128 = vmatpush.bf16.msra.mxu1 %v3074_v10 }
 0x837   :  { %1129 = vmatpush.bf16.msra.mxu1 %v3080_v11 }
 0x83b   :  { %1130 = vmatpush.bf16.msra.mxu1 %v3086_v13 }
 0x83f   :  { %1131 = vmatpush.bf16.msra.mxu1 %v3094_v15 }
 0x89f   :  { %v609_v57 = vpop.f32.mrf.mxu1 }
 0x8a0   :  { %v626_v59 = vadd.f32 %v3184_v40, %v609_v57  ;;  %v647_v42 = vadd.f32 %v609_v57, %v3110_v41 }
 0x8a2   :  { %v627_v4 = vadd.f32 %v3106_v24, %v626_v59 }
 0x8a4   :  { %v2546_v8 = vmul.f32 -1.442695, %v627_v4 }
 0x8a6   :  { %2686 = vpow2.f32 %v2546_v8 }
 0x8a7   :  { %v611_v18 = vpop.f32.mrf.mxu1 }
 0x8ac   :  { %v2687_v21 = vpop.eup %2686 }
 0x8ad   :  { %v631_v22 = vadd.f32 1.0, %v2687_v21 }
 0x8af   :  { %2688 = vrcp.f32 %v631_v22  ;;  %v643_v32 = vand.u32 2147483648, %v631_v22  ;;  %v641_v34 = vand.u32 2147483647, %v631_v22  ;;  %vm637_vm5 = vweird.f32 %v631_v22 }
 0x8b1   :  { %v644_v36 = vor.u32 1.1754944e-38, %v643_v32  ;;  %vm642_vm7 = vcmp.eq.f32.partialorder %v641_v34, 8.507059e+37 }
 0x8b5   :  { %v2689_v26 = vpop.eup %2688 }
 0x8b6   :  { %v633_v30 = vmul.f32 %v2689_v26, %v631_v22  ;;  %vm638_vm4 = vweird.f32 %v2689_v26 }
 0x8b7   :  { %vm639_vm6 = vmor %vm637_vm5, %vm638_vm4 }
 0x8b8   :  { %v634_v31 = vsub.f32 1.0, %v633_v30 }
 0x8ba   :  { %v635_v33 = vmul.f32 %v2689_v26, %v634_v31 }
 0x8bc   :  { %v636_v35 = vadd.f32 %v2689_v26, %v635_v33 }
 0x8be   :  { %v640_v40 = vsel %vm639_vm6, %v2689_v26, %v636_v35 }
 0x8bf   :  { %v645_v38 = vsel %vm642_vm7, %v644_v36, %v640_v40 }
 0x8c0   :  { %v653_v39 = vmul.f32 %v651_v37, %v645_v38  ;;  %v660_v47 = vsub.f32 1.0, %v645_v38  ;;  %v666_v53 = vmul.f32 %v645_v38, %v3144_v58 }
 0x8c2   :  { %655 = vrot.lane.b32.xlu0 %v653_v39, %s2961_s14  ;;  %v726_v39 = vpop.permute.xlu2 %725 }
 0x934   :  { %v656_v28 = vpop.permute.xlu0 %655 }
 0x935   :  { %v658_v43 = vadd.f32 %v656_v28, %v647_v42 }
 0x937   :  { %2690 = vtanh.f32 %v658_v43 }
 0x93d   :  { %v2691_v44 = vpop.eup %2690 }
 0x93e   :  { %662 = vrot.lane.b32.xlu1 %v2691_v44, %s2963_s27 }
 0x9b0   :  { %v663_v50 = vpop.permute.xlu1 %662 }
 0x9b1   :  { %v665_v54 = vmul.f32 %v663_v50, %v660_v47 }
 0x9b3   :  { %v3311_v59 = vadd.f32 %v666_v53, %v665_v54 }
 0x9b5   :  { %v668_v4 = vpack.c.bf16 %v3311_v59, %v3311_v59 }
 0x9b7   :  { %670 = vrot.lane.b32.xlu0 %v668_v4, %s2963_s27 }
 0xa29   :  { %v671_v8 = vpop.permute.xlu0 %670 }
 0xa2a   :  { %2547 = vmatmul.msk.bf16.vlgmr.msra.gmra.mxu3 %vm226_vm0, %v671_v8 }
 0xa2b   :  { %943 = vmatpush.bf16.msra.mxu3 %v3124_v48 }
 0xa2f   :  { %944 = vmatpush.bf16.msra.mxu3 %v3138_v51 }
 0xa3a   :  { %2551 = vmatmul.msk.bf16.vlgmr.msrb.gmra.mxu3 %vm226_vm0, %v3276_v27 }
 0xa3b   :  { %1031 = vmatpush.bf16.msrb.mxu3 %v3152_v60 }
 0xa3f   :  { %1032 = vmatpush.bf16.msrb.mxu3 %v3158_v61 }
 0xaad   :  { %v684_v58 = vpop.f32.mrf.mxu3 }
 0xaae   :  { %v701_v57 = vadd.f32 %v3244_v25, %v684_v58  ;;  %v722_v44 = vadd.f32 %v684_v58, %v3187_v45 }
 0xab0   :  { %v702_v18 = vadd.f32 %v3179_v19, %v701_v57 }
 0xab2   :  { %v2549_v21 = vmul.f32 -1.442695, %v702_v18 }
 0xab4   :  { %2692 = vpow2.f32 %v2549_v21 }
 0xab5   :  { %v686_v22 = vpop.f32.mrf.mxu3 }
 0xaba   :  { %v2693_v26 = vpop.eup %2692 }
 0xabb   :  { %v706_v30 = vadd.f32 1.0, %v2693_v26 }
 0xabd   :  { %2694 = vrcp.f32 %v706_v30  ;;  %v772_v31 = vpop.f32.mrf.mxu3  ;;  %v718_v35 = vand.u32 2147483648, %v706_v30  ;;  %v716_v40 = vand.u32 2147483647, %v706_v30  ;;  %vm712_vm9 = vweird.f32 %v706_v30 }
 0xabe   :  { %v798_v43 = vadd.f32 %v772_v31, %v3221_v20 }
 0xabf   :  { %v719_v25 = vor.u32 1.1754944e-38, %v718_v35  ;;  %vm717_vm11 = vcmp.eq.f32.partialorder %v716_v40, 8.507059e+37 }
 0xac3   :  { %v2695_v32 = vpop.eup %2694 }
 0xac4   :  { %v708_v33 = vmul.f32 %v2695_v32, %v706_v30  ;;  %vm713_vm8 = vweird.f32 %v2695_v32 }
 0xac5   :  { %v774_v34 = vpop.f32.mrf.mxu3  ;;  %vm714_vm10 = vmor %vm712_vm9, %vm713_vm8 }
 0xac6   :  { %v709_v27 = vsub.f32 1.0, %v708_v33 }
 0xac8   :  { %v710_v36 = vmul.f32 %v2695_v32, %v709_v27 }
 0xaca   :  { %v711_v37 = vadd.f32 %v2695_v32, %v710_v36 }
 0xacc   :  { %v715_v38 = vsel %vm714_vm10, %v2695_v32, %v711_v37 }
 0xacd   :  { %v720_v42 = vsel %vm717_vm11, %v719_v25, %v715_v38 }
 0xace   :  { %v728_v28 = vmul.f32 %v726_v39, %v720_v42  ;;  %v735_v54 = vsub.f32 1.0, %v720_v42  ;;  %v741_v57 = vmul.f32 %v720_v42, %v3214_v7 }
 0xad0   :  { %730 = vrot.lane.b32.xlu1 %v728_v28, %s2961_s14 }
 0xad8   :  { %800 = vrot.lane.b32.xlu1 %v798_v43, %s2961_s14 }
 0xb42   :  { %v731_v47 = vpop.permute.xlu1 %730 }
 0xb43   :  { %v733_v50 = vadd.f32 %v731_v47, %v722_v44 }
 0xb45   :  { %2696 = vtanh.f32 %v733_v50 }
 0xb4a   :  { %v801_v42 = vpop.permute.xlu1 %800 }
 0xb4b   :  { %v2697_v53 = vpop.eup %2696 }
 0xb4c   :  { %737 = vrot.lane.b32.xlu0 %v2697_v53, %s2963_s27 }
 0xbbe   :  { %v738_v4 = vpop.permute.xlu0 %737 }
 0xbbf   :  { %v740_v18 = vmul.f32 %v738_v4, %v735_v54 }
 0xbc1   :  { %v3331_v21 = vadd.f32 %v741_v57, %v740_v18 }
 0xbc3   :  { %v743_v22 = vpack.c.bf16 %v3331_v21, %v3331_v21 }
 0xbc5   :  { %745 = vrot.lane.b32.xlu2 %v743_v22, %s2963_s27 }
 0xc1f   :  { %v746_v26 = vpop.permute.xlu2 %745 }
 0xc20   :  { %2550 = vmatmul.msk.bf16.vlgmr.msrb.gmra.mxu2 %vm226_vm0, %v746_v26 }
 0xc21   :  { %1018 = vmatpush.bf16.msrb.mxu2 %v3194_v55 }
 0xc25   :  { %1019 = vmatpush.bf16.msrb.mxu2 %v3201_v56 }
 0xc30   :  { %2557 = vmatmul.msk.bf16.vlgmr.msra.gmra.mxu2 %vm226_vm0, %v671_v8 }
 0xc31   :  { %1143 = vmatpush.bf16.msra.mxu2 %v3036_v1 }
 0xc35   :  { %1144 = vmatpush.bf16.msra.mxu2 %v3048_v3 }
 0xca3   :  { %v759_v7 = vpop.f32.mrf.mxu2 }
 0xca4   :  { %v776_v58 = vadd.f32 %v772_v31, %v759_v7  ;;  %v797_v44 = vadd.f32 %v759_v7, %v3249_v52 }
 0xca6   :  { %v777_v30 = vadd.f32 %v3242_v12, %v776_v58 }
 0xca8   :  { %v2552_v32 = vmul.f32 -1.442695, %v777_v30 }
 0xcaa   :  { %2698 = vpow2.f32 %v2552_v32 }
 0xcab   :  { %v761_v33 = vpop.f32.mrf.mxu2 }
 0xcb0   :  { %v2699_v34 = vpop.eup %2698 }
 0xcb1   :  { %v781_v27 = vadd.f32 1.0, %v2699_v34 }
 0xcb3   :  { %2700 = vrcp.f32 %v781_v27  ;;  %v3343_v35 = vpop.f32.mrf.mxu2  ;;  %v793_v25 = vand.u32 2147483648, %v781_v27  ;;  %v791_v3 = vand.u32 2147483647, %v781_v27  ;;  %vm787_vm13 = vweird.f32 %v781_v27 }
 0xcb4   :  { %v910_v34 = vadd.f32 %v3343_v35, %v3099_v17 }
 0xcb5   :  { %v794_v31 = vor.u32 1.1754944e-38, %v793_v25  ;;  %vm792_vm15 = vcmp.eq.f32.partialorder %v791_v3, 8.507059e+37 }
 0xcb9   :  { %v2701_v36 = vpop.eup %2700 }
 0xcba   :  { %v783_v40 = vmul.f32 %v2701_v36, %v781_v27  ;;  %vm788_vm12 = vweird.f32 %v2701_v36 }
 0xcbb   :  { %v886_v37 = vpop.f32.mrf.mxu2  ;;  %vm789_vm14 = vmor %vm787_vm13, %vm788_vm12 }
 0xcbc   :  { %v784_v8 = vsub.f32 1.0, %v783_v40 }
 0xcbe   :  { %v785_v1 = vmul.f32 %v2701_v36, %v784_v8 }
 0xcc0   :  { %v786_v38 = vadd.f32 %v2701_v36, %v785_v1 }
 0xcc2   :  { %v790_v39 = vsel %vm789_vm14, %v2701_v36, %v786_v38 }
 0xcc3   :  { %v795_v28 = vsel %vm792_vm15, %v794_v31, %v790_v39 }
 0xcc4   :  { %v803_v43 = vmul.f32 %v801_v42, %v795_v28  ;;  %v810_v54 = vsub.f32 1.0, %v795_v28  ;;  %v816_v57 = vmul.f32 %v795_v28, %v3271_v23 }
 0xcc6   :  { %805 = vrot.lane.b32.xlu0 %v803_v43, %s2961_s14 }
 0xd38   :  { %v806_v47 = vpop.permute.xlu0 %805 }
 0xd39   :  { %v808_v50 = vadd.f32 %v806_v47, %v797_v44 }
 0xd3b   :  { %2702 = vtanh.f32 %v808_v50 }
 0xd41   :  { %v2703_v53 = vpop.eup %2702 }
 0xd42   :  { %812 = vrot.lane.b32.xlu2 %v2703_v53, %s2963_s27 }
 0xd9c   :  { %v813_v4 = vpop.permute.xlu2 %812 }
 0xd9d   :  { %v815_v18 = vmul.f32 %v813_v4, %v810_v54 }
 0xd9f   :  { %v3349_v22 = vadd.f32 %v816_v57, %v815_v18 }
 0xda1   :  { %v818_v58 = vpack.c.bf16 %v3349_v22, %v3349_v22 }
 0xda3   :  { %820 = vrot.lane.b32.xlu1 %v818_v58, %s2963_s27 }
 0xe15   :  { %v3354_v30 = vpop.permute.xlu1 %820 }
 0xe16   :  { %2553 = vmatmul.msk.bf16.vlgmr.msra.gmra.mxu0 %vm226_vm0, %v3354_v30 }
 0xe17   :  { %1093 = vmatpush.bf16.msra.mxu0 %v3256_v62 }
 0xe1b   :  { %1094 = vmatpush.bf16.msra.mxu0 %v3262_v63 }
 0xe26   :  { %2560 = vmatmul.msk.bf16.vlgmr.msrb.gmra.mxu0 %vm226_vm0, %v746_v26 }
 0xe27   :  { %1218 = vmatpush.bf16.msrb.mxu0 %v3119_v46 }
 0xe2b   :  { %1219 = vmatpush.bf16.msrb.mxu0 %v3130_v49 }
 0xe93   :  { %v834_v23 = vpop.f32.mrf.mxu0 }
 0xe94   :  { %v835_v7 = vadd.f32 %v3285_v29, %v834_v23 }
 0xe96   :  { %839 = vst [vmem:[#allocation8 + $0x8] sm:$0xff] %v835_v7  ;;  %840 = vmax.xlane.f32.xlu0 %v835_v7 }
 0xe9b   :  { %v836_v32 = vpop.f32.mrf.mxu0 }
 0xea3   :  { %v3364_v33 = vpop.f32.mrf.mxu0 }
 0xea4   :  { %v985_v57 = vadd.f32 %v3364_v33, %v3164_v5 }
 0xeaa   :  { %912 = vrot.lane.b32.xlu0 %v910_v34, %s2961_s14 }
 0xeab   :  { %v961_v27 = vpop.f32.mrf.mxu0 }
 0xf09   :  { %v841_v36 = vpop.xlane.xlu0 %840 }
 0xf0a   :  { %vm842_vm1 = vcmp.eq.f32.partialorder %v835_v7, %v841_v36 }
 0xf0b   :  { %v843_v46 = vsel %vm842_vm1, %v3088_v14, 128 }
 0xf0c   :  { %v845_v26 = vshra.s32 %v843_v46, 16  ;;  %v844_v40 = vand.u32 65535, %v843_v46 }
 0xf0e   :  { %v847_v49 = vcvt.s32.f32 %v845_v26  ;;  %v846_v8 = vcvt.s32.f32 %v844_v40 }
 0xf10   :  { %848 = vmin.xlane.f32.xlu2 %v847_v49 }
 0xf83   :  { %v849_v37 = vpop.xlane.xlu2 %848 }
 0xf84   :  { %vm850_vm2 = vcmp.eq.f32.partialorder %v847_v49, %v849_v37  ;;  %v855_v1 = vcvt.f32.s32 %v849_v37 }
 0xf85   :  { %v851_v25 = vsel %vm850_vm2, %v846_v8, inf }
 0xf86   :  { %852 = vmin.xlane.f32.xlu1 %v851_v25  ;;  %v856_v38 = vshll.u32 %v855_v1, 16 }
 0xff9   :  { %v853_v3 = vpop.xlane.xlu1 %852 }
 0xffa   :  { %v854_v31 = vcvt.f32.s32 %v853_v3 }
 0xffc   :  { %v857_v39 = vadd.s32 %v856_v38, %v854_v31 }
 0xffe   :  { %vm858_vm3 = vcmp.eq.s32.totalorder %v3088_v14, %v857_v39 }
 0xfff   :  { %vm2555_vm4 = vmpackc.low %vm858_vm3, %vm858_vm3 }
0x1000   :  { %2556 = vmatmul.msk.bf16.vlgmr.msrb.gmra.mxu1 %vm2555_vm4, %v2962_v16 }
0x1001   :  { %1386 = vmatpush.bf16.msrb.mxu1 %v3031_v0 }
0x1005   :  { %1387 = vmatpush.bf16.msrb.mxu1 %v3041_v2 }
0x1009   :  { %1388 = vmatpush.bf16.msrb.mxu1 %v3055_v6 }
0x100d   :  { %1389 = vmatpush.bf16.msrb.mxu1 %v3068_v9 }
0x1011   :  { %1390 = vmatpush.bf16.msrb.mxu1 %v3074_v10 }
0x1015   :  { %1391 = vmatpush.bf16.msrb.mxu1 %v3080_v11 }
0x1019   :  { %1392 = vmatpush.bf16.msrb.mxu1 %v3086_v13 }
0x101d   :  { %1393 = vmatpush.bf16.msrb.mxu1 %v3094_v15 }
0x107d   :  { %v871_v42 = vpop.f32.mrf.mxu1 }
0x107e   :  { %v888_v28 = vadd.f32 %v3343_v35, %v871_v42  ;;  %v909_v18 = vadd.f32 %v871_v42, %v3110_v41 }
0x1080   :  { %v889_v43 = vadd.f32 %v3106_v24, %v888_v28  ;;  %v913_v24 = vpop.permute.xlu0 %912 }
0x1082   :  { %v2558_v0 = vmul.f32 -1.442695, %v889_v43 }
0x1084   :  { %2704 = vpow2.f32 %v2558_v0 }
0x1085   :  { %v873_v2 = vpop.f32.mrf.mxu1 }
0x108a   :  { %v2705_v44 = vpop.eup %2704 }
0x108b   :  { %v893_v6 = vadd.f32 1.0, %v2705_v44 }
0x108d   :  { %2706 = vrcp.f32 %v893_v6  ;;  %v905_v50 = vand.u32 2147483648, %v893_v6  ;;  %v903_v13 = vand.u32 2147483647, %v893_v6  ;;  %vm899_vm6 = vweird.f32 %v893_v6 }
0x108f   :  { %v906_v15 = vor.u32 1.1754944e-38, %v905_v50  ;;  %vm904_vm8 = vcmp.eq.f32.partialorder %v903_v13, 8.507059e+37 }
0x1093   :  { %v2707_v9 = vpop.eup %2706 }
0x1094   :  { %v895_v47 = vmul.f32 %v2707_v9, %v893_v6  ;;  %vm900_vm5 = vweird.f32 %v2707_v9 }
0x1095   :  { %vm901_vm7 = vmor %vm899_vm6, %vm900_vm5 }
0x1096   :  { %v896_v10 = vsub.f32 1.0, %v895_v47 }
0x1098   :  { %v897_v11 = vmul.f32 %v2707_v9, %v896_v10 }
0x109a   :  { %v898_v53 = vadd.f32 %v2707_v9, %v897_v11 }
0x109c   :  { %v902_v35 = vsel %vm901_vm7, %v2707_v9, %v898_v53 }
0x109d   :  { %v907_v54 = vsel %vm904_vm8, %v906_v15, %v902_v35 }
0x109e   :  { %v915_v4 = vmul.f32 %v913_v24, %v907_v54  ;;  %v922_v32 = vsub.f32 1.0, %v907_v54  ;;  %v928_v27 = vmul.f32 %v907_v54, %v3311_v59  ;;  %v3427_v24 = vld [vmem:[%s3954_s3] sm:$0xff] }
0x10a0   :  { %917 = vrot.lane.b32.xlu2 %v915_v4, %s2961_s14 }
0x10a8   :  { %987 = vrot.lane.b32.xlu2 %v985_v57, %s2961_s14 }
0x10fa   :  { %v918_v58 = vpop.permute.xlu2 %917 }
0x10fb   :  { %v920_v23 = vadd.f32 %v918_v58, %v909_v18 }
0x10fd   :  { %2708 = vtanh.f32 %v920_v23 }
0x1102   :  { %v988_v28 = vpop.permute.xlu2 %987 }
0x1103   :  { %v2709_v7 = vpop.eup %2708 }
0x1104   :  { %924 = vrot.lane.b32.xlu1 %v2709_v7, %s2963_s27 }
0x1176   :  { %v925_v34 = vpop.permute.xlu1 %924 }
0x1177   :  { %v927_v36 = vmul.f32 %v925_v34, %v922_v32 }
0x1179   :  { %v3389_v46 = vadd.f32 %v928_v27, %v927_v36 }
0x117b   :  { %v930_v26 = vpack.c.bf16 %v3389_v46, %v3389_v46 }
0x117d   :  { %932 = vrot.lane.b32.xlu0 %v930_v26, %s2963_s27 }
0x11ef   :  { %v933_v49 = vpop.permute.xlu0 %932 }
0x11f0   :  { %2559 = vmatmul.msk.bf16.vlgmr.msra.gmra.mxu3 %vm226_vm0, %v933_v49 }
0x11f1   :  { %1205 = vmatpush.bf16.msra.mxu3 %v3124_v48 }
0x11f5   :  { %1206 = vmatpush.bf16.msra.mxu3 %v3138_v51 }
0x1200   :  { %2563 = vmatmul.msk.bf16.vlgmr.msrb.gmra.mxu3 %vm226_vm0, %v3354_v30 }
0x1201   :  { %1293 = vmatpush.bf16.msrb.mxu3 %v3152_v60 }
0x1205   :  { %1294 = vmatpush.bf16.msrb.mxu3 %v3158_v61 }
0x1273   :  { %v946_v59 = vpop.f32.mrf.mxu3 }
0x1274   :  { %v963_v40 = vadd.f32 %v3364_v33, %v946_v59  ;;  %v984_v44 = vadd.f32 %v946_v59, %v3187_v45 }
0x1276   :  { %v964_v37 = vadd.f32 %v3179_v19, %v963_v40 }
0x1278   :  { %v2561_v8 = vmul.f32 -1.442695, %v964_v37 }
0x127a   :  { %2710 = vpow2.f32 %v2561_v8 }
0x127b   :  { %v948_v25 = vpop.f32.mrf.mxu3 }
0x1280   :  { %v2711_v1 = vpop.eup %2710 }
0x1281   :  { %v968_v3 = vadd.f32 1.0, %v2711_v1 }
0x1283   :  { %2712 = vrcp.f32 %v968_v3  ;;  %v1034_v48 = vpop.f32.mrf.mxu3  ;;  %v980_v39 = vand.u32 2147483648, %v968_v3  ;;  %v978_v61 = vand.u32 2147483647, %v968_v3  ;;  %vm974_vm10 = vweird.f32 %v968_v3 }
0x1284   :  { %v1060_v2 = vadd.f32 %v1034_v48, %v3221_v20 }
0x1285   :  { %v981_v33 = vor.u32 1.1754944e-38, %v980_v39  ;;  %vm979_vm12 = vcmp.eq.f32.partialorder %v978_v61, 8.507059e+37 }
0x1289   :  { %v2713_v51 = vpop.eup %2712 }
0x128a   :  { %v970_v38 = vmul.f32 %v2713_v51, %v968_v3  ;;  %vm975_vm9 = vweird.f32 %v2713_v51 }
0x128b   :  { %v1036_v31 = vpop.f32.mrf.mxu3  ;;  %vm976_vm11 = vmor %vm974_vm10, %vm975_vm9 }
0x128c   :  { %v971_v30 = vsub.f32 1.0, %v970_v38 }
0x128e   :  { %v972_v60 = vmul.f32 %v2713_v51, %v971_v30 }
0x1290   :  { %v973_v42 = vadd.f32 %v2713_v51, %v972_v60 }
0x1292   :  { %v977_v19 = vsel %vm976_vm11, %v2713_v51, %v973_v42 }
0x1293   :  { %v982_v43 = vsel %vm979_vm12, %v981_v33, %v977_v19  ;;  %v3458_v33 = vld [vmem:[%s3954_s3 + $0x10] sm:$0xff] }
0x1294   :  { %v990_v0 = vmul.f32 %v988_v28, %v982_v43  ;;  %v997_v10 = vsub.f32 1.0, %v982_v43  ;;  %v1003_v11 = vmul.f32 %v982_v43, %v3331_v21  ;;  %v3421_v21 = vld [vmem:[%s3954_s3 + $0x8] sm:$0xff] }
0x1296   :  { %992 = vrot.lane.b32.xlu0 %v990_v0, %s2961_s14 }
0x129e   :  { %1062 = vrot.lane.b32.xlu0 %v1060_v2, %s2961_s14 }
0x1308   :  { %v993_v6 = vpop.permute.xlu0 %992 }
0x1309   :  { %v995_v9 = vadd.f32 %v993_v6, %v984_v44 }
0x130b   :  { %2714 = vtanh.f32 %v995_v9 }
0x1310   :  { %v1063_v37 = vpop.permute.xlu0 %1062 }
0x1311   :  { %v2715_v47 = vpop.eup %2714 }
0x1312   :  { %999 = vrot.lane.b32.xlu1 %v2715_v47, %s2963_s27 }
0x1384   :  { %v1000_v50 = vpop.permute.xlu1 %999 }
0x1385   :  { %v1002_v13 = vmul.f32 %v1000_v50, %v997_v10 }
0x1387   :  { %v3409_v53 = vadd.f32 %v1003_v11, %v1002_v13 }
0x1389   :  { %v1005_v15 = vpack.c.bf16 %v3409_v53, %v3409_v53 }
0x138b   :  { %1007 = vrot.lane.b32.xlu2 %v1005_v15, %s2963_s27 }
0x13e5   :  { %v1008_v35 = vpop.permute.xlu2 %1007 }
0x13e6   :  { %2562 = vmatmul.msk.bf16.vlgmr.msrb.gmra.mxu2 %vm226_vm0, %v1008_v35 }
0x13e7   :  { %1280 = vmatpush.bf16.msrb.mxu2 %v3194_v55 }
0x13eb   :  { %1281 = vmatpush.bf16.msrb.mxu2 %v3201_v56 }
0x13f6   :  { %2569 = vmatmul.msk.bf16.vlgmr.msra.gmra.mxu2 %vm226_vm0, %v933_v49 }
0x13f7   :  { %1405 = vmatpush.bf16.msra.mxu2 %v3421_v21 }
0x13fb   :  { %1406 = vmatpush.bf16.msra.mxu2 %v3427_v24 }
0x1469   :  { %v1021_v54 = vpop.f32.mrf.mxu2 }
0x146a   :  { %v1038_v55 = vadd.f32 %v1034_v48, %v1021_v54  ;;  %v1059_v1 = vadd.f32 %v1021_v54, %v3249_v52 }
0x146c   :  { %v1039_v56 = vadd.f32 %v3242_v12, %v1038_v55  ;;  %v3473_v55 = vld [vmem:[%s3952_s1 + $0x38] sm:$0xff] }
0x146e   :  { %v2564_v4 = vmul.f32 -1.442695, %v1039_v56  ;;  %v3479_v56 = vld [vmem:[%s3952_s1 + $0x30] sm:$0xff] }
0x1470   :  { %2716 = vpow2.f32 %v2564_v4  ;;  %v3485_v4 = vld [vmem:[%s3952_s1 + $0x28] sm:$0xff] }
0x1471   :  { %v1023_v57 = vpop.f32.mrf.mxu2 }
0x1472   :  { %v3491_v57 = vld [vmem:[%s3952_s1 + $0x20] sm:$0xff] }
0x1476   :  { %v2717_v18 = vpop.eup %2716 }
0x1477   :  { %v1043_v58 = vadd.f32 1.0, %v2717_v18  ;;  %v3497_v18 = vld [vmem:[%s3952_s1 + $0x18] sm:$0xff] }
0x1479   :  { %2718 = vrcp.f32 %v1043_v58  ;;  %v3431_v23 = vpop.f32.mrf.mxu2  ;;  %v1055_v36 = vand.u32 2147483648, %v1043_v58  ;;  %v1053_v49 = vand.u32 2147483647, %v1043_v58  ;;  %vm1049_vm14 = vweird.f32 %v1043_v58 }
0x147a   :  { %v1172_v0 = vadd.f32 %v3431_v23, %v3099_v17 }
0x147b   :  { %v1056_v12 = vor.u32 1.1754944e-38, %v1055_v36  ;;  %vm1054_vm1 = vcmp.eq.f32.partialorder %v1053_v49, 8.507059e+37  ;;  %v3522_v36 = vld [vmem:[%s3955_s4] ss:$0 sm:$0xff] }
0x147f   :  { %v2719_v7 = vpop.eup %2718 }
0x1480   :  { %v1045_v32 = vmul.f32 %v2719_v7, %v1043_v58  ;;  %vm1050_vm13 = vweird.f32 %v2719_v7  ;;  %v3503_v58 = vld [vmem:[%s3952_s1 + $0x10] sm:$0xff] }
0x1481   :  { %v1148_v34 = vpop.f32.mrf.mxu2  ;;  %vm1051_vm15 = vmor %vm1049_vm14, %vm1050_vm13 }
0x1482   :  { %v1046_v27 = vsub.f32 1.0, %v1045_v32  ;;  %v3515_v32 = vld [vmem:[%s3952_s1] sm:$0xff] }
0x1484   :  { %v1047_v26 = vmul.f32 %v2719_v7, %v1046_v27 }
0x1486   :  { %v1048_v59 = vadd.f32 %v2719_v7, %v1047_v26 }
0x1488   :  { %v1052_v40 = vsel %vm1051_vm15, %v2719_v7, %v1048_v59  ;;  %v3509_v7 = vld [vmem:[%s3952_s1 + $0x8] sm:$0xff] }
0x1489   :  { %v1057_v8 = vsel %vm1054_vm1, %v1056_v12, %v1052_v40 }
0x148a   :  { %v1065_v25 = vmul.f32 %v1063_v37, %v1057_v8  ;;  %v1072_v38 = vsub.f32 1.0, %v1057_v8  ;;  %v1078_v30 = vmul.f32 %v1057_v8, %v3349_v22  ;;  %v3452_v22 = vld [vmem:[%s3954_s3 + $0x18] sm:$0xff] }
0x148c   :  { %1067 = vrot.lane.b32.xlu1 %v1065_v25, %s2961_s14 }
0x14fe   :  { %v1068_v3 = vpop.permute.xlu1 %1067 }
0x14ff   :  { %v1070_v48 = vadd.f32 %v1068_v3, %v1059_v1 }
0x1501   :  { %2720 = vtanh.f32 %v1070_v48 }
0x1507   :  { %v2721_v51 = vpop.eup %2720 }
0x1508   :  { %1074 = vrot.lane.b32.xlu2 %v2721_v51, %s2963_s27 }
0x1562   :  { %v1075_v31 = vpop.permute.xlu2 %1074 }
0x1563   :  { %v1077_v39 = vmul.f32 %v1075_v31, %v1072_v38 }
0x1565   :  { %v3437_v60 = vadd.f32 %v1078_v30, %v1077_v39 }
0x1567   :  { %v1080_v61 = vpack.c.bf16 %v3437_v60, %v3437_v60 }
0x1569   :  { %1082 = vrot.lane.b32.xlu0 %v1080_v61, %s2963_s27 }
0x15db   :  { %v3442_v42 = vpop.permute.xlu0 %1082 }
0x15dc   :  { %2565 = vmatmul.msk.bf16.vlgmr.msra.gmra.mxu0 %vm226_vm0, %v3442_v42 }
0x15dd   :  { %1355 = vmatpush.bf16.msra.mxu0 %v3256_v62 }
0x15e1   :  { %1356 = vmatpush.bf16.msra.mxu0 %v3262_v63 }
0x15ec   :  { %2572 = vmatmul.msk.bf16.vlgmr.msrb.gmra.mxu0 %vm226_vm0, %v1008_v35 }
0x15ed   :  { %1480 = vmatpush.bf16.msrb.mxu0 %v3452_v22 }
0x15f1   :  { %1481 = vmatpush.bf16.msrb.mxu0 %v3458_v33 }
0x1659   :  { %v1096_v19 = vpop.f32.mrf.mxu0 }
0x165a   :  { %v1097_v62 = vadd.f32 %v3285_v29, %v1096_v19 }
0x165c   :  { %1101 = vst [vmem:[#allocation8 + $0x10] sm:$0xff] %v1097_v62  ;;  %1102 = vmax.xlane.f32.xlu1 %v1097_v62 }
0x1661   :  { %v1098_v63 = vpop.f32.mrf.mxu0 }
0x1669   :  { %v3462_v28 = vpop.f32.mrf.mxu0 }
0x1671   :  { %v1223_v43 = vpop.f32.mrf.mxu0 }
0x1672   :  { %v1247_v43 = vadd.f32 %v3462_v28, %v3164_v5 }
0x1675   :  { %1174 = vrot.lane.b32.xlu1 %v1172_v0, %s2961_s14 }
0x16cf   :  { %v1103_v2 = vpop.xlane.xlu1 %1102 }
0x16d0   :  { %vm1104_vm2 = vcmp.eq.f32.partialorder %v1097_v62, %v1103_v2 }
0x16d1   :  { %v1105_v44 = vsel %vm1104_vm2, %v3088_v14, 128 }
0x16d2   :  { %v1107_v6 = vshra.s32 %v1105_v44, 16  ;;  %v1106_v47 = vand.u32 65535, %v1105_v44 }
0x16d4   :  { %v1109_v9 = vcvt.s32.f32 %v1107_v6  ;;  %v1108_v10 = vcvt.s32.f32 %v1106_v47 }
0x16d6   :  { %1110 = vmin.xlane.f32.xlu2 %v1109_v9 }
0x16e7   :  { %v1175_v31 = vpop.permute.xlu1 %1174 }
0x1749   :  { %v1111_v29 = vpop.xlane.xlu2 %1110 }
0x174a   :  { %vm1112_vm3 = vcmp.eq.f32.partialorder %v1109_v9, %v1111_v29  ;;  %v1117_v11 = vcvt.f32.s32 %v1111_v29 }
0x174b   :  { %v1113_v50 = vsel %vm1112_vm3, %v1108_v10, inf  ;;  %v3541_v10 = vld [vmem:[%s3953_s2 + $0x18] sm:$0xff] }
0x174c   :  { %1114 = vmin.xlane.f32.xlu0 %v1113_v50  ;;  %v1118_v15 = vshll.u32 %v1117_v11, 16  ;;  %v3555_v50 = vld [vmem:[%s3954_s3 + $0x28] sm:$0xff]  ;;  %v3561_v11 = vld [vmem:[%s3954_s3 + $0x20] sm:$0xff] }
0x17bf   :  { %v1115_v13 = vpop.xlane.xlu0 %1114 }
0x17c0   :  { %v1116_v35 = vcvt.f32.s32 %v1115_v13 }
0x17c2   :  { %v1119_v54 = vadd.s32 %v1118_v15, %v1116_v35 }
0x17c4   :  { %vm1120_vm4 = vcmp.eq.s32.totalorder %v3088_v14, %v1119_v54 }
0x17c5   :  { %vm2567_vm5 = vmpackc.low %vm1120_vm4, %vm1120_vm4 }
0x17c6   :  { %2568 = vmatmul.msk.bf16.vlgmr.msra.gmra.mxu1 %vm2567_vm5, %v2962_v16 }
0x17c7   :  { %1648 = vmatpush.bf16.msra.mxu1 %v3473_v55 }
0x17cb   :  { %1649 = vmatpush.bf16.msra.mxu1 %v3479_v56 }
0x17cf   :  { %1650 = vmatpush.bf16.msra.mxu1 %v3485_v4 }
0x17d3   :  { %1651 = vmatpush.bf16.msra.mxu1 %v3491_v57 }
0x17d7   :  { %1652 = vmatpush.bf16.msra.mxu1 %v3497_v18 }
0x17db   :  { %1653 = vmatpush.bf16.msra.mxu1 %v3503_v58 }
0x17df   :  { %1654 = vmatpush.bf16.msra.mxu1 %v3509_v7 }
0x17e3   :  { %1655 = vmatpush.bf16.msra.mxu1 %v3515_v32 }
0x1843   :  { %v1133_v34 = vpop.f32.mrf.mxu1 }
0x1844   :  { %v1150_v27 = vadd.f32 %v3431_v23, %v1133_v34  ;;  %v1171_v61 = vadd.f32 %v1133_v34, %v3110_v41 }
0x1846   :  { %v1151_v26 = vadd.f32 %v3522_v36, %v1150_v27 }
0x1848   :  { %v2570_v49 = vmul.f32 -1.442695, %v1151_v26 }
0x184a   :  { %2722 = vpow2.f32 %v2570_v49 }
0x184b   :  { %v1135_v59 = vpop.f32.mrf.mxu1 }
0x1850   :  { %v2723_v12 = vpop.eup %2722 }
0x1851   :  { %v1155_v40 = vadd.f32 1.0, %v2723_v12 }
0x1853   :  { %2724 = vrcp.f32 %v1155_v40  ;;  %v1167_v1 = vand.u32 2147483648, %v1155_v40  ;;  %v1165_v23 = vand.u32 2147483647, %v1155_v40  ;;  %vm1161_vm7 = vweird.f32 %v1155_v40 }
0x1855   :  { %v1168_v51 = vor.u32 1.1754944e-38, %v1167_v1  ;;  %vm1166_vm9 = vcmp.eq.f32.partialorder %v1165_v23, 8.507059e+37 }
0x1859   :  { %v2725_v37 = vpop.eup %2724 }
0x185a   :  { %v1157_v8 = vmul.f32 %v2725_v37, %v1155_v40  ;;  %vm1162_vm6 = vweird.f32 %v2725_v37 }
0x185b   :  { %vm1163_vm8 = vmor %vm1161_vm7, %vm1162_vm6 }
0x185c   :  { %v1158_v25 = vsub.f32 1.0, %v1157_v8 }
0x185e   :  { %v1159_v3 = vmul.f32 %v2725_v37, %v1158_v25 }
0x1860   :  { %v1160_v48 = vadd.f32 %v2725_v37, %v1159_v3 }
0x1862   :  { %v1164_v38 = vsel %vm1163_vm8, %v2725_v37, %v1160_v48 }
0x1863   :  { %v1169_v30 = vsel %vm1166_vm9, %v1168_v51, %v1164_v38 }
0x1864   :  { %v1177_v39 = vmul.f32 %v1175_v31, %v1169_v30  ;;  %v1184_v0 = vsub.f32 1.0, %v1169_v30  ;;  %v1190_v44 = vmul.f32 %v1169_v30, %v3389_v46  ;;  %v3547_v46 = vld [vmem:[%s3953_s2 + $0x10] sm:$0xff] }
0x1866   :  { %1179 = vrot.lane.b32.xlu2 %v1177_v39, %s2961_s14 }
0x18c0   :  { %v1180_v19 = vpop.permute.xlu2 %1179 }
0x18c1   :  { %v1182_v62 = vadd.f32 %v1180_v19, %v1171_v61 }
0x18c3   :  { %2726 = vtanh.f32 %v1182_v62 }
0x18c9   :  { %v2727_v63 = vpop.eup %2726 }
0x18ca   :  { %1186 = vrot.lane.b32.xlu0 %v2727_v63, %s2963_s27 }
0x18d2   :  { %1249 = vrot.lane.b32.xlu0 %v1247_v43, %s2961_s14 }
0x193c   :  { %v1187_v2 = vpop.permute.xlu0 %1186 }
0x193d   :  { %v1189_v6 = vmul.f32 %v1187_v2, %v1184_v0 }
0x193f   :  { %v3532_v9 = vadd.f32 %v1190_v44, %v1189_v6 }
0x1941   :  { %v1192_v47 = vpack.c.bf16 %v3532_v9, %v3532_v9 }
0x1943   :  { %1194 = vrot.lane.b32.xlu1 %v1192_v47, %s2963_s27  ;;  %v3586_v47 = vld [vmem:[%s3953_s2 + $0x28] sm:$0xff] }
0x1944   :  { %v1250_v48 = vpop.permute.xlu0 %1249 }
0x19b5   :  { %v1195_v29 = vpop.permute.xlu1 %1194 }
0x19b6   :  { %2571 = vmatmul.msk.bf16.vlgmr.msra.gmra.mxu3 %vm226_vm0, %v1195_v29 }
0x19b7   :  { %1467 = vmatpush.bf16.msra.mxu3 %v3541_v10 }
0x19bb   :  { %1468 = vmatpush.bf16.msra.mxu3 %v3547_v46 }
0x19c6   :  { %2575 = vmatmul.msk.bf16.vlgmr.msrb.gmra.mxu3 %vm226_vm0, %v3442_v42  ;;  %v3568_v42 = vld [vmem:[%s3955_s4 + $0x1] ss:$0 sm:$0xff] }
0x19c7   :  { %1555 = vmatpush.bf16.msrb.mxu3 %v3555_v50 }
0x19cb   :  { %1556 = vmatpush.bf16.msrb.mxu3 %v3561_v11 }
0x1a39   :  { %v1208_v13 = vpop.f32.mrf.mxu3 }
0x1a3a   :  { %v1225_v15 = vadd.f32 %v3462_v28, %v1208_v13  ;;  %v1246_v30 = vadd.f32 %v1208_v13, %v3187_v45 }
0x1a3c   :  { %v1226_v35 = vadd.f32 %v3568_v42, %v1225_v15 }
0x1a3e   :  { %v2573_v54 = vmul.f32 -1.442695, %v1226_v35  ;;  %v3601_v35 = vld [vmem:[%s3955_s4 + $0x2] ss:$0 sm:$0xff] }
0x1a40   :  { %2728 = vpow2.f32 %v2573_v54 }
0x1a41   :  { %v1210_v34 = vpop.f32.mrf.mxu3 }
0x1a46   :  { %v2729_v27 = vpop.eup %2728 }
0x1a47   :  { %v1230_v26 = vadd.f32 1.0, %v2729_v27 }
0x1a49   :  { %2730 = vrcp.f32 %v1230_v26  ;;  %v1296_v49 = vpop.f32.mrf.mxu3  ;;  %v1242_v8 = vand.u32 2147483648, %v1230_v26  ;;  %v1240_v25 = vand.u32 2147483647, %v1230_v26  ;;  %vm1236_vm11 = vweird.f32 %v1230_v26 }
0x1a4a   :  { %v1322_v31 = vadd.f32 %v1296_v49, %v3221_v20 }
0x1a4b   :  { %v1243_v3 = vor.u32 1.1754944e-38, %v1242_v8  ;;  %vm1241_vm13 = vcmp.eq.f32.partialorder %v1240_v25, 8.507059e+37 }
0x1a4f   :  { %v2731_v59 = vpop.eup %2730 }
0x1a50   :  { %v1232_v12 = vmul.f32 %v2731_v59, %v1230_v26  ;;  %vm1237_vm10 = vweird.f32 %v2731_v59 }
0x1a51   :  { %v1298_v40 = vpop.f32.mrf.mxu3  ;;  %vm1238_vm12 = vmor %vm1236_vm11, %vm1237_vm10 }
0x1a52   :  { %v1233_v37 = vsub.f32 1.0, %v1232_v12 }
0x1a54   :  { %v1234_v28 = vmul.f32 %v2731_v59, %v1233_v37 }
0x1a56   :  { %v1235_v1 = vadd.f32 %v2731_v59, %v1234_v28 }
0x1a58   :  { %v1239_v23 = vsel %vm1238_vm12, %v2731_v59, %v1235_v1 }
0x1a59   :  { %v1244_v51 = vsel %vm1241_vm13, %v1243_v3, %v1239_v23 }
0x1a5a   :  { %v1252_v38 = vmul.f32 %v1250_v48, %v1244_v51  ;;  %v1259_v62 = vsub.f32 1.0, %v1244_v51  ;;  %v1265_v43 = vmul.f32 %v1244_v51, %v3409_v53  ;;  %v3592_v53 = vld [vmem:[%s3953_s2 + $0x20] sm:$0xff] }
0x1a5c   :  { %1254 = vrot.lane.b32.xlu2 %v1252_v38, %s2961_s14 }
0x1a64   :  { %1324 = vrot.lane.b32.xlu2 %v1322_v31, %s2961_s14 }
0x1ab6   :  { %v1255_v39 = vpop.permute.xlu2 %1254 }
0x1ab7   :  { %v1257_v61 = vadd.f32 %v1255_v39, %v1246_v30 }
0x1ab9   :  { %2732 = vtanh.f32 %v1257_v61 }
0x1abe   :  { %v1325_v48 = vpop.permute.xlu2 %1324 }
0x1abf   :  { %v2733_v19 = vpop.eup %2732 }
0x1ac0   :  { %1261 = vrot.lane.b32.xlu1 %v2733_v19, %s2963_s27 }
0x1b32   :  { %v1262_v63 = vpop.permute.xlu1 %1261 }
0x1b33   :  { %v1264_v0 = vmul.f32 %v1262_v63, %v1259_v62 }
0x1b35   :  { %v3577_v2 = vadd.f32 %v1265_v43, %v1264_v0 }
0x1b37   :  { %v1267_v44 = vpack.c.bf16 %v3577_v2, %v3577_v2 }
0x1b39   :  { %1269 = vrot.lane.b32.xlu0 %v1267_v44, %s2963_s27 }
0x1bab   :  { %v1270_v6 = vpop.permute.xlu0 %1269 }
0x1bac   :  { %2574 = vmatmul.msk.bf16.vlgmr.msrb.gmra.mxu2 %vm226_vm0, %v1270_v6 }
0x1bad   :  { %1542 = vmatpush.bf16.msrb.mxu2 %v3586_v47 }
0x1bb1   :  { %1543 = vmatpush.bf16.msrb.mxu2 %v3592_v53 }
0x1bbc   :  { %2581 = vmatmul.msk.bf16.vlgmr.msra.gmra.mxu2 %vm226_vm0, %v1195_v29 }
0x1bbd   :  { %1667 = vmatpush.bf16.msra.mxu2 %v3421_v21 }
0x1bc1   :  { %1668 = vmatpush.bf16.msra.mxu2 %v3427_v24 }
0x1c2f   :  { %v1283_v13 = vpop.f32.mrf.mxu2 }
0x1c30   :  { %v1300_v15 = vadd.f32 %v1296_v49, %v1283_v13  ;;  %v1321_v31 = vadd.f32 %v1283_v13, %v3249_v52  ;;  %v3622_v13 = vld [vmem:[%s3958_s7 + $0x8] sm:$0xff] }
0x1c32   :  { %v1301_v54 = vadd.f32 %v3601_v35, %v1300_v15 }
0x1c34   :  { %v2576_v34 = vmul.f32 -1.442695, %v1301_v54 }
0x1c36   :  { %2734 = vpow2.f32 %v2576_v34  ;;  %v3637_v34 = vld [vmem:[%s3959_s8] ss:$0 sm:$0xff] }
0x1c37   :  { %v1285_v27 = vpop.f32.mrf.mxu2 }
0x1c3c   :  { %v2735_v26 = vpop.eup %2734 }
0x1c3d   :  { %v1305_v59 = vadd.f32 1.0, %v2735_v26 }
0x1c3f   :  { %2736 = vrcp.f32 %v1305_v59  ;;  %v3604_v29 = vpop.f32.mrf.mxu2  ;;  %v1317_v49 = vand.u32 2147483648, %v1305_v59  ;;  %v1315_v25 = vand.u32 2147483647, %v1305_v59  ;;  %vm1311_vm15 = vweird.f32 %v1305_v59 }
0x1c41   :  { %v1318_v3 = vor.u32 1.1754944e-38, %v1317_v49  ;;  %vm1316_vm2 = vcmp.eq.f32.partialorder %v1315_v25, 8.507059e+37 }
0x1c45   :  { %v2737_v12 = vpop.eup %2736 }
0x1c46   :  { %v1307_v40 = vmul.f32 %v2737_v12, %v1305_v59  ;;  %vm1312_vm14 = vweird.f32 %v2737_v12 }
0x1c47   :  { %v1410_v37 = vpop.f32.mrf.mxu2  ;;  %vm1313_vm1 = vmor %vm1311_vm15, %vm1312_vm14 }
0x1c48   :  { %v1308_v8 = vsub.f32 1.0, %v1307_v40 }
0x1c4a   :  { %v1309_v28 = vmul.f32 %v2737_v12, %v1308_v8 }
0x1c4c   :  { %v1310_v1 = vadd.f32 %v2737_v12, %v1309_v28 }
0x1c4e   :  { %v1314_v23 = vsel %vm1313_vm1, %v2737_v12, %v1310_v1 }
0x1c4f   :  { %v1319_v51 = vsel %vm1316_vm2, %v1318_v3, %v1314_v23 }
0x1c50   :  { %v1327_v38 = vmul.f32 %v1325_v48, %v1319_v51  ;;  %v1334_v19 = vsub.f32 1.0, %v1319_v51  ;;  %v1340_v63 = vmul.f32 %v1319_v51, %v3437_v60  ;;  %v3628_v60 = vld [vmem:[%s3958_s7] sm:$0xff] }
0x1c52   :  { %1329 = vrot.lane.b32.xlu1 %v1327_v38, %s2961_s14 }
0x1cc4   :  { %v1330_v30 = vpop.permute.xlu1 %1329 }
0x1cc5   :  { %v1332_v39 = vadd.f32 %v1330_v30, %v1321_v31 }
0x1cc7   :  { %2738 = vtanh.f32 %v1332_v39 }
0x1ccd   :  { %v2739_v61 = vpop.eup %2738 }
0x1cce   :  { %1336 = vrot.lane.b32.xlu0 %v2739_v61, %s2963_s27 }
0x1d40   :  { %v1337_v62 = vpop.permute.xlu0 %1336 }
0x1d41   :  { %v1339_v43 = vmul.f32 %v1337_v62, %v1334_v19 }
0x1d43   :  { %v3610_v0 = vadd.f32 %v1340_v63, %v1339_v43 }
0x1d45   :  { %v1342_v44 = vpack.c.bf16 %v3610_v0, %v3610_v0 }
0x1d47   :  { %1344 = vrot.lane.b32.xlu2 %v1342_v44, %s2963_s27 }
0x1da1   :  { %v3615_v15 = vpop.permute.xlu2 %1344 }
0x1da2   :  { %2577 = vmatmul.msk.bf16.vlgmr.msra.gmra.mxu0 %vm226_vm0, %v3615_v15 }
0x1da3   :  { %1617 = vmatpush.bf16.msra.mxu0 %v3622_v13 }
0x1da7   :  { %1618 = vmatpush.bf16.msra.mxu0 %v3628_v60 }
0x1db2   :  { %2584 = vmatmul.msk.bf16.vlgmr.msrb.gmra.mxu0 %vm226_vm0, %v1270_v6  ;;  %v1434_v6 = vadd.f32 %v3604_v29, %v3099_v17 }
0x1db3   :  { %1742 = vmatpush.bf16.msrb.mxu0 %v3452_v22 }
0x1db7   :  { %1743 = vmatpush.bf16.msrb.mxu0 %v3458_v33 }
0x1e1f   :  { %v1358_v54 = vpop.f32.mrf.mxu0 }
0x1e20   :  { %v1359_v27 = vadd.f32 %v3637_v34, %v1358_v54 }
0x1e22   :  { %1363 = vst [vmem:[#allocation8 + $0x18] sm:$0xff] %v1359_v27  ;;  %1364 = vmax.xlane.f32.xlu1 %v1359_v27 }
0x1e27   :  { %v1360_v26 = vpop.f32.mrf.mxu0 }
0x1e2f   :  { %v3640_v59 = vpop.f32.mrf.mxu0 }
0x1e30   :  { %v1509_v40 = vadd.f32 %v3640_v59, %v3164_v5 }
0x1e37   :  { %v1485_v12 = vpop.f32.mrf.mxu0 }
0x1e3b   :  { %1436 = vrot.lane.b32.xlu1 %v1434_v6, %s2961_s14 }
0x1e43   :  { %1511 = vrot.lane.b32.xlu1 %v1509_v40, %s2961_s14 }
0x1e95   :  { %v1365_v37 = vpop.xlane.xlu1 %1364 }
0x1e96   :  { %vm1366_vm3 = vcmp.eq.f32.partialorder %v1359_v27, %v1365_v37 }
0x1e97   :  { %v1367_v8 = vsel %vm1366_vm3, %v3088_v14, 128 }
0x1e98   :  { %v1369_v49 = vshra.s32 %v1367_v8, 16  ;;  %v1368_v25 = vand.u32 65535, %v1367_v8 }
0x1e9a   :  { %v1371_v28 = vcvt.s32.f32 %v1369_v49  ;;  %v1370_v3 = vcvt.s32.f32 %v1368_v25 }
0x1e9c   :  { %1372 = vmin.xlane.f32.xlu0 %v1371_v28 }
0x1ead   :  { %v1437_v49 = vpop.permute.xlu1 %1436 }
0x1f0f   :  { %v1373_v1 = vpop.xlane.xlu0 %1372 }
0x1f10   :  { %vm1374_vm4 = vcmp.eq.f32.partialorder %v1371_v28, %v1373_v1  ;;  %v1379_v48 = vcvt.f32.s32 %v1373_v1 }
0x1f11   :  { %v1375_v23 = vsel %vm1374_vm4, %v1370_v3, inf }
0x1f12   :  { %1376 = vmin.xlane.f32.xlu2 %v1375_v23  ;;  %v1380_v38 = vshll.u32 %v1379_v48, 16 }
0x1f85   :  { %v1377_v51 = vpop.xlane.xlu2 %1376 }
0x1f86   :  { %v1378_v31 = vcvt.f32.s32 %v1377_v51 }
0x1f88   :  { %v1381_v30 = vadd.s32 %v1380_v38, %v1378_v31 }
0x1f8a   :  { %vm1382_vm5 = vcmp.eq.s32.totalorder %v3088_v14, %v1381_v30 }
0x1f8b   :  { %vm2579_vm6 = vmpackc.low %vm1382_vm5, %vm1382_vm5 }
0x1f8c   :  { %2580 = vmatmul.msk.bf16.vlgmr.msrb.gmra.mxu1 %vm2579_vm6, %v2962_v16 }
0x1f8d   :  { %1910 = vmatpush.bf16.msrb.mxu1 %v3473_v55 }
0x1f91   :  { %1911 = vmatpush.bf16.msrb.mxu1 %v3479_v56 }
0x1f95   :  { %1912 = vmatpush.bf16.msrb.mxu1 %v3485_v4 }
0x1f99   :  { %1913 = vmatpush.bf16.msrb.mxu1 %v3491_v57 }
0x1f9d   :  { %1914 = vmatpush.bf16.msrb.mxu1 %v3497_v18 }
0x1fa1   :  { %1915 = vmatpush.bf16.msrb.mxu1 %v3503_v58 }
0x1fa5   :  { %1916 = vmatpush.bf16.msrb.mxu1 %v3509_v7 }
0x1fa9   :  { %1917 = vmatpush.bf16.msrb.mxu1 %v3515_v32 }
0x2009   :  { %v1395_v39 = vpop.f32.mrf.mxu1 }
0x200a   :  { %v1412_v61 = vadd.f32 %v3604_v29, %v1395_v39  ;;  %v1433_v1 = vadd.f32 %v1395_v39, %v3110_v41 }
0x200c   :  { %v1413_v19 = vadd.f32 %v3522_v36, %v1412_v61 }
0x200e   :  { %v2582_v62 = vmul.f32 -1.442695, %v1413_v19 }
0x2010   :  { %2740 = vpow2.f32 %v2582_v62 }
0x2011   :  { %v1397_v63 = vpop.f32.mrf.mxu1 }
0x2016   :  { %v2741_v43 = vpop.eup %2740 }
0x2017   :  { %v1417_v44 = vadd.f32 1.0, %v2741_v43 }
0x2019   :  { %2742 = vrcp.f32 %v1417_v44  ;;  %v1429_v12 = vand.u32 2147483648, %v1417_v44  ;;  %v1427_v40 = vand.u32 2147483647, %v1417_v44  ;;  %vm1423_vm8 = vweird.f32 %v1417_v44 }
0x201b   :  { %v1430_v8 = vor.u32 1.1754944e-38, %v1429_v12  ;;  %vm1428_vm10 = vcmp.eq.f32.partialorder %v1427_v40, 8.507059e+37 }
0x201f   :  { %v2743_v54 = vpop.eup %2742 }
0x2020   :  { %v1419_v27 = vmul.f32 %v2743_v54, %v1417_v44  ;;  %vm1424_vm7 = vweird.f32 %v2743_v54 }
0x2021   :  { %vm1425_vm9 = vmor %vm1423_vm8, %vm1424_vm7 }
0x2022   :  { %v1420_v26 = vsub.f32 1.0, %v1419_v27 }
0x2024   :  { %v1421_v6 = vmul.f32 %v2743_v54, %v1420_v26 }
0x2026   :  { %v1422_v37 = vadd.f32 %v2743_v54, %v1421_v6 }
0x2028   :  { %v1426_v29 = vsel %vm1425_vm9, %v2743_v54, %v1422_v37 }
0x2029   :  { %v1431_v28 = vsel %vm1428_vm10, %v1430_v8, %v1426_v29 }
0x202a   :  { %v1439_v25 = vmul.f32 %v1437_v49, %v1431_v28  ;;  %v1446_v51 = vsub.f32 1.0, %v1431_v28  ;;  %v1452_v31 = vmul.f32 %v1431_v28, %v3532_v9 }
0x202c   :  { %1441 = vrot.lane.b32.xlu0 %v1439_v25, %s2961_s14  ;;  %v1512_v25 = vpop.permute.xlu1 %1511 }
0x209e   :  { %v1442_v3 = vpop.permute.xlu0 %1441 }
0x209f   :  { %v1444_v23 = vadd.f32 %v1442_v3, %v1433_v1 }
0x20a1   :  { %2744 = vtanh.f32 %v1444_v23 }
0x20a7   :  { %v2745_v48 = vpop.eup %2744 }
0x20a8   :  { %1448 = vrot.lane.b32.xlu2 %v2745_v48, %s2963_s27 }
0x2102   :  { %v1449_v38 = vpop.permute.xlu2 %1448 }
0x2103   :  { %v1451_v30 = vmul.f32 %v1449_v38, %v1446_v51 }
0x2105   :  { %v3665_v61 = vadd.f32 %v1452_v31, %v1451_v30 }
0x2107   :  { %v1454_v19 = vpack.c.bf16 %v3665_v61, %v3665_v61 }
0x2109   :  { %1456 = vrot.lane.b32.xlu0 %v1454_v19, %s2963_s27 }
0x217b   :  { %v1457_v62 = vpop.permute.xlu0 %1456 }
0x217c   :  { %2583 = vmatmul.msk.bf16.vlgmr.msra.gmra.mxu3 %vm226_vm0, %v1457_v62 }
0x217d   :  { %1729 = vmatpush.bf16.msra.mxu3 %v3541_v10 }
0x2181   :  { %1730 = vmatpush.bf16.msra.mxu3 %v3547_v46 }
0x218c   :  { %2587 = vmatmul.msk.bf16.vlgmr.msrb.gmra.mxu3 %vm226_vm0, %v3615_v15 }
0x218d   :  { %1817 = vmatpush.bf16.msrb.mxu3 %v3555_v50 }
0x2191   :  { %1818 = vmatpush.bf16.msrb.mxu3 %v3561_v11 }
0x21ff   :  { %v1470_v9 = vpop.f32.mrf.mxu3 }
0x2200   :  { %v1487_v39 = vadd.f32 %v3640_v59, %v1470_v9  ;;  %v1508_v48 = vadd.f32 %v1470_v9, %v3187_v45 }
0x2202   :  { %v1488_v63 = vadd.f32 %v3568_v42, %v1487_v39 }
0x2204   :  { %v2585_v43 = vmul.f32 -1.442695, %v1488_v63 }
0x2206   :  { %2746 = vpow2.f32 %v2585_v43 }
0x2207   :  { %v1472_v44 = vpop.f32.mrf.mxu3 }
0x220c   :  { %v2747_v54 = vpop.eup %2746 }
0x220d   :  { %v1492_v27 = vadd.f32 1.0, %v2747_v54 }
0x220f   :  { %2748 = vrcp.f32 %v1492_v27  ;;  %v1558_v26 = vpop.f32.mrf.mxu3  ;;  %v1504_v37 = vand.u32 2147483648, %v1492_v27  ;;  %v1502_v29 = vand.u32 2147483647, %v1492_v27  ;;  %vm1498_vm12 = vweird.f32 %v1492_v27 }
0x2210   :  { %v1584_v23 = vadd.f32 %v1558_v26, %v3221_v20 }
0x2211   :  { %v1505_v59 = vor.u32 1.1754944e-38, %v1504_v37  ;;  %vm1503_vm14 = vcmp.eq.f32.partialorder %v1502_v29, 8.507059e+37 }
0x2215   :  { %v2749_v12 = vpop.eup %2748 }
0x2216   :  { %v1494_v6 = vmul.f32 %v2749_v12, %v1492_v27  ;;  %vm1499_vm11 = vweird.f32 %v2749_v12 }
0x2217   :  { %v1560_v40 = vpop.f32.mrf.mxu3  ;;  %vm1500_vm13 = vmor %vm1498_vm12, %vm1499_vm11 }
0x2218   :  { %v1495_v15 = vsub.f32 1.0, %v1494_v6 }
0x221a   :  { %v1496_v8 = vmul.f32 %v2749_v12, %v1495_v15 }
0x221c   :  { %v1497_v49 = vadd.f32 %v2749_v12, %v1496_v8 }
0x221e   :  { %v1501_v28 = vsel %vm1500_vm13, %v2749_v12, %v1497_v49 }
0x221f   :  { %v1506_v1 = vsel %vm1503_vm14, %v1505_v59, %v1501_v28 }
0x2220   :  { %v1514_v3 = vmul.f32 %v1512_v25, %v1506_v1  ;;  %v1521_v30 = vsub.f32 1.0, %v1506_v1  ;;  %v1527_v39 = vmul.f32 %v1506_v1, %v3577_v2 }
0x2222   :  { %1516 = vrot.lane.b32.xlu2 %v1514_v3, %s2961_s14 }
0x222a   :  { %1586 = vrot.lane.b32.xlu2 %v1584_v23, %s2961_s14 }
0x227c   :  { %v1517_v51 = vpop.permute.xlu2 %1516 }
0x227d   :  { %v1519_v38 = vadd.f32 %v1517_v51, %v1508_v48 }
0x227f   :  { %2750 = vtanh.f32 %v1519_v38 }
0x2284   :  { %v1587_v1 = vpop.permute.xlu2 %1586 }
0x2285   :  { %v2751_v31 = vpop.eup %2750 }
0x2286   :  { %1523 = vrot.lane.b32.xlu0 %v2751_v31, %s2963_s27 }
0x22f8   :  { %v1524_v19 = vpop.permute.xlu0 %1523 }
0x22f9   :  { %v1526_v63 = vmul.f32 %v1524_v19, %v1521_v30 }
0x22fb   :  { %v3685_v43 = vadd.f32 %v1527_v39, %v1526_v63 }
0x22fd   :  { %v1529_v44 = vpack.c.bf16 %v3685_v43, %v3685_v43 }
0x22ff   :  { %1531 = vrot.lane.b32.xlu1 %v1529_v44, %s2963_s27 }
0x2371   :  { %v1532_v54 = vpop.permute.xlu1 %1531 }
0x2372   :  { %2586 = vmatmul.msk.bf16.vlgmr.msrb.gmra.mxu2 %vm226_vm0, %v1532_v54 }
0x2373   :  { %1804 = vmatpush.bf16.msrb.mxu2 %v3586_v47 }
0x2377   :  { %1805 = vmatpush.bf16.msrb.mxu2 %v3592_v53 }
0x2382   :  { %2593 = vmatmul.msk.bf16.vlgmr.msra.gmra.mxu2 %vm226_vm0, %v1457_v62 }
0x2383   :  { %1929 = vmatpush.bf16.msra.mxu2 %v3421_v21 }
0x2387   :  { %1930 = vmatpush.bf16.msra.mxu2 %v3427_v24 }
0x23f5   :  { %v1545_v2 = vpop.f32.mrf.mxu2 }
0x23f6   :  { %v1562_v9 = vadd.f32 %v1558_v26, %v1545_v2  ;;  %v1583_v48 = vadd.f32 %v1545_v2, %v3249_v52 }
0x23f8   :  { %v1563_v27 = vadd.f32 %v3601_v35, %v1562_v9 }
0x23fa   :  { %v2588_v12 = vmul.f32 -1.442695, %v1563_v27 }
0x23fc   :  { %2752 = vpow2.f32 %v2588_v12 }
0x23fd   :  { %v1547_v6 = vpop.f32.mrf.mxu2 }
0x2402   :  { %v2753_v40 = vpop.eup %2752 }
0x2403   :  { %v1567_v15 = vadd.f32 1.0, %v2753_v40 }
0x2405   :  { %2754 = vrcp.f32 %v1567_v15  ;;  %v3697_v37 = vpop.f32.mrf.mxu2  ;;  %v1579_v59 = vand.u32 2147483648, %v1567_v15  ;;  %v1577_v24 = vand.u32 2147483647, %v1567_v15  ;;  %vm1573_vm1 = vweird.f32 %v1567_v15 }
0x2406   :  { %v1696_v40 = vadd.f32 %v3697_v37, %v3099_v17 }
0x2407   :  { %v1580_v26 = vor.u32 1.1754944e-38, %v1579_v59  ;;  %vm1578_vm3 = vcmp.eq.f32.partialorder %v1577_v24, 8.507059e+37 }
0x240b   :  { %v2755_v8 = vpop.eup %2754 }
0x240c   :  { %v1569_v29 = vmul.f32 %v2755_v8, %v1567_v15  ;;  %vm1574_vm15 = vweird.f32 %v2755_v8 }
0x240d   :  { %v1672_v49 = vpop.f32.mrf.mxu2  ;;  %vm1575_vm2 = vmor %vm1573_vm1, %vm1574_vm15 }
0x240e   :  { %v1570_v62 = vsub.f32 1.0, %v1569_v29 }
0x2410   :  { %v1571_v21 = vmul.f32 %v2755_v8, %v1570_v62 }
0x2412   :  { %v1572_v28 = vadd.f32 %v2755_v8, %v1571_v21 }
0x2414   :  { %v1576_v25 = vsel %vm1575_vm2, %v2755_v8, %v1572_v28 }
0x2415   :  { %v1581_v3 = vsel %vm1578_vm3, %v1580_v26, %v1576_v25 }
0x2416   :  { %v1589_v23 = vmul.f32 %v1587_v1, %v1581_v3  ;;  %v1596_v30 = vsub.f32 1.0, %v1581_v3  ;;  %v1602_v39 = vmul.f32 %v1581_v3, %v3610_v0 }
0x2418   :  { %1591 = vrot.lane.b32.xlu0 %v1589_v23, %s2961_s14 }
0x248a   :  { %v1592_v51 = vpop.permute.xlu0 %1591 }
0x248b   :  { %v1594_v38 = vadd.f32 %v1592_v51, %v1583_v48 }
0x248d   :  { %2756 = vtanh.f32 %v1594_v38 }
0x2493   :  { %v2757_v31 = vpop.eup %2756 }
0x2494   :  { %1598 = vrot.lane.b32.xlu1 %v2757_v31, %s2963_s27 }
0x2506   :  { %v1599_v19 = vpop.permute.xlu1 %1598 }
0x2507   :  { %v1601_v63 = vmul.f32 %v1599_v19, %v1596_v30 }
0x2509   :  { %v3703_v44 = vadd.f32 %v1602_v39, %v1601_v63 }
0x250b   :  { %v1604_v9 = vpack.c.bf16 %v3703_v44, %v3703_v44 }
0x250d   :  { %1606 = vrot.lane.b32.xlu2 %v1604_v9, %s2963_s27 }
0x2567   :  { %v3708_v27 = vpop.permute.xlu2 %1606 }
0x2568   :  { %2589 = vmatmul.msk.bf16.vlgmr.msra.gmra.mxu0 %vm226_vm0, %v3708_v27 }
0x2569   :  { %1879 = vmatpush.bf16.msra.mxu0 %v3622_v13 }
0x256d   :  { %1880 = vmatpush.bf16.msra.mxu0 %v3628_v60 }
0x2578   :  { %2596 = vmatmul.msk.bf16.vlgmr.msrb.gmra.mxu0 %vm226_vm0, %v1532_v54 }
0x2579   :  { %2004 = vmatpush.bf16.msrb.mxu0 %v3452_v22 }
0x257d   :  { %2005 = vmatpush.bf16.msrb.mxu0 %v3458_v33 }
0x25e5   :  { %v1620_v0 = vpop.f32.mrf.mxu0 }
0x25e6   :  { %v1621_v2 = vadd.f32 %v3637_v34, %v1620_v0 }
0x25e8   :  { %1625 = vst [vmem:[#allocation8 + $0x20] sm:$0xff] %v1621_v2  ;;  %1626 = vmax.xlane.f32.xlu0 %v1621_v2 }
0x25ed   :  { %v1622_v12 = vpop.f32.mrf.mxu0 }
0x25f5   :  { %v3718_v6 = vpop.f32.mrf.mxu0 }
0x25f6   :  { %v1771_v39 = vadd.f32 %v3718_v6, %v3164_v5 }
0x25fc   :  { %1698 = vrot.lane.b32.xlu0 %v1696_v40, %s2961_s14 }
0x25fd   :  { %v1747_v15 = vpop.f32.mrf.mxu0 }
0x265b   :  { %v1627_v8 = vpop.xlane.xlu0 %1626 }
0x265c   :  { %vm1628_vm4 = vcmp.eq.f32.partialorder %v1621_v2, %v1627_v8 }
0x265d   :  { %v1629_v22 = vsel %vm1628_vm4, %v3088_v14, 128 }
0x265e   :  { %v1631_v54 = vshra.s32 %v1629_v22, 16  ;;  %v1630_v29 = vand.u32 65535, %v1629_v22 }
0x2660   :  { %v1633_v33 = vcvt.s32.f32 %v1631_v54  ;;  %v1632_v62 = vcvt.s32.f32 %v1630_v29 }
0x2662   :  { %1634 = vmin.xlane.f32.xlu1 %v1633_v33 }
0x26d5   :  { %v1635_v49 = vpop.xlane.xlu1 %1634 }
0x26d6   :  { %vm1636_vm5 = vcmp.eq.f32.partialorder %v1633_v33, %v1635_v49  ;;  %v1641_v21 = vcvt.f32.s32 %v1635_v49 }
0x26d7   :  { %v1637_v59 = vsel %vm1636_vm5, %v1632_v62, inf }
0x26d8   :  { %1638 = vmin.xlane.f32.xlu2 %v1637_v59  ;;  %v1642_v28 = vshll.u32 %v1641_v21, 16 }
0x274b   :  { %v1639_v24 = vpop.xlane.xlu2 %1638 }
0x274c   :  { %v1640_v26 = vcvt.f32.s32 %v1639_v24 }
0x274e   :  { %v1643_v25 = vadd.s32 %v1642_v28, %v1640_v26 }
0x2750   :  { %vm1644_vm6 = vcmp.eq.s32.totalorder %v3088_v14, %v1643_v25 }
0x2751   :  { %vm2591_vm7 = vmpackc.low %vm1644_vm6, %vm1644_vm6 }
0x2752   :  { %2592 = vmatmul.msk.bf16.vlgmr.msra.gmra.mxu1 %vm2591_vm7, %v2962_v16 }
0x2753   :  { %2172 = vmatpush.bf16.msra.mxu1 %v3473_v55 }
0x2757   :  { %2173 = vmatpush.bf16.msra.mxu1 %v3479_v56 }
0x275b   :  { %2174 = vmatpush.bf16.msra.mxu1 %v3485_v4 }
0x275f   :  { %2175 = vmatpush.bf16.msra.mxu1 %v3491_v57 }
0x2763   :  { %2176 = vmatpush.bf16.msra.mxu1 %v3497_v18 }
0x2767   :  { %2177 = vmatpush.bf16.msra.mxu1 %v3503_v58 }
0x276b   :  { %2178 = vmatpush.bf16.msra.mxu1 %v3509_v7 }
0x276f   :  { %2179 = vmatpush.bf16.msra.mxu1 %v3515_v32 }
0x27cf   :  { %v1657_v1 = vpop.f32.mrf.mxu1 }
0x27d0   :  { %v1674_v3 = vadd.f32 %v3697_v37, %v1657_v1  ;;  %v1695_v63 = vadd.f32 %v1657_v1, %v3110_v41 }
0x27d2   :  { %v1675_v23 = vadd.f32 %v3522_v36, %v1674_v3  ;;  %v1699_v36 = vpop.permute.xlu0 %1698 }
0x27d4   :  { %v2594_v55 = vmul.f32 -1.442695, %v1675_v23 }
0x27d6   :  { %2758 = vpow2.f32 %v2594_v55 }
0x27d7   :  { %v1659_v56 = vpop.f32.mrf.mxu1 }
0x27dc   :  { %v2759_v48 = vpop.eup %2758 }
0x27dd   :  { %v1679_v4 = vadd.f32 1.0, %v2759_v48 }
0x27df   :  { %2760 = vrcp.f32 %v1679_v4  ;;  %v1691_v38 = vand.u32 2147483648, %v1679_v4  ;;  %v1689_v7 = vand.u32 2147483647, %v1679_v4  ;;  %vm1685_vm9 = vweird.f32 %v1679_v4 }
0x27e1   :  { %v1692_v32 = vor.u32 1.1754944e-38, %v1691_v38  ;;  %vm1690_vm11 = vcmp.eq.f32.partialorder %v1689_v7, 8.507059e+37 }
0x27e5   :  { %v2761_v57 = vpop.eup %2760 }
0x27e6   :  { %v1681_v51 = vmul.f32 %v2761_v57, %v1679_v4  ;;  %vm1686_vm8 = vweird.f32 %v2761_v57 }
0x27e7   :  { %vm1687_vm10 = vmor %vm1685_vm9, %vm1686_vm8 }
0x27e8   :  { %v1682_v18 = vsub.f32 1.0, %v1681_v51 }
0x27ea   :  { %v1683_v58 = vmul.f32 %v2761_v57, %v1682_v18 }
0x27ec   :  { %v1684_v31 = vadd.f32 %v2761_v57, %v1683_v58 }
0x27ee   :  { %v1688_v37 = vsel %vm1687_vm10, %v2761_v57, %v1684_v31 }
0x27ef   :  { %v1693_v30 = vsel %vm1690_vm11, %v1692_v32, %v1688_v37 }
0x27f0   :  { %v1701_v19 = vmul.f32 %v1699_v36, %v1693_v30  ;;  %v1708_v12 = vsub.f32 1.0, %v1693_v30  ;;  %v1714_v15 = vmul.f32 %v1693_v30, %v3665_v61  ;;  %v2837_v36 = vld [vmem:[%s3954_s3] sm:$0xff] }
0x27f2   :  { %1703 = vrot.lane.b32.xlu2 %v1701_v19, %s2961_s14 }
0x27fa   :  { %1773 = vrot.lane.b32.xlu2 %v1771_v39, %s2961_s14 }
0x284c   :  { %v1704_v9 = vpop.permute.xlu2 %1703 }
0x284d   :  { %v1706_v0 = vadd.f32 %v1704_v9, %v1695_v63 }
0x284f   :  { %2762 = vtanh.f32 %v1706_v0 }
0x2854   :  { %v1774_v3 = vpop.permute.xlu2 %1773 }
0x2855   :  { %v2763_v2 = vpop.eup %2762 }
0x2856   :  { %1710 = vrot.lane.b32.xlu1 %v2763_v2, %s2963_s27 }
0x28c8   :  { %v1711_v40 = vpop.permute.xlu1 %1710 }
0x28c9   :  { %v1713_v8 = vmul.f32 %v1711_v40, %v1708_v12 }
0x28cb   :  { %v3743_v22 = vadd.f32 %v1714_v15, %v1713_v8 }
0x28cd   :  { %v1716_v54 = vpack.c.bf16 %v3743_v22, %v3743_v22 }
0x28cf   :  { %1718 = vrot.lane.b32.xlu0 %v1716_v54, %s2963_s27 }
0x2941   :  { %v1719_v33 = vpop.permute.xlu0 %1718 }
0x2942   :  { %2595 = vmatmul.msk.bf16.vlgmr.msra.gmra.mxu3 %vm226_vm0, %v1719_v33 }
0x2943   :  { %1991 = vmatpush.bf16.msra.mxu3 %v3541_v10 }
0x2947   :  { %1992 = vmatpush.bf16.msra.mxu3 %v3547_v46 }
0x2952   :  { %2599 = vmatmul.msk.bf16.vlgmr.msrb.gmra.mxu3 %vm226_vm0, %v3708_v27 }
0x2953   :  { %2079 = vmatpush.bf16.msrb.mxu3 %v3555_v50 }
0x2957   :  { %2080 = vmatpush.bf16.msrb.mxu3 %v3561_v11 }
0x29c5   :  { %v1732_v61 = vpop.f32.mrf.mxu3 }
0x29c6   :  { %v1749_v29 = vadd.f32 %v3718_v6, %v1732_v61  ;;  %v1770_v48 = vadd.f32 %v1732_v61, %v3187_v45 }
0x29c8   :  { %v1750_v49 = vadd.f32 %v3568_v42, %v1749_v29 }
0x29ca   :  { %v2597_v62 = vmul.f32 -1.442695, %v1750_v49 }
0x29cc   :  { %2764 = vpow2.f32 %v2597_v62 }
0x29cd   :  { %v1734_v59 = vpop.f32.mrf.mxu3 }
0x29d2   :  { %v2765_v21 = vpop.eup %2764 }
0x29d3   :  { %v1754_v24 = vadd.f32 1.0, %v2765_v21 }
0x29d5   :  { %2766 = vrcp.f32 %v1754_v24  ;;  %v1820_v10 = vpop.f32.mrf.mxu3  ;;  %v1766_v25 = vand.u32 2147483648, %v1754_v24  ;;  %v1764_v11 = vand.u32 2147483647, %v1754_v24  ;;  %vm1760_vm13 = vweird.f32 %v1754_v24 }
0x29d6   :  { %v1846_v56 = vadd.f32 %v1820_v10, %v3221_v20 }
0x29d7   :  { %v1767_v6 = vor.u32 1.1754944e-38, %v1766_v25  ;;  %vm1765_vm15 = vcmp.eq.f32.partialorder %v1764_v11, 8.507059e+37 }
0x29db   :  { %v2767_v46 = vpop.eup %2766 }
0x29dc   :  { %v1756_v28 = vmul.f32 %v2767_v46, %v1754_v24  ;;  %vm1761_vm12 = vweird.f32 %v2767_v46 }
0x29dd   :  { %v1822_v26 = vpop.f32.mrf.mxu3  ;;  %vm1762_vm14 = vmor %vm1760_vm13, %vm1761_vm12 }
0x29de   :  { %v1757_v27 = vsub.f32 1.0, %v1756_v28 }
0x29e0   :  { %v1758_v50 = vmul.f32 %v2767_v46, %v1757_v27 }
0x29e2   :  { %v1759_v1 = vadd.f32 %v2767_v46, %v1758_v50 }
0x29e4   :  { %v1763_v42 = vsel %vm1762_vm14, %v2767_v46, %v1759_v1 }
0x29e5   :  { %v1768_v23 = vsel %vm1765_vm15, %v1767_v6, %v1763_v42  ;;  %v2839_v6 = vld [vmem:[%s3954_s3 + $0x10] sm:$0xff] }
0x29e6   :  { %v1776_v55 = vmul.f32 %v1774_v3, %v1768_v23  ;;  %v1783_v18 = vsub.f32 1.0, %v1768_v23  ;;  %v1789_v58 = vmul.f32 %v1768_v23, %v3685_v43  ;;  %v2836_v43 = vld [vmem:[%s3954_s3 + $0x8] sm:$0xff] }
0x29e8   :  { %1778 = vrot.lane.b32.xlu0 %v1776_v55, %s2961_s14 }
0x29f0   :  { %1848 = vrot.lane.b32.xlu0 %v1846_v56, %s2961_s14 }
0x2a5a   :  { %v1779_v4 = vpop.permute.xlu0 %1778 }
0x2a5b   :  { %v1781_v57 = vadd.f32 %v1779_v4, %v1770_v48 }
0x2a5d   :  { %2768 = vtanh.f32 %v1781_v57 }
0x2a62   :  { %v1849_v49 = vpop.permute.xlu0 %1848 }
0x2a63   :  { %v2769_v51 = vpop.eup %2768 }
0x2a64   :  { %1785 = vrot.lane.b32.xlu1 %v2769_v51, %s2963_s27 }
0x2ad6   :  { %v1786_v38 = vpop.permute.xlu1 %1785 }
0x2ad7   :  { %v1788_v7 = vmul.f32 %v1786_v38, %v1783_v18 }
0x2ad9   :  { %v3763_v31 = vadd.f32 %v1789_v58, %v1788_v7 }
0x2adb   :  { %v1791_v32 = vpack.c.bf16 %v3763_v31, %v3763_v31 }
0x2add   :  { %1793 = vrot.lane.b32.xlu2 %v1791_v32, %s2963_s27 }
0x2b37   :  { %v1794_v37 = vpop.permute.xlu2 %1793 }
0x2b38   :  { %2598 = vmatmul.msk.bf16.vlgmr.msrb.gmra.mxu2 %vm226_vm0, %v1794_v37 }
0x2b39   :  { %2066 = vmatpush.bf16.msrb.mxu2 %v3586_v47 }
0x2b3d   :  { %2067 = vmatpush.bf16.msrb.mxu2 %v3592_v53 }
0x2b48   :  { %2605 = vmatmul.msk.bf16.vlgmr.msra.gmra.mxu2 %vm226_vm0, %v1719_v33 }
0x2b49   :  { %2191 = vmatpush.bf16.msra.mxu2 %v2836_v43 }
0x2b4d   :  { %2192 = vmatpush.bf16.msra.mxu2 %v2837_v36 }
0x2bbb   :  { %v1807_v30 = vpop.f32.mrf.mxu2 }
0x2bbc   :  { %v1824_v19 = vadd.f32 %v1820_v10, %v1807_v30  ;;  %v1845_v21 = vadd.f32 %v1807_v30, %v3249_v52 }
0x2bbe   :  { %v1825_v39 = vadd.f32 %v3601_v35, %v1824_v19  ;;  %v3816_v19 = vld [vmem:[%s3955_s4] ss:$0 sm:$0xff] }
0x2bc0   :  { %v2600_v63 = vmul.f32 -1.442695, %v1825_v39 }
0x2bc2   :  { %2770 = vpow2.f32 %v2600_v63 }
0x2bc3   :  { %v1809_v47 = vpop.f32.mrf.mxu2 }
0x2bc8   :  { %v2771_v53 = vpop.eup %2770 }
0x2bc9   :  { %v1829_v9 = vadd.f32 1.0, %v2771_v53 }
0x2bcb   :  { %2772 = vrcp.f32 %v1829_v9  ;;  %v3779_v0 = vpop.f32.mrf.mxu2  ;;  %v1841_v8 = vand.u32 2147483648, %v1829_v9  ;;  %v1839_v33 = vand.u32 2147483647, %v1829_v9  ;;  %vm1835_vm2 = vweird.f32 %v1829_v9 }
0x2bcc   :  { %v1958_v55 = vadd.f32 %v3779_v0, %v3099_v17 }
0x2bcd   :  { %v1842_v35 = vor.u32 1.1754944e-38, %v1841_v8  ;;  %vm1840_vm4 = vcmp.eq.f32.partialorder %v1839_v33, 8.507059e+37 }
0x2bd1   :  { %v2773_v2 = vpop.eup %2772 }
0x2bd2   :  { %v1831_v12 = vmul.f32 %v2773_v2, %v1829_v9  ;;  %vm1836_vm1 = vweird.f32 %v2773_v2 }
0x2bd3   :  { %v1934_v40 = vpop.f32.mrf.mxu2  ;;  %vm1837_vm3 = vmor %vm1835_vm2, %vm1836_vm1 }
0x2bd4   :  { %v1832_v15 = vsub.f32 1.0, %v1831_v12 }
0x2bd6   :  { %v1833_v54 = vmul.f32 %v2773_v2, %v1832_v15 }
0x2bd8   :  { %v1834_v61 = vadd.f32 %v2773_v2, %v1833_v54 }
0x2bda   :  { %v1838_v29 = vsel %vm1837_vm3, %v2773_v2, %v1834_v61 }
0x2bdb   :  { %v1843_v62 = vsel %vm1840_vm4, %v1842_v35, %v1838_v29 }
0x2bdc   :  { %v1851_v59 = vmul.f32 %v1849_v49, %v1843_v62  ;;  %v1858_v28 = vsub.f32 1.0, %v1843_v62  ;;  %v1864_v27 = vmul.f32 %v1843_v62, %v3703_v44  ;;  %v2838_v44 = vld [vmem:[%s3954_s3 + $0x18] sm:$0xff] }
0x2bde   :  { %1853 = vrot.lane.b32.xlu1 %v1851_v59, %s2961_s14 }
0x2c50   :  { %v1854_v24 = vpop.permute.xlu1 %1853 }
0x2c51   :  { %v1856_v10 = vadd.f32 %v1854_v24, %v1845_v21 }
0x2c53   :  { %2774 = vtanh.f32 %v1856_v10 }
0x2c59   :  { %v2775_v46 = vpop.eup %2774 }
0x2c5a   :  { %1860 = vrot.lane.b32.xlu2 %v2775_v46, %s2963_s27 }
0x2cb4   :  { %v1861_v26 = vpop.permute.xlu2 %1860 }
0x2cb5   :  { %v1863_v25 = vmul.f32 %v1861_v26, %v1858_v28 }
0x2cb7   :  { %v3785_v50 = vadd.f32 %v1864_v27, %v1863_v25 }
0x2cb9   :  { %v1866_v11 = vpack.c.bf16 %v3785_v50, %v3785_v50 }
0x2cbb   :  { %1868 = vrot.lane.b32.xlu0 %v1866_v11, %s2963_s27 }
0x2d2d   :  { %v3790_v1 = vpop.permute.xlu0 %1868 }
0x2d2e   :  { %2601 = vmatmul.msk.bf16.vlgmr.msra.gmra.mxu0 %vm226_vm0, %v3790_v1 }
0x2d2f   :  { %2141 = vmatpush.bf16.msra.mxu0 %v3622_v13 }
0x2d33   :  { %2142 = vmatpush.bf16.msra.mxu0 %v3628_v60 }
0x2d3e   :  { %2608 = vmatmul.msk.bf16.vlgmr.msrb.gmra.mxu0 %vm226_vm0, %v1794_v37 }
0x2d3f   :  { %2266 = vmatpush.bf16.msrb.mxu0 %v2838_v44 }
0x2d43   :  { %2267 = vmatpush.bf16.msrb.mxu0 %v2839_v6  ;;  %v2841_v6 = vld [vmem:[%s3953_s2 + $0x18] sm:$0xff] }
0x2dab   :  { %v1882_v42 = vpop.f32.mrf.mxu0 }
0x2dac   :  { %v1883_v3 = vadd.f32 %v3637_v34, %v1882_v42  ;;  %v2843_v42 = vld [vmem:[%s3954_s3 + $0x28] sm:$0xff] }
0x2dae   :  { %1887 = vst [vmem:[#allocation8 + $0x28] sm:$0xff] %v1883_v3  ;;  %1888 = vmax.xlane.f32.xlu1 %v1883_v3 }
0x2db3   :  { %v1884_v13 = vpop.f32.mrf.mxu0 }
0x2dbb   :  { %v3804_v23 = vpop.f32.mrf.mxu0 }
0x2dbc   :  { %v2033_v10 = vadd.f32 %v3804_v23, %v3164_v5 }
0x2dc3   :  { %v2009_v60 = vpop.f32.mrf.mxu0 }
0x2dc7   :  { %1960 = vrot.lane.b32.xlu1 %v1958_v55, %s2961_s14  ;;  %v3850_v55 = vld [vmem:[%s3955_s4 + $0x1] ss:$0 sm:$0xff] }
0x2e21   :  { %v1889_v56 = vpop.xlane.xlu1 %1888 }
0x2e22   :  { %vm1890_vm5 = vcmp.eq.f32.partialorder %v1883_v3, %v1889_v56  ;;  %v2844_v3 = vld [vmem:[%s3954_s3 + $0x20] sm:$0xff] }
0x2e23   :  { %v1891_v48 = vsel %vm1890_vm5, %v3088_v14, 128 }
0x2e24   :  { %v1893_v4 = vshra.s32 %v1891_v48, 16  ;;  %v1892_v51 = vand.u32 65535, %v1891_v48 }
0x2e26   :  { %v1895_v57 = vcvt.s32.f32 %v1893_v4  ;;  %v1894_v18 = vcvt.s32.f32 %v1892_v51 }
0x2e28   :  { %1896 = vmin.xlane.f32.xlu2 %v1895_v57 }
0x2e39   :  { %v1961_v35 = vpop.permute.xlu1 %1960 }
0x2e9b   :  { %v1897_v34 = vpop.xlane.xlu2 %1896 }
0x2e9c   :  { %vm1898_vm6 = vcmp.eq.f32.partialorder %v1895_v57, %v1897_v34  ;;  %v1903_v58 = vcvt.f32.s32 %v1897_v34 }
0x2e9d   :  { %v1899_v38 = vsel %vm1898_vm6, %v1894_v18, inf }
0x2e9e   :  { %1900 = vmin.xlane.f32.xlu0 %v1899_v38  ;;  %v1904_v32 = vshll.u32 %v1903_v58, 16 }
0x2f11   :  { %v1901_v7 = vpop.xlane.xlu0 %1900 }
0x2f12   :  { %v1902_v37 = vcvt.f32.s32 %v1901_v7 }
0x2f14   :  { %v1905_v43 = vadd.s32 %v1904_v32, %v1902_v37 }
0x2f16   :  { %vm1906_vm7 = vcmp.eq.s32.totalorder %v3088_v14, %v1905_v43 }
0x2f17   :  { %vm2603_vm8 = vmpackc.low %vm1906_vm7, %vm1906_vm7 }
0x2f18   :  { %2604 = vmatmul.msk.bf16.vlgmr.msrb.gmra.mxu1 %vm2603_vm8, %v2962_v16 }
0x2f95   :  { %v1919_v36 = vpop.f32.mrf.mxu1 }
0x2f96   :  { %v1936_v30 = vadd.f32 %v3779_v0, %v1919_v36  ;;  %v1957_v62 = vadd.f32 %v1919_v36, %v3110_v41 }
0x2f98   :  { %v1937_v39 = vadd.f32 %v3816_v19, %v1936_v30 }
0x2f9a   :  { %v2606_v63 = vmul.f32 -1.442695, %v1937_v39 }
0x2f9c   :  { %2776 = vpow2.f32 %v2606_v63 }
0x2f9d   :  { %v1921_v47 = vpop.f32.mrf.mxu1 }
0x2fa2   :  { %v2777_v53 = vpop.eup %2776 }
0x2fa3   :  { %v1941_v9 = vadd.f32 1.0, %v2777_v53 }
0x2fa5   :  { %2778 = vrcp.f32 %v1941_v9  ;;  %v1953_v15 = vand.u32 2147483648, %v1941_v9  ;;  %v1951_v0 = vand.u32 2147483647, %v1941_v9  ;;  %vm1947_vm10 = vweird.f32 %v1941_v9 }
0x2fa7   :  { %v1954_v33 = vor.u32 1.1754944e-38, %v1953_v15  ;;  %vm1952_vm12 = vcmp.eq.f32.partialorder %v1951_v0, 8.507059e+37 }
0x2fab   :  { %v2779_v2 = vpop.eup %2778 }
0x2fac   :  { %v1943_v12 = vmul.f32 %v2779_v2, %v1941_v9  ;;  %vm1948_vm9 = vweird.f32 %v2779_v2 }
0x2fad   :  { %vm1949_vm11 = vmor %vm1947_vm10, %vm1948_vm9 }
0x2fae   :  { %v1944_v40 = vsub.f32 1.0, %v1943_v12 }
0x2fb0   :  { %v1945_v8 = vmul.f32 %v2779_v2, %v1944_v40 }
0x2fb2   :  { %v1946_v54 = vadd.f32 %v2779_v2, %v1945_v8 }
0x2fb4   :  { %v1950_v61 = vsel %vm1949_vm11, %v2779_v2, %v1946_v54 }
0x2fb5   :  { %v1955_v29 = vsel %vm1952_vm12, %v1954_v33, %v1950_v61 }
0x2fb6   :  { %v1963_v49 = vmul.f32 %v1961_v35, %v1955_v29  ;;  %v1970_v46 = vsub.f32 1.0, %v1955_v29  ;;  %v1976_v26 = vmul.f32 %v1955_v29, %v3743_v22  ;;  %v2842_v22 = vld [vmem:[%s3953_s2 + $0x10] sm:$0xff]  ;;  %v2846_v35 = vld [vmem:[%s3953_s2 + $0x28] sm:$0xff] }
0x2fb8   :  { %1965 = vrot.lane.b32.xlu2 %v1963_v49, %s2961_s14 }
0x3012   :  { %v1966_v59 = vpop.permute.xlu2 %1965 }
0x3013   :  { %v1968_v21 = vadd.f32 %v1966_v59, %v1957_v62  ;;  %v3875_v62 = vld [vmem:[%s3955_s4 + $0x2] ss:$0 sm:$0xff] }
0x3015   :  { %2780 = vtanh.f32 %v1968_v21 }
0x301b   :  { %v2781_v24 = vpop.eup %2780 }
0x301c   :  { %1972 = vrot.lane.b32.xlu0 %v2781_v24, %s2963_s27 }
0x3024   :  { %2035 = vrot.lane.b32.xlu0 %v2033_v10, %s2961_s14 }
0x308e   :  { %v1973_v28 = vpop.permute.xlu0 %1972 }
0x308f   :  { %v1975_v27 = vmul.f32 %v1973_v28, %v1970_v46 }
0x3091   :  { %v3826_v25 = vadd.f32 %v1976_v26, %v1975_v27 }
0x3093   :  { %v1978_v11 = vpack.c.bf16 %v3826_v25, %v3826_v25 }
0x3095   :  { %1980 = vrot.lane.b32.xlu1 %v1978_v11, %s2963_s27 }
0x3096   :  { %v2036_v30 = vpop.permute.xlu0 %2035 }
0x3107   :  { %v1981_v44 = vpop.permute.xlu1 %1980 }
0x3108   :  { %2607 = vmatmul.msk.bf16.vlgmr.msra.gmra.mxu3 %vm226_vm0, %v1981_v44 }
0x3109   :  { %2253 = vmatpush.bf16.msra.mxu3 %v2841_v6 }
0x310d   :  { %2254 = vmatpush.bf16.msra.mxu3 %v2842_v22 }
0x3118   :  { %2611 = vmatmul.msk.bf16.vlgmr.msrb.gmra.mxu3 %vm226_vm0, %v3790_v1 }
0x3119   :  { %2341 = vmatpush.bf16.msrb.mxu3 %v2843_v42 }
0x311d   :  { %2342 = vmatpush.bf16.msrb.mxu3 %v2844_v3 }
0x318b   :  { %v1994_v13 = vpop.f32.mrf.mxu3 }
0x318c   :  { %v2011_v60 = vadd.f32 %v3804_v23, %v1994_v13  ;;  %v2032_v53 = vadd.f32 %v1994_v13, %v3187_v45 }
0x318e   :  { %v2012_v1 = vadd.f32 %v3850_v55, %v2011_v60 }
0x3190   :  { %v2609_v56 = vmul.f32 -1.442695, %v2012_v1 }
0x3192   :  { %2782 = vpow2.f32 %v2609_v56 }
0x3193   :  { %v1996_v48 = vpop.f32.mrf.mxu3 }
0x3198   :  { %v2783_v4 = vpop.eup %2782 }
0x3199   :  { %v2016_v57 = vadd.f32 1.0, %v2783_v4 }
0x319b   :  { %2784 = vrcp.f32 %v2016_v57  ;;  %v2082_v51 = vpop.f32.mrf.mxu3  ;;  %v2028_v7 = vand.u32 2147483648, %v2016_v57  ;;  %v2026_v32 = vand.u32 2147483647, %v2016_v57  ;;  %vm2022_vm14 = vweird.f32 %v2016_v57 }
0x319c   :  { %v2108_v47 = vadd.f32 %v2082_v51, %v3221_v20 }
0x319d   :  { %v2029_v43 = vor.u32 1.1754944e-38, %v2028_v7  ;;  %vm2027_vm1 = vcmp.eq.f32.partialorder %v2026_v32, 8.507059e+37 }
0x31a1   :  { %v2785_v34 = vpop.eup %2784 }
0x31a2   :  { %v2018_v18 = vmul.f32 %v2785_v34, %v2016_v57  ;;  %vm2023_vm13 = vweird.f32 %v2785_v34 }
0x31a3   :  { %v2084_v38 = vpop.f32.mrf.mxu3  ;;  %vm2024_vm15 = vmor %vm2022_vm14, %vm2023_vm13 }
0x31a4   :  { %v2019_v58 = vsub.f32 1.0, %v2018_v18 }
0x31a6   :  { %v2020_v23 = vmul.f32 %v2785_v34, %v2019_v58 }
0x31a8   :  { %v2021_v37 = vadd.f32 %v2785_v34, %v2020_v23 }
0x31aa   :  { %v2025_v36 = vsel %vm2024_vm15, %v2785_v34, %v2021_v37 }
0x31ab   :  { %v2030_v39 = vsel %vm2027_vm1, %v2029_v43, %v2025_v36  ;;  %v2849_v43 = vld [vmem:[%s3958_s7 + $0x8] sm:$0xff] }
0x31ac   :  { %v2038_v63 = vmul.f32 %v2036_v30, %v2030_v39  ;;  %v2045_v40 = vsub.f32 1.0, %v2030_v39  ;;  %v2051_v8 = vmul.f32 %v2030_v39, %v3763_v31  ;;  %v2847_v31 = vld [vmem:[%s3953_s2 + $0x20] sm:$0xff] }
0x31ad   :  { %v3903_v30 = vld [vmem:[%s3959_s8] ss:$0 sm:$0xff] }
0x31ae   :  { %2040 = vrot.lane.b32.xlu2 %v2038_v63, %s2961_s14 }
0x31b6   :  { %2110 = vrot.lane.b32.xlu2 %v2108_v47, %s2961_s14 }
0x3208   :  { %v2041_v9 = vpop.permute.xlu2 %2040 }
0x3209   :  { %v2043_v2 = vadd.f32 %v2041_v9, %v2032_v53 }
0x320b   :  { %2786 = vtanh.f32 %v2043_v2 }
0x3210   :  { %v2111_v1 = vpop.permute.xlu2 %2110 }
0x3211   :  { %v2787_v12 = vpop.eup %2786 }
0x3212   :  { %2047 = vrot.lane.b32.xlu1 %v2787_v12, %s2963_s27 }
0x3284   :  { %v2048_v15 = vpop.permute.xlu1 %2047 }
0x3285   :  { %v2050_v0 = vmul.f32 %v2048_v15, %v2045_v40 }
0x3287   :  { %v3859_v54 = vadd.f32 %v2051_v8, %v2050_v0 }
0x3289   :  { %v2053_v33 = vpack.c.bf16 %v3859_v54, %v3859_v54 }
0x328b   :  { %2055 = vrot.lane.b32.xlu0 %v2053_v33, %s2963_s27 }
0x32fd   :  { %v2056_v61 = vpop.permute.xlu0 %2055 }
0x32fe   :  { %2610 = vmatmul.msk.bf16.vlgmr.msrb.gmra.mxu2 %vm226_vm0, %v2056_v61 }
0x32ff   :  { %2328 = vmatpush.bf16.msrb.mxu2 %v2846_v35 }
0x3303   :  { %2329 = vmatpush.bf16.msrb.mxu2 %v2847_v31 }
0x330e   :  { %2617 = vmatmul.msk.bf16.vlgmr.msra.gmra.mxu2 %vm226_vm0, %v1981_v44 }
0x3381   :  { %v2069_v29 = vpop.f32.mrf.mxu2 }
0x3382   :  { %v2086_v49 = vadd.f32 %v2082_v51, %v2069_v29  ;;  %v2107_v4 = vadd.f32 %v2069_v29, %v3249_v52 }
0x3384   :  { %v2087_v59 = vadd.f32 %v3875_v62, %v2086_v49 }
0x3386   :  { %v2612_v21 = vmul.f32 -1.442695, %v2087_v59 }
0x3388   :  { %2788 = vpow2.f32 %v2612_v21 }
0x3389   :  { %v2071_v24 = vpop.f32.mrf.mxu2 }
0x338e   :  { %v2789_v10 = vpop.eup %2788 }
0x338f   :  { %v2091_v46 = vadd.f32 1.0, %v2789_v10 }
0x3391   :  { %2790 = vrcp.f32 %v2091_v46  ;;  %v3878_v28 = vpop.f32.mrf.mxu2  ;;  %v2103_v6 = vand.u32 2147483648, %v2091_v46  ;;  %v2101_v42 = vand.u32 2147483647, %v2091_v46  ;;  %vm2097_vm3 = vweird.f32 %v2091_v46 }
0x3392   :  { %v2220_v9 = vadd.f32 %v3878_v28, %v3099_v17 }
0x3393   :  { %v2104_v13 = vor.u32 1.1754944e-38, %v2103_v6  ;;  %vm2102_vm5 = vcmp.eq.f32.partialorder %v2101_v42, 8.507059e+37 }
0x3397   :  { %v2791_v26 = vpop.eup %2790 }
0x3398   :  { %v2093_v27 = vmul.f32 %v2791_v26, %v2091_v46  ;;  %vm2098_vm2 = vweird.f32 %v2791_v26 }
0x3399   :  { %v2196_v11 = vpop.f32.mrf.mxu2  ;;  %vm2099_vm4 = vmor %vm2097_vm3, %vm2098_vm2 }
0x339a   :  { %v2094_v44 = vsub.f32 1.0, %v2093_v27 }
0x339c   :  { %v2095_v22 = vmul.f32 %v2791_v26, %v2094_v44 }
0x339e   :  { %v2096_v3 = vadd.f32 %v2791_v26, %v2095_v22 }
0x33a0   :  { %v2100_v60 = vsel %vm2099_vm4, %v2791_v26, %v2096_v3 }
0x33a1   :  { %v2105_v56 = vsel %vm2102_vm5, %v2104_v13, %v2100_v60 }
0x33a2   :  { %v2113_v48 = vmul.f32 %v2111_v1, %v2105_v56  ;;  %v2120_v18 = vsub.f32 1.0, %v2105_v56  ;;  %v2126_v58 = vmul.f32 %v2105_v56, %v3785_v50  ;;  %v2850_v50 = vld [vmem:[%s3958_s7] sm:$0xff]  ;;  %s2965_s7 = smov [#allocation8]  }
0x33a3   :  { %s2416_s8 = sshll.u32 %s2965_s7, 4  ;;  %s2417_s8 = int_to_ptr.vmem [resolvable:$true] %s2416_s8 }
0x33a4   :  { %2115 = vrot.lane.b32.xlu1 %v2113_v48, %s2961_s14 }
0x3416   :  { %v2116_v57 = vpop.permute.xlu1 %2115 }
0x3417   :  { %v2118_v51 = vadd.f32 %v2116_v57, %v2107_v4 }
0x3419   :  { %2792 = vtanh.f32 %v2118_v51 }
0x341f   :  { %v2793_v34 = vpop.eup %2792 }
0x3420   :  { %2122 = vrot.lane.b32.xlu0 %v2793_v34, %s2963_s27 }
0x3492   :  { %v2123_v38 = vpop.permute.xlu0 %2122 }
0x3493   :  { %v2125_v7 = vmul.f32 %v2123_v38, %v2120_v18 }
0x3495   :  { %v3884_v23 = vadd.f32 %v2126_v58, %v2125_v7 }
0x3497   :  { %v2128_v32 = vpack.c.bf16 %v3884_v23, %v3884_v23 }
0x3499   :  { %2130 = vrot.lane.b32.xlu2 %v2128_v32, %s2963_s27 }
0x34f3   :  { %v3889_v37 = vpop.permute.xlu2 %2130 }
0x34f4   :  { %2613 = vmatmul.msk.bf16.vlgmr.msra.gmra.mxu0 %vm226_vm0, %v3889_v37 }
0x34f5   :  { %2403 = vmatpush.bf16.msra.mxu0 %v2849_v43 }
0x34f9   :  { %2404 = vmatpush.bf16.msra.mxu0 %v2850_v50 }
0x3504   :  { %2620 = vmatmul.msk.bf16.vlgmr.msrb.gmra.mxu0 %vm226_vm0, %v2056_v61 }
0x3571   :  { %v2144_v36 = vpop.f32.mrf.mxu0 }
0x3572   :  { %v2145_v39 = vadd.f32 %v3903_v30, %v2144_v36 }
0x3574   :  { %2149 = vst [vmem:[#allocation8 + $0x30] sm:$0xff] %v2145_v39  ;;  %2150 = vmax.xlane.f32.xlu1 %v2145_v39 }
0x3579   :  { %v2146_v63 = vpop.f32.mrf.mxu0 }
0x3581   :  { %v3906_v47 = vpop.f32.mrf.mxu0 }
0x3582   :  { %v2295_v2 = vadd.f32 %v3906_v47, %v3164_v5 }
0x3589   :  { %v2271_v53 = vpop.f32.mrf.mxu0 }
0x358d   :  { %2222 = vrot.lane.b32.xlu1 %v2220_v9, %s2961_s14 }
0x3595   :  { %2297 = vrot.lane.b32.xlu1 %v2295_v2, %s2961_s14 }
0x35e7   :  { %v2151_v12 = vpop.xlane.xlu1 %2150 }
0x35e8   :  { %vm2152_vm6 = vcmp.eq.f32.partialorder %v2145_v39, %v2151_v12 }
0x35e9   :  { %v2153_v40 = vsel %vm2152_vm6, %v3088_v14, 128 }
0x35ea   :  { %v2155_v15 = vshra.s32 %v2153_v40, 16  ;;  %v2154_v0 = vand.u32 65535, %v2153_v40 }
0x35ec   :  { %v2157_v8 = vcvt.s32.f32 %v2155_v15  ;;  %v2156_v61 = vcvt.s32.f32 %v2154_v0 }
0x35ee   :  { %2158 = vmin.xlane.f32.xlu0 %v2157_v8 }
0x3661   :  { %v2159_v33 = vpop.xlane.xlu0 %2158 }
0x3662   :  { %vm2160_vm7 = vcmp.eq.f32.partialorder %v2157_v8, %v2159_v33  ;;  %v2165_v17 = vcvt.f32.s32 %v2159_v33 }
0x3663   :  { %v2161_v35 = vsel %vm2160_vm7, %v2156_v61, inf }
0x3664   :  { %2162 = vmin.xlane.f32.xlu2 %v2161_v35  ;;  %v2166_v29 = vshll.u32 %v2165_v17, 16 }
0x36d7   :  { %v2163_v31 = vpop.xlane.xlu2 %2162 }
0x36d8   :  { %v2164_v49 = vcvt.f32.s32 %v2163_v31 }
0x36da   :  { %v2167_v5 = vadd.s32 %v2166_v29, %v2164_v49 }
0x36dc   :  { %vm2168_vm8 = vcmp.eq.s32.totalorder %v3088_v14, %v2167_v5 }
0x36dd   :  { %vm2615_vm9 = vmpackc.low %vm2168_vm8, %vm2168_vm8 }
0x36de   :  { %2616 = vmatmul.msk.bf16.vlgmr.msra.gmra.mxu1 %vm2615_vm9, %v2962_v16 }
0x375b   :  { %v2181_v59 = vpop.f32.mrf.mxu1 }
0x375c   :  { %v2198_v21 = vadd.f32 %v3878_v28, %v2181_v59  ;;  %v2219_v1 = vadd.f32 %v2181_v59, %v3110_v41 }
0x375e   :  { %v2199_v24 = vadd.f32 %v3816_v19, %v2198_v21  ;;  %v2223_v19 = vpop.permute.xlu1 %2222 }
0x3760   :  { %v2618_v10 = vmul.f32 -1.442695, %v2199_v24 }
0x3762   :  { %2794 = vpow2.f32 %v2618_v10 }
0x3763   :  { %v2183_v46 = vpop.f32.mrf.mxu1 }
0x3766   :  { %v2298_v0 = vpop.permute.xlu1 %2297 }
0x3768   :  { %v2795_v26 = vpop.eup %2794 }
0x3769   :  { %v2203_v27 = vadd.f32 1.0, %v2795_v26 }
0x376b   :  { %2796 = vrcp.f32 %v2203_v27  ;;  %v2215_v22 = vand.u32 2147483648, %v2203_v27  ;;  %v2213_v14 = vand.u32 2147483647, %v2203_v27  ;;  %vm2209_vm11 = vweird.f32 %v2203_v27 }
0x376d   :  { %v2216_v16 = vor.u32 1.1754944e-38, %v2215_v22  ;;  %vm2214_vm13 = vcmp.eq.f32.partialorder %v2213_v14, 8.507059e+37 }
0x3771   :  { %v2797_v11 = vpop.eup %2796 }
0x3772   :  { %v2205_v44 = vmul.f32 %v2797_v11, %v2203_v27  ;;  %vm2210_vm10 = vweird.f32 %v2797_v11 }
0x3773   :  { %vm2211_vm12 = vmor %vm2209_vm11, %vm2210_vm10 }
0x3774   :  { %v2206_v6 = vsub.f32 1.0, %v2205_v44 }
0x3776   :  { %v2207_v42 = vmul.f32 %v2797_v11, %v2206_v6 }
0x3778   :  { %v2208_v3 = vadd.f32 %v2797_v11, %v2207_v42 }
0x377a   :  { %v2212_v28 = vsel %vm2211_vm12, %v2797_v11, %v2208_v3 }
0x377b   :  { %v2217_v13 = vsel %vm2214_vm13, %v2216_v16, %v2212_v28 }
0x377c   :  { %v2225_v60 = vmul.f32 %v2223_v19, %v2217_v13  ;;  %v2232_v57 = vsub.f32 1.0, %v2217_v13  ;;  %v2238_v34 = vmul.f32 %v2217_v13, %v3826_v25 }
0x377e   :  { %2227 = vrot.lane.b32.xlu0 %v2225_v60, %s2961_s14 }
0x37f0   :  { %v2228_v56 = vpop.permute.xlu0 %2227 }
0x37f1   :  { %v2230_v48 = vadd.f32 %v2228_v56, %v2219_v1 }
0x37f3   :  { %2798 = vtanh.f32 %v2230_v48 }
0x37f9   :  { %v2799_v4 = vpop.eup %2798 }
0x37fa   :  { %2234 = vrot.lane.b32.xlu2 %v2799_v4, %s2963_s27 }
0x3854   :  { %v2235_v51 = vpop.permute.xlu2 %2234 }
0x3855   :  { %v2237_v18 = vmul.f32 %v2235_v51, %v2232_v57 }
0x3857   :  { %v2239_v38 = vadd.f32 %v2238_v34, %v2237_v18 }
0x3859   :  { %v2240_v58 = vpack.c.bf16 %v2239_v38, %v2239_v38 }
0x385b   :  { %2242 = vrot.lane.b32.xlu0 %v2240_v58, %s2963_s27 }
0x38cd   :  { %v2243_v7 = vpop.permute.xlu0 %2242 }
0x38ce   :  { %2619 = vmatmul.msk.bf16.vlgmr.msra.gmra.mxu3 %vm226_vm0, %v2243_v7 }
0x38de   :  { %2623 = vmatmul.msk.bf16.vlgmr.msrb.gmra.mxu3 %vm226_vm0, %v3889_v37 }
0x3951   :  { %v2256_v41 = vpop.f32.mrf.mxu3 }
0x3952   :  { %v2273_v32 = vadd.f32 %v3906_v47, %v2256_v41  ;;  %v2294_v17 = vadd.f32 %v2256_v41, %v3187_v45 }
0x3954   :  { %v2274_v43 = vadd.f32 %v3850_v55, %v2273_v32 }
0x3956   :  { %v2621_v50 = vmul.f32 -1.442695, %v2274_v43 }
0x3958   :  { %2800 = vpow2.f32 %v2621_v50 }
0x3959   :  { %v2258_v36 = vpop.f32.mrf.mxu3 }
0x395e   :  { %v2801_v25 = vpop.eup %2800 }
0x395f   :  { %v2278_v39 = vadd.f32 1.0, %v2801_v25 }
0x3961   :  { %2802 = vrcp.f32 %v2278_v39  ;;  %v2344_v63 = vpop.f32.mrf.mxu3  ;;  %v2290_v40 = vand.u32 2147483648, %v2278_v39  ;;  %v2288_v37 = vand.u32 2147483647, %v2278_v39  ;;  %vm2284_vm15 = vweird.f32 %v2278_v39 }
0x3962   :  { %v2370_v35 = vadd.f32 %v2344_v63, %v3221_v20 }
0x3963   :  { %v2291_v47 = vor.u32 1.1754944e-38, %v2290_v40  ;;  %vm2289_vm2 = vcmp.eq.f32.partialorder %v2288_v37, 8.507059e+37 }
0x3967   :  { %v2803_v53 = vpop.eup %2802 }
0x3968   :  { %v2280_v9 = vmul.f32 %v2803_v53, %v2278_v39  ;;  %vm2285_vm14 = vweird.f32 %v2803_v53 }
0x3969   :  { %v2346_v2 = vpop.f32.mrf.mxu3  ;;  %vm2286_vm1 = vmor %vm2284_vm15, %vm2285_vm14 }
0x396a   :  { %v2281_v12 = vsub.f32 1.0, %v2280_v9 }
0x396c   :  { %v2282_v15 = vmul.f32 %v2803_v53, %v2281_v12 }
0x396e   :  { %v2283_v8 = vadd.f32 %v2803_v53, %v2282_v15 }
0x3970   :  { %v2287_v55 = vsel %vm2286_vm1, %v2803_v53, %v2283_v8 }
0x3971   :  { %v2292_v33 = vsel %vm2289_vm2, %v2291_v47, %v2287_v55 }
0x3972   :  { %v2300_v61 = vmul.f32 %v2298_v0, %v2292_v33  ;;  %v2307_v5 = vsub.f32 1.0, %v2292_v33  ;;  %v2313_v21 = vmul.f32 %v2292_v33, %v3859_v54 }
0x3974   :  { %2302 = vrot.lane.b32.xlu2 %v2300_v61, %s2961_s14 }
0x397c   :  { %2372 = vrot.lane.b32.xlu2 %v2370_v35, %s2961_s14 }
0x39ce   :  { %v2303_v31 = vpop.permute.xlu2 %2302 }
0x39cf   :  { %v2305_v29 = vadd.f32 %v2303_v31, %v2294_v17 }
0x39d1   :  { %2804 = vtanh.f32 %v2305_v29 }
0x39d7   :  { %v2805_v49 = vpop.eup %2804 }
0x39d8   :  { %2309 = vrot.lane.b32.xlu0 %v2805_v49, %s2963_s27 }
0x3a4a   :  { %v2310_v59 = vpop.permute.xlu0 %2309 }
0x3a4b   :  { %v2312_v24 = vmul.f32 %v2310_v59, %v2307_v5 }
0x3a4d   :  { %v2314_v10 = vadd.f32 %v2313_v21, %v2312_v24 }
0x3a4f   :  { %v2315_v46 = vpack.c.bf16 %v2314_v10, %v2314_v10 }
0x3a51   :  { %2317 = vrot.lane.b32.xlu1 %v2315_v46, %s2963_s27 }
0x3ac3   :  { %v2318_v20 = vpop.permute.xlu1 %2317 }
0x3ac4   :  { %2622 = vmatmul.msk.bf16.vlgmr.msrb.gmra.mxu2 %vm226_vm0, %v2318_v20 }
0x3b47   :  { %v2331_v26 = vpop.f32.mrf.mxu2 }
0x3b48   :  { %v2348_v45 = vadd.f32 %v2344_v63, %v2331_v26  ;;  %v2369_v48 = vadd.f32 %v2331_v26, %v3249_v52 }
0x3b4a   :  { %v2349_v27 = vadd.f32 %v3875_v62, %v2348_v45  ;;  %v2373_v62 = vpop.permute.xlu2 %2372 }
0x3b4c   :  { %v2624_v11 = vmul.f32 -1.442695, %v2349_v27 }
0x3b4e   :  { %2806 = vpow2.f32 %v2624_v11 }
0x3b4f   :  { %v2333_v44 = vpop.f32.mrf.mxu2 }
0x3b54   :  { %v2807_v6 = vpop.eup %2806 }
0x3b55   :  { %v2353_v22 = vadd.f32 1.0, %v2807_v6 }
0x3b57   :  { %2808 = vrcp.f32 %v2353_v22  ;;  %v2365_v3 = vand.u32 2147483648, %v2353_v22  ;;  %v2363_v28 = vand.u32 2147483647, %v2353_v22  ;;  %vm2359_vm4 = vweird.f32 %v2353_v22 }
0x3b59   :  { %v2366_v13 = vor.u32 1.1754944e-38, %v2365_v3  ;;  %vm2364_vm6 = vcmp.eq.f32.partialorder %v2363_v28, 8.507059e+37 }
0x3b5d   :  { %v2809_v42 = vpop.eup %2808 }
0x3b5e   :  { %v2355_v54 = vmul.f32 %v2809_v42, %v2353_v22  ;;  %vm2360_vm3 = vweird.f32 %v2809_v42 }
0x3b5f   :  { %vm2361_vm5 = vmor %vm2359_vm4, %vm2360_vm3 }
0x3b60   :  { %v2356_v14 = vsub.f32 1.0, %v2355_v54 }
0x3b62   :  { %v2357_v16 = vmul.f32 %v2809_v42, %v2356_v14 }
0x3b64   :  { %v2358_v19 = vadd.f32 %v2809_v42, %v2357_v16 }
0x3b66   :  { %v2362_v60 = vsel %vm2361_vm5, %v2809_v42, %v2358_v19 }
0x3b67   :  { %v2367_v1 = vsel %vm2364_vm6, %v2366_v13, %v2362_v60 }
0x3b68   :  { %v2375_v56 = vmul.f32 %v2373_v62, %v2367_v1  ;;  %v2382_v34 = vsub.f32 1.0, %v2367_v1  ;;  %v2388_v38 = vmul.f32 %v2367_v1, %v3884_v23 }
0x3b6a   :  { %2377 = vrot.lane.b32.xlu0 %v2375_v56, %s2961_s14 }
0x3bdc   :  { %v2378_v4 = vpop.permute.xlu0 %2377 }
0x3bdd   :  { %v2380_v57 = vadd.f32 %v2378_v4, %v2369_v48 }
0x3bdf   :  { %2810 = vtanh.f32 %v2380_v57 }
0x3be5   :  { %v2811_v51 = vpop.eup %2810 }
0x3be6   :  { %2384 = vrot.lane.b32.xlu1 %v2811_v51, %s2963_s27 }
0x3c58   :  { %v2385_v18 = vpop.permute.xlu1 %2384 }
0x3c59   :  { %v2387_v58 = vmul.f32 %v2385_v18, %v2382_v34 }
0x3c5b   :  { %v2389_v7 = vadd.f32 %v2388_v38, %v2387_v58 }
0x3c5d   :  { %v2390_v41 = vpack.c.bf16 %v2389_v7, %v2389_v7 }
0x3c5f   :  { %2392 = vrot.lane.b32.xlu2 %v2390_v41, %s2963_s27 }
0x3cb9   :  { %v2393_v32 = vpop.permute.xlu2 %2392 }
0x3cba   :  { %2625 = vmatmul.msk.bf16.vlgmr.msra.gmra.mxu0 %vm226_vm0, %v2393_v32 }
0x3d37   :  { %v2406_v52 = vpop.f32.mrf.mxu0 }
0x3d38   :  { %v2407_v43 = vadd.f32 %v3903_v30, %v2406_v52 }
0x3d3a   :  { %2411 = vst [vmem:[#allocation8 + $0x38] sm:$0xff] %v2407_v43 }
0x3d3b   :  { %2424 = dma.vmem_to_hbm [thread:$0]  %s2417_s8, 1024, %s2419_s6, [#allocation4], %s2958_s21, %s2958_s21, %s2959_s22  }
0x3d3f   :  { %v2408_v23 = vpop.f32.mrf.mxu0 }
0x3d40   :  { %2952 = dma.done.wait [#allocation4], 1024  }
0x3d41   :  { %2953 = vsyncadd [#allocation4], 4294966272 }
0x3d42   :  { %2429 = vsyncpa [#allocation3], 1 }
0x3d43   :  { %2430 = vsyncpa [#allocation6], 1 }
0x3d44   :  { %2431 = vsyncpa [#allocation4], 1 }

</bundles_post_ra>
